<compile_context>
chip_gen: v7x
topology: tpu7x:2x2x1
jax: 0.10.0
libtpu: 0.0.40
codegen_flags: <defaults>
</compile_context>

<pallas_src>
import jax
import jax.numpy as jnp
from jax import lax
from jax.experimental import pallas as pl
from jax.experimental.pallas import tpu as pltpu


# --------------------------- fused RNN kernel --------------------------------
def _rnn_fused_kernel(lens_ref, x_ref,
                      wih0f_ref, b0f_ref, whh0f_ref,
                      wih0b_ref, b0b_ref, whh0b_ref,
                      wih1fa_ref, wih1fb_ref, b1f_ref, whh1f_ref,
                      wih1ba_ref, wih1bb_ref, b1b_ref, whh1b_ref,
                      w1a_ref, w1b_ref, bb1_ref, w2_ref, bb2_ref,
                      o_ref,
                      g0f_sc, g0b_sc, h0f_sc, h0b_sc, g1f_sc, g1b_sc):
    T, B, H = x_ref.shape
    f32 = jnp.float32
    lens = lens_ref[...]                              # (B, 1) int32

    def lstm_cell(gates, h, c, m):
        # gates: (B, 4H) pre-activations, PyTorch gate order (i, f, g, o).
        sig = jax.nn.sigmoid(gates)                   # full-vreg EUP sigmoid
        i_g = sig[:, 0 * H:1 * H]
        f_g = sig[:, 1 * H:2 * H]
        o_g = sig[:, 3 * H:4 * H]
        g_g = jnp.tanh(gates[:, 2 * H:3 * H])
        c_new = f_g * c + i_g * g_g
        h_new = o_g * jnp.tanh(c_new)
        # packed-sequence semantics: state only advances while t < len[b]
        return jnp.where(m, h_new, h), jnp.where(m, c_new, c)

    # ---- Layer 0: hoisted input projection (independent of the h-carry) ----
    wih0f = wih0f_ref[...]; b0f = b0f_ref[...]
    wih0b = wih0b_ref[...]; b0b = b0b_ref[...]
    for t in range(T):                                # static unroll, tiny T
        x_t = x_ref[t]                                # (B, H)
        g0f_sc[t] = jnp.dot(x_t, wih0f, preferred_element_type=f32) + b0f
        g0b_sc[t] = jnp.dot(x_t, wih0b, preferred_element_type=f32) + b0b

    # ---- Layer 0 recurrence: fwd + bwd fused in one unrolled loop ----------
    whh0f = whh0f_ref[...]; whh0b = whh0b_ref[...]
    zeros = jnp.zeros((B, H), f32)

    def l0_body(t, carry):
        hf, cf, hb, cb = carry
        tb = T - 1 - t                                # backward time index
        mf = t < lens
        mb = tb < lens
        gf = g0f_sc[t] + jnp.dot(hf, whh0f, preferred_element_type=f32)
        hf, cf = lstm_cell(gf, hf, cf, mf)
        gb = g0b_sc[tb] + jnp.dot(hb, whh0b, preferred_element_type=f32)
        hb, cb = lstm_cell(gb, hb, cb, mb)
        # zero at padded steps, like pad_packed_sequence
        h0f_sc[t] = jnp.where(mf, hf, 0.0)
        h0b_sc[tb] = jnp.where(mb, hb, 0.0)
        return hf, cf, hb, cb

    _ = lax.fori_loop(0, T, l0_body, (zeros, zeros, zeros, zeros), unroll=True)

    # ---- Layer 1: hoisted input projection (reads layer-0 VMEM scratch) ----
    # W_ih of layer 1 is split into the rows acting on the fwd / bwd halves of
    # the (2H) layer-0 feature, so no concatenation is needed.
    wih1fa = wih1fa_ref[...]; wih1fb = wih1fb_ref[...]; b1f = b1f_ref[...]
    wih1ba = wih1ba_ref[...]; wih1bb = wih1bb_ref[...]; b1b = b1b_ref[...]
    for t in range(T):
        hft = h0f_sc[t]
        hbt = h0b_sc[t]
        g1f_sc[t] = (jnp.dot(hft, wih1fa, preferred_element_type=f32)
                     + jnp.dot(hbt, wih1fb, preferred_element_type=f32) + b1f)
        g1b_sc[t] = (jnp.dot(hft, wih1ba, preferred_element_type=f32)
                     + jnp.dot(hbt, wih1bb, preferred_element_type=f32) + b1b)

    # ---- Layer 1 recurrence --------------------------------------------------
    whh1f = whh1f_ref[...]; whh1b = whh1b_ref[...]

    def l1_body(t, carry):
        hf, cf, hb, cb = carry
        tb = T - 1 - t
        mf = t < lens
        mb = tb < lens
        gf = g1f_sc[t] + jnp.dot(hf, whh1f, preferred_element_type=f32)
        hf, cf = lstm_cell(gf, hf, cf, mf)
        gb = g1b_sc[tb] + jnp.dot(hb, whh1b, preferred_element_type=f32)
        hb, cb = lstm_cell(gb, hb, cb, mb)
        return hf, cf, hb, cb

    h1f, _, h1b, _ = lax.fori_loop(
        0, T, l1_body, (zeros, zeros, zeros, zeros), unroll=True)

    # ---- Fused MLP head: cat(ht[-2], ht[-1]) -> Linear -> ReLU -> Linear ----
    hid = (jnp.dot(h1f, w1a_ref[...], preferred_element_type=f32)
           + jnp.dot(h1b, w1b_ref[...], preferred_element_type=f32)
           + bb1_ref[...])
    hid = jnp.maximum(hid, 0.0)
    o_ref[...] = (jnp.dot(hid, w2_ref[...], preferred_element_type=f32)
                  + bb2_ref[...])


# ------------------------------ Full forward ---------------------------------
def rnn_forward(params, texts, lens):
    emb = params["embedding"][texts]                  # (B, T, H) gather (XLA glue)
    B, T, H = emb.shape
    x = jnp.transpose(emb, (1, 0, 2))                 # time-major (T, B, H)
    lens2d = lens.reshape(B, 1).astype(jnp.int32)

    wih0f, whh0f, b0f = params["l0_fwd"]
    wih0b, whh0b, b0b = params["l0_bwd"]
    wih1f, whh1f, b1f = params["l1_fwd"]
    wih1b, whh1b, b1b = params["l1_bwd"]
    w1, bb1, w2, bb2 = params["mlp"]
    out_dim = w2.shape[1]

    return pl.pallas_call(
        _rnn_fused_kernel,
        out_shape=jax.ShapeDtypeStruct((B, out_dim), jnp.float32),
        scratch_shapes=[
            pltpu.VMEM((T, B, 4 * H), jnp.float32),   # layer-0 fwd input proj
            pltpu.VMEM((T, B, 4 * H), jnp.float32),   # layer-0 bwd input proj
            pltpu.VMEM((T, B, H), jnp.float32),       # layer-0 fwd per-step h
            pltpu.VMEM((T, B, H), jnp.float32),       # layer-0 bwd per-step h
            pltpu.VMEM((T, B, 4 * H), jnp.float32),   # layer-1 fwd input proj
            pltpu.VMEM((T, B, 4 * H), jnp.float32),   # layer-1 bwd input proj
        ],
    )(lens2d, x,
      wih0f, b0f, whh0f,
      wih0b, b0b, whh0b,
      wih1f[:H], wih1f[H:], b1f, whh1f,
      wih1b[:H], wih1b[H:], b1b, whh1b,
      w1[:H], w1[H:], bb1, w2, bb2)


# ------------------------------ Param init ------------------------------------
def init_params(key, hidden_dim, vocab, out_dim):
    H = hidden_dim
    keys = iter(jax.random.split(key, 32))

    def dense(shape, scale=0.1):
        return (scale * jax.random.normal(next(keys), shape)).astype(jnp.float32)

    def lstm_dir(din):
        return (dense((din, 4 * H)),      # W_ih^T, gate order (i, f, g, o)
                dense((H, 4 * H)),        # W_hh^T
                dense((1, 4 * H)))        # b_ih + b_hh combined

    return {
        "embedding": dense((vocab, H)),
        "l0_fwd": lstm_dir(H),
        "l0_bwd": lstm_dir(H),
        "l1_fwd": lstm_dir(2 * H),
        "l1_bwd": lstm_dir(2 * H),
        "mlp": (dense((2 * H, H)), dense((1, H)),
                dense((H, out_dim)), dense((1, out_dim))),
    }


if __name__ == "__main__":
    hidden_dim, vocab, out_dim = 32, 50, 4
    B, T = 2, 8

    key = jax.random.PRNGKey(0)
    k_param, k_text = jax.random.split(key)
    params = init_params(k_param, hidden_dim, vocab, out_dim)

    texts = jax.random.randint(k_text, (B, T), 0, vocab, dtype=jnp.int32)
    lens = jnp.array([8, 5], dtype=jnp.int32)   # variable lengths (packed semantics)

    out = jax.jit(rnn_forward)(params, texts, lens)
    jax.block_until_ready(out)
    assert out.shape == (B, out_dim) and out.dtype == jnp.float32
    print("KERNEL_OK")
</pallas_src>

<mosaic_0001>
module attributes {stable_mosaic.version = 11 : i64} {
  func.func @_rnn_fused_kernel(%arg0: memref<2x1xi32, #tpu.memory_space<vmem>>, %arg1: memref<8x2x32xf32, #tpu.memory_space<vmem>>, %arg2: memref<32x128xf32, #tpu.memory_space<vmem>>, %arg3: memref<1x128xf32, #tpu.memory_space<vmem>>, %arg4: memref<32x128xf32, #tpu.memory_space<vmem>>, %arg5: memref<32x128xf32, #tpu.memory_space<vmem>>, %arg6: memref<1x128xf32, #tpu.memory_space<vmem>>, %arg7: memref<32x128xf32, #tpu.memory_space<vmem>>, %arg8: memref<32x128xf32, #tpu.memory_space<vmem>>, %arg9: memref<32x128xf32, #tpu.memory_space<vmem>>, %arg10: memref<1x128xf32, #tpu.memory_space<vmem>>, %arg11: memref<32x128xf32, #tpu.memory_space<vmem>>, %arg12: memref<32x128xf32, #tpu.memory_space<vmem>>, %arg13: memref<32x128xf32, #tpu.memory_space<vmem>>, %arg14: memref<1x128xf32, #tpu.memory_space<vmem>>, %arg15: memref<32x128xf32, #tpu.memory_space<vmem>>, %arg16: memref<32x32xf32, #tpu.memory_space<vmem>>, %arg17: memref<32x32xf32, #tpu.memory_space<vmem>>, %arg18: memref<1x32xf32, #tpu.memory_space<vmem>>, %arg19: memref<32x4xf32, #tpu.memory_space<vmem>>, %arg20: memref<1x4xf32, #tpu.memory_space<vmem>>, %arg21: memref<2x4xf32, #tpu.memory_space<vmem>>, %arg22: memref<8x2x128xf32, #tpu.memory_space<vmem>>, %arg23: memref<8x2x128xf32, #tpu.memory_space<vmem>>, %arg24: memref<8x2x32xf32, #tpu.memory_space<vmem>>, %arg25: memref<8x2x32xf32, #tpu.memory_space<vmem>>, %arg26: memref<8x2x128xf32, #tpu.memory_space<vmem>>, %arg27: memref<8x2x128xf32, #tpu.memory_space<vmem>>) attributes {dimension_semantics = [], scalar_prefetch = 0 : i64, scratch_operands = 6 : i64, tpu.core_type = #tpu.core_type<tc>} {
    %c0 = arith.constant 0 : index
    %c0_0 = arith.constant 0 : index
    %0 = vector.load %arg0[%c0, %c0_0] : memref<2x1xi32, #tpu.memory_space<vmem>>, vector<2x1xi32>
    %c0_1 = arith.constant 0 : index
    %c0_2 = arith.constant 0 : index
    %1 = vector.load %arg2[%c0_1, %c0_2] : memref<32x128xf32, #tpu.memory_space<vmem>>, vector<32x128xf32>
    %c0_3 = arith.constant 0 : index
    %c0_4 = arith.constant 0 : index
    %2 = vector.load %arg3[%c0_3, %c0_4] : memref<1x128xf32, #tpu.memory_space<vmem>>, vector<1x128xf32>
    %c0_5 = arith.constant 0 : index
    %c0_6 = arith.constant 0 : index
    %3 = vector.load %arg5[%c0_5, %c0_6] : memref<32x128xf32, #tpu.memory_space<vmem>>, vector<32x128xf32>
    %c0_7 = arith.constant 0 : index
    %c0_8 = arith.constant 0 : index
    %4 = vector.load %arg6[%c0_7, %c0_8] : memref<1x128xf32, #tpu.memory_space<vmem>>, vector<1x128xf32>
    %c0_9 = arith.constant 0 : index
    %c0_10 = arith.constant 0 : index
    %c0_11 = arith.constant 0 : index
    %5 = vector.load %arg1[%c0_9, %c0_10, %c0_11] : memref<8x2x32xf32, #tpu.memory_space<vmem>>, vector<1x2x32xf32>
    %6 = vector.shape_cast %5 : vector<1x2x32xf32> to vector<2x32xf32>
    %cst = arith.constant dense<0.000000e+00> : vector<2x128xf32>
    %7 = tpu.matmul %6, %1, %cst {dimension_numbers = #tpu.dot_dimension_numbers<[1], [0], [0], [1], [0, 0, 1, 1], [], []>} : vector<2x32xf32>, vector<32x128xf32>, vector<2x128xf32> -> vector<2x128xf32>
    %8 = vector.broadcast %2 : vector<1x128xf32> to vector<2x128xf32>
    %9 = arith.addf %7, %8 : vector<2x128xf32>
    %c0_12 = arith.constant 0 : index
    %c0_13 = arith.constant 0 : index
    %c0_14 = arith.constant 0 : index
    %10 = vector.load %arg22[%c0_12, %c0_13, %c0_14] : memref<8x2x128xf32, #tpu.memory_space<vmem>>, vector<1x2x128xf32>
    %11 = vector.shape_cast %10 : vector<1x2x128xf32> to vector<2x128xf32>
    %12 = vector.shape_cast %9 : vector<2x128xf32> to vector<1x2x128xf32>
    tpu.vector_store %arg22[%c0_12, %c0_13, %c0_14], %12 {strides = array<i32>} : memref<8x2x128xf32, #tpu.memory_space<vmem>>, vector<1x2x128xf32>,
    %cst_15 = arith.constant dense<0.000000e+00> : vector<2x128xf32>
    %13 = tpu.matmul %6, %3, %cst_15 {dimension_numbers = #tpu.dot_dimension_numbers<[1], [0], [0], [1], [0, 0, 1, 1], [], []>} : vector<2x32xf32>, vector<32x128xf32>, vector<2x128xf32> -> vector<2x128xf32>
    %14 = vector.broadcast %4 : vector<1x128xf32> to vector<2x128xf32>
    %15 = arith.addf %13, %14 : vector<2x128xf32>
    %c0_16 = arith.constant 0 : index
    %c0_17 = arith.constant 0 : index
    %c0_18 = arith.constant 0 : index
    %16 = vector.load %arg23[%c0_16, %c0_17, %c0_18] : memref<8x2x128xf32, #tpu.memory_space<vmem>>, vector<1x2x128xf32>
    %17 = vector.shape_cast %16 : vector<1x2x128xf32> to vector<2x128xf32>
    %18 = vector.shape_cast %15 : vector<2x128xf32> to vector<1x2x128xf32>
    tpu.vector_store %arg23[%c0_16, %c0_17, %c0_18], %18 {strides = array<i32>} : memref<8x2x128xf32, #tpu.memory_space<vmem>>, vector<1x2x128xf32>,
    %c1 = arith.constant 1 : index
    %c0_19 = arith.constant 0 : index
    %c0_20 = arith.constant 0 : index
    %19 = vector.load %arg1[%c1, %c0_19, %c0_20] : memref<8x2x32xf32, #tpu.memory_space<vmem>>, vector<1x2x32xf32>
    %20 = vector.shape_cast %19 : vector<1x2x32xf32> to vector<2x32xf32>
    %cst_21 = arith.constant dense<0.000000e+00> : vector<2x128xf32>
    %21 = tpu.matmul %20, %1, %cst_21 {dimension_numbers = #tpu.dot_dimension_numbers<[1], [0], [0], [1], [0, 0, 1, 1], [], []>} : vector<2x32xf32>, vector<32x128xf32>, vector<2x128xf32> -> vector<2x128xf32>
    %22 = vector.broadcast %2 : vector<1x128xf32> to vector<2x128xf32>
    %23 = arith.addf %21, %22 : vector<2x128xf32>
    %c1_22 = arith.constant 1 : index
    %c0_23 = arith.constant 0 : index
    %c0_24 = arith.constant 0 : index
    %24 = vector.load %arg22[%c1_22, %c0_23, %c0_24] : memref<8x2x128xf32, #tpu.memory_space<vmem>>, vector<1x2x128xf32>
    %25 = vector.shape_cast %24 : vector<1x2x128xf32> to vector<2x128xf32>
    %26 = vector.shape_cast %23 : vector<2x128xf32> to vector<1x2x128xf32>
    tpu.vector_store %arg22[%c1_22, %c0_23, %c0_24], %26 {strides = array<i32>} : memref<8x2x128xf32, #tpu.memory_space<vmem>>, vector<1x2x128xf32>,
    %cst_25 = arith.constant dense<0.000000e+00> : vector<2x128xf32>
    %27 = tpu.matmul %20, %3, %cst_25 {dimension_numbers = #tpu.dot_dimension_numbers<[1], [0], [0], [1], [0, 0, 1, 1], [], []>} : vector<2x32xf32>, vector<32x128xf32>, vector<2x128xf32> -> vector<2x128xf32>
    %28 = vector.broadcast %4 : vector<1x128xf32> to vector<2x128xf32>
    %29 = arith.addf %27, %28 : vector<2x128xf32>
    %c1_26 = arith.constant 1 : index
    %c0_27 = arith.constant 0 : index
    %c0_28 = arith.constant 0 : index
    %30 = vector.load %arg23[%c1_26, %c0_27, %c0_28] : memref<8x2x128xf32, #tpu.memory_space<vmem>>, vector<1x2x128xf32>
    %31 = vector.shape_cast %30 : vector<1x2x128xf32> to vector<2x128xf32>
    %32 = vector.shape_cast %29 : vector<2x128xf32> to vector<1x2x128xf32>
    tpu.vector_store %arg23[%c1_26, %c0_27, %c0_28], %32 {strides = array<i32>} : memref<8x2x128xf32, #tpu.memory_space<vmem>>, vector<1x2x128xf32>,
    %c2 = arith.constant 2 : index
    %c0_29 = arith.constant 0 : index
    %c0_30 = arith.constant 0 : index
    %33 = vector.load %arg1[%c2, %c0_29, %c0_30] : memref<8x2x32xf32, #tpu.memory_space<vmem>>, vector<1x2x32xf32>
    %34 = vector.shape_cast %33 : vector<1x2x32xf32> to vector<2x32xf32>
    %cst_31 = arith.constant dense<0.000000e+00> : vector<2x128xf32>
    %35 = tpu.matmul %34, %1, %cst_31 {dimension_numbers = #tpu.dot_dimension_numbers<[1], [0], [0], [1], [0, 0, 1, 1], [], []>} : vector<2x32xf32>, vector<32x128xf32>, vector<2x128xf32> -> vector<2x128xf32>
    %36 = vector.broadcast %2 : vector<1x128xf32> to vector<2x128xf32>
    %37 = arith.addf %35, %36 : vector<2x128xf32>
    %c2_32 = arith.constant 2 : index
    %c0_33 = arith.constant 0 : index
    %c0_34 = arith.constant 0 : index
    %38 = vector.load %arg22[%c2_32, %c0_33, %c0_34] : memref<8x2x128xf32, #tpu.memory_space<vmem>>, vector<1x2x128xf32>
    %39 = vector.shape_cast %38 : vector<1x2x128xf32> to vector<2x128xf32>
    %40 = vector.shape_cast %37 : vector<2x128xf32> to vector<1x2x128xf32>
    tpu.vector_store %arg22[%c2_32, %c0_33, %c0_34], %40 {strides = array<i32>} : memref<8x2x128xf32, #tpu.memory_space<vmem>>, vector<1x2x128xf32>,
    %cst_35 = arith.constant dense<0.000000e+00> : vector<2x128xf32>
    %41 = tpu.matmul %34, %3, %cst_35 {dimension_numbers = #tpu.dot_dimension_numbers<[1], [0], [0], [1], [0, 0, 1, 1], [], []>} : vector<2x32xf32>, vector<32x128xf32>, vector<2x128xf32> -> vector<2x128xf32>
    %42 = vector.broadcast %4 : vector<1x128xf32> to vector<2x128xf32>
    %43 = arith.addf %41, %42 : vector<2x128xf32>
    %c2_36 = arith.constant 2 : index
    %c0_37 = arith.constant 0 : index
    %c0_38 = arith.constant 0 : index
    %44 = vector.load %arg23[%c2_36, %c0_37, %c0_38] : memref<8x2x128xf32, #tpu.memory_space<vmem>>, vector<1x2x128xf32>
    %45 = vector.shape_cast %44 : vector<1x2x128xf32> to vector<2x128xf32>
    %46 = vector.shape_cast %43 : vector<2x128xf32> to vector<1x2x128xf32>
    tpu.vector_store %arg23[%c2_36, %c0_37, %c0_38], %46 {strides = array<i32>} : memref<8x2x128xf32, #tpu.memory_space<vmem>>, vector<1x2x128xf32>,
    %c3 = arith.constant 3 : index
    %c0_39 = arith.constant 0 : index
    %c0_40 = arith.constant 0 : index
    %47 = vector.load %arg1[%c3, %c0_39, %c0_40] : memref<8x2x32xf32, #tpu.memory_space<vmem>>, vector<1x2x32xf32>
    %48 = vector.shape_cast %47 : vector<1x2x32xf32> to vector<2x32xf32>
    %cst_41 = arith.constant dense<0.000000e+00> : vector<2x128xf32>
    %49 = tpu.matmul %48, %1, %cst_41 {dimension_numbers = #tpu.dot_dimension_numbers<[1], [0], [0], [1], [0, 0, 1, 1], [], []>} : vector<2x32xf32>, vector<32x128xf32>, vector<2x128xf32> -> vector<2x128xf32>
    %50 = vector.broadcast %2 : vector<1x128xf32> to vector<2x128xf32>
    %51 = arith.addf %49, %50 : vector<2x128xf32>
    %c3_42 = arith.constant 3 : index
    %c0_43 = arith.constant 0 : index
    %c0_44 = arith.constant 0 : index
    %52 = vector.load %arg22[%c3_42, %c0_43, %c0_44] : memref<8x2x128xf32, #tpu.memory_space<vmem>>, vector<1x2x128xf32>
    %53 = vector.shape_cast %52 : vector<1x2x128xf32> to vector<2x128xf32>
    %54 = vector.shape_cast %51 : vector<2x128xf32> to vector<1x2x128xf32>
    tpu.vector_store %arg22[%c3_42, %c0_43, %c0_44], %54 {strides = array<i32>} : memref<8x2x128xf32, #tpu.memory_space<vmem>>, vector<1x2x128xf32>,
    %cst_45 = arith.constant dense<0.000000e+00> : vector<2x128xf32>
    %55 = tpu.matmul %48, %3, %cst_45 {dimension_numbers = #tpu.dot_dimension_numbers<[1], [0], [0], [1], [0, 0, 1, 1], [], []>} : vector<2x32xf32>, vector<32x128xf32>, vector<2x128xf32> -> vector<2x128xf32>
    %56 = vector.broadcast %4 : vector<1x128xf32> to vector<2x128xf32>
    %57 = arith.addf %55, %56 : vector<2x128xf32>
    %c3_46 = arith.constant 3 : index
    %c0_47 = arith.constant 0 : index
    %c0_48 = arith.constant 0 : index
    %58 = vector.load %arg23[%c3_46, %c0_47, %c0_48] : memref<8x2x128xf32, #tpu.memory_space<vmem>>, vector<1x2x128xf32>
    %59 = vector.shape_cast %58 : vector<1x2x128xf32> to vector<2x128xf32>
    %60 = vector.shape_cast %57 : vector<2x128xf32> to vector<1x2x128xf32>
    tpu.vector_store %arg23[%c3_46, %c0_47, %c0_48], %60 {strides = array<i32>} : memref<8x2x128xf32, #tpu.memory_space<vmem>>, vector<1x2x128xf32>,
    %c4 = arith.constant 4 : index
    %c0_49 = arith.constant 0 : index
    %c0_50 = arith.constant 0 : index
    %61 = vector.load %arg1[%c4, %c0_49, %c0_50] : memref<8x2x32xf32, #tpu.memory_space<vmem>>, vector<1x2x32xf32>
    %62 = vector.shape_cast %61 : vector<1x2x32xf32> to vector<2x32xf32>
    %cst_51 = arith.constant dense<0.000000e+00> : vector<2x128xf32>
    %63 = tpu.matmul %62, %1, %cst_51 {dimension_numbers = #tpu.dot_dimension_numbers<[1], [0], [0], [1], [0, 0, 1, 1], [], []>} : vector<2x32xf32>, vector<32x128xf32>, vector<2x128xf32> -> vector<2x128xf32>
    %64 = vector.broadcast %2 : vector<1x128xf32> to vector<2x128xf32>
    %65 = arith.addf %63, %64 : vector<2x128xf32>
    %c4_52 = arith.constant 4 : index
    %c0_53 = arith.constant 0 : index
    %c0_54 = arith.constant 0 : index
    %66 = vector.load %arg22[%c4_52, %c0_53, %c0_54] : memref<8x2x128xf32, #tpu.memory_space<vmem>>, vector<1x2x128xf32>
    %67 = vector.shape_cast %66 : vector<1x2x128xf32> to vector<2x128xf32>
    %68 = vector.shape_cast %65 : vector<2x128xf32> to vector<1x2x128xf32>
    tpu.vector_store %arg22[%c4_52, %c0_53, %c0_54], %68 {strides = array<i32>} : memref<8x2x128xf32, #tpu.memory_space<vmem>>, vector<1x2x128xf32>,
    %cst_55 = arith.constant dense<0.000000e+00> : vector<2x128xf32>
    %69 = tpu.matmul %62, %3, %cst_55 {dimension_numbers = #tpu.dot_dimension_numbers<[1], [0], [0], [1], [0, 0, 1, 1], [], []>} : vector<2x32xf32>, vector<32x128xf32>, vector<2x128xf32> -> vector<2x128xf32>
    %70 = vector.broadcast %4 : vector<1x128xf32> to vector<2x128xf32>
    %71 = arith.addf %69, %70 : vector<2x128xf32>
    %c4_56 = arith.constant 4 : index
    %c0_57 = arith.constant 0 : index
    %c0_58 = arith.constant 0 : index
    %72 = vector.load %arg23[%c4_56, %c0_57, %c0_58] : memref<8x2x128xf32, #tpu.memory_space<vmem>>, vector<1x2x128xf32>
    %73 = vector.shape_cast %72 : vector<1x2x128xf32> to vector<2x128xf32>
    %74 = vector.shape_cast %71 : vector<2x128xf32> to vector<1x2x128xf32>
    tpu.vector_store %arg23[%c4_56, %c0_57, %c0_58], %74 {strides = array<i32>} : memref<8x2x128xf32, #tpu.memory_space<vmem>>, vector<1x2x128xf32>,
    %c5 = arith.constant 5 : index
    %c0_59 = arith.constant 0 : index
    %c0_60 = arith.constant 0 : index
    %75 = vector.load %arg1[%c5, %c0_59, %c0_60] : memref<8x2x32xf32, #tpu.memory_space<vmem>>, vector<1x2x32xf32>
    %76 = vector.shape_cast %75 : vector<1x2x32xf32> to vector<2x32xf32>
    %cst_61 = arith.constant dense<0.000000e+00> : vector<2x128xf32>
    %77 = tpu.matmul %76, %1, %cst_61 {dimension_numbers = #tpu.dot_dimension_numbers<[1], [0], [0], [1], [0, 0, 1, 1], [], []>} : vector<2x32xf32>, vector<32x128xf32>, vector<2x128xf32> -> vector<2x128xf32>
    %78 = vector.broadcast %2 : vector<1x128xf32> to vector<2x128xf32>
    %79 = arith.addf %77, %78 : vector<2x128xf32>
    %c5_62 = arith.constant 5 : index
    %c0_63 = arith.constant 0 : index
    %c0_64 = arith.constant 0 : index
    %80 = vector.load %arg22[%c5_62, %c0_63, %c0_64] : memref<8x2x128xf32, #tpu.memory_space<vmem>>, vector<1x2x128xf32>
    %81 = vector.shape_cast %80 : vector<1x2x128xf32> to vector<2x128xf32>
    %82 = vector.shape_cast %79 : vector<2x128xf32> to vector<1x2x128xf32>
    tpu.vector_store %arg22[%c5_62, %c0_63, %c0_64], %82 {strides = array<i32>} : memref<8x2x128xf32, #tpu.memory_space<vmem>>, vector<1x2x128xf32>,
    %cst_65 = arith.constant dense<0.000000e+00> : vector<2x128xf32>
    %83 = tpu.matmul %76, %3, %cst_65 {dimension_numbers = #tpu.dot_dimension_numbers<[1], [0], [0], [1], [0, 0, 1, 1], [], []>} : vector<2x32xf32>, vector<32x128xf32>, vector<2x128xf32> -> vector<2x128xf32>
    %84 = vector.broadcast %4 : vector<1x128xf32> to vector<2x128xf32>
    %85 = arith.addf %83, %84 : vector<2x128xf32>
    %c5_66 = arith.constant 5 : index
    %c0_67 = arith.constant 0 : index
    %c0_68 = arith.constant 0 : index
    %86 = vector.load %arg23[%c5_66, %c0_67, %c0_68] : memref<8x2x128xf32, #tpu.memory_space<vmem>>, vector<1x2x128xf32>
    %87 = vector.shape_cast %86 : vector<1x2x128xf32> to vector<2x128xf32>
    %88 = vector.shape_cast %85 : vector<2x128xf32> to vector<1x2x128xf32>
    tpu.vector_store %arg23[%c5_66, %c0_67, %c0_68], %88 {strides = array<i32>} : memref<8x2x128xf32, #tpu.memory_space<vmem>>, vector<1x2x128xf32>,
    %c6 = arith.constant 6 : index
    %c0_69 = arith.constant 0 : index
    %c0_70 = arith.constant 0 : index
    %89 = vector.load %arg1[%c6, %c0_69, %c0_70] : memref<8x2x32xf32, #tpu.memory_space<vmem>>, vector<1x2x32xf32>
    %90 = vector.shape_cast %89 : vector<1x2x32xf32> to vector<2x32xf32>
    %cst_71 = arith.constant dense<0.000000e+00> : vector<2x128xf32>
    %91 = tpu.matmul %90, %1, %cst_71 {dimension_numbers = #tpu.dot_dimension_numbers<[1], [0], [0], [1], [0, 0, 1, 1], [], []>} : vector<2x32xf32>, vector<32x128xf32>, vector<2x128xf32> -> vector<2x128xf32>
    %92 = vector.broadcast %2 : vector<1x128xf32> to vector<2x128xf32>
    %93 = arith.addf %91, %92 : vector<2x128xf32>
    %c6_72 = arith.constant 6 : index
    %c0_73 = arith.constant 0 : index
    %c0_74 = arith.constant 0 : index
    %94 = vector.load %arg22[%c6_72, %c0_73, %c0_74] : memref<8x2x128xf32, #tpu.memory_space<vmem>>, vector<1x2x128xf32>
    %95 = vector.shape_cast %94 : vector<1x2x128xf32> to vector<2x128xf32>
    %96 = vector.shape_cast %93 : vector<2x128xf32> to vector<1x2x128xf32>
    tpu.vector_store %arg22[%c6_72, %c0_73, %c0_74], %96 {strides = array<i32>} : memref<8x2x128xf32, #tpu.memory_space<vmem>>, vector<1x2x128xf32>,
    %cst_75 = arith.constant dense<0.000000e+00> : vector<2x128xf32>
    %97 = tpu.matmul %90, %3, %cst_75 {dimension_numbers = #tpu.dot_dimension_numbers<[1], [0], [0], [1], [0, 0, 1, 1], [], []>} : vector<2x32xf32>, vector<32x128xf32>, vector<2x128xf32> -> vector<2x128xf32>
    %98 = vector.broadcast %4 : vector<1x128xf32> to vector<2x128xf32>
    %99 = arith.addf %97, %98 : vector<2x128xf32>
    %c6_76 = arith.constant 6 : index
    %c0_77 = arith.constant 0 : index
    %c0_78 = arith.constant 0 : index
    %100 = vector.load %arg23[%c6_76, %c0_77, %c0_78] : memref<8x2x128xf32, #tpu.memory_space<vmem>>, vector<1x2x128xf32>
    %101 = vector.shape_cast %100 : vector<1x2x128xf32> to vector<2x128xf32>
    %102 = vector.shape_cast %99 : vector<2x128xf32> to vector<1x2x128xf32>
    tpu.vector_store %arg23[%c6_76, %c0_77, %c0_78], %102 {strides = array<i32>} : memref<8x2x128xf32, #tpu.memory_space<vmem>>, vector<1x2x128xf32>,
    %c7 = arith.constant 7 : index
    %c0_79 = arith.constant 0 : index
    %c0_80 = arith.constant 0 : index
    %103 = vector.load %arg1[%c7, %c0_79, %c0_80] : memref<8x2x32xf32, #tpu.memory_space<vmem>>, vector<1x2x32xf32>
    %104 = vector.shape_cast %103 : vector<1x2x32xf32> to vector<2x32xf32>
    %cst_81 = arith.constant dense<0.000000e+00> : vector<2x128xf32>
    %105 = tpu.matmul %104, %1, %cst_81 {dimension_numbers = #tpu.dot_dimension_numbers<[1], [0], [0], [1], [0, 0, 1, 1], [], []>} : vector<2x32xf32>, vector<32x128xf32>, vector<2x128xf32> -> vector<2x128xf32>
    %106 = vector.broadcast %2 : vector<1x128xf32> to vector<2x128xf32>
    %107 = arith.addf %105, %106 : vector<2x128xf32>
    %c7_82 = arith.constant 7 : index
    %c0_83 = arith.constant 0 : index
    %c0_84 = arith.constant 0 : index
    %108 = vector.load %arg22[%c7_82, %c0_83, %c0_84] : memref<8x2x128xf32, #tpu.memory_space<vmem>>, vector<1x2x128xf32>
    %109 = vector.shape_cast %108 : vector<1x2x128xf32> to vector<2x128xf32>
    %110 = vector.shape_cast %107 : vector<2x128xf32> to vector<1x2x128xf32>
    tpu.vector_store %arg22[%c7_82, %c0_83, %c0_84], %110 {strides = array<i32>} : memref<8x2x128xf32, #tpu.memory_space<vmem>>, vector<1x2x128xf32>,
    %cst_85 = arith.constant dense<0.000000e+00> : vector<2x128xf32>
    %111 = tpu.matmul %104, %3, %cst_85 {dimension_numbers = #tpu.dot_dimension_numbers<[1], [0], [0], [1], [0, 0, 1, 1], [], []>} : vector<2x32xf32>, vector<32x128xf32>, vector<2x128xf32> -> vector<2x128xf32>
    %112 = vector.broadcast %4 : vector<1x128xf32> to vector<2x128xf32>
    %113 = arith.addf %111, %112 : vector<2x128xf32>
    %c7_86 = arith.constant 7 : index
    %c0_87 = arith.constant 0 : index
    %c0_88 = arith.constant 0 : index
    %114 = vector.load %arg23[%c7_86, %c0_87, %c0_88] : memref<8x2x128xf32, #tpu.memory_space<vmem>>, vector<1x2x128xf32>
    %115 = vector.shape_cast %114 : vector<1x2x128xf32> to vector<2x128xf32>
    %116 = vector.shape_cast %113 : vector<2x128xf32> to vector<1x2x128xf32>
    tpu.vector_store %arg23[%c7_86, %c0_87, %c0_88], %116 {strides = array<i32>} : memref<8x2x128xf32, #tpu.memory_space<vmem>>, vector<1x2x128xf32>,
    %c0_89 = arith.constant 0 : index
    %c0_90 = arith.constant 0 : index
    %117 = vector.load %arg4[%c0_89, %c0_90] : memref<32x128xf32, #tpu.memory_space<vmem>>, vector<32x128xf32>
    %c0_91 = arith.constant 0 : index
    %c0_92 = arith.constant 0 : index
    %118 = vector.load %arg7[%c0_91, %c0_92] : memref<32x128xf32, #tpu.memory_space<vmem>>, vector<32x128xf32>
    %cst_93 = arith.constant 0.000000e+00 : f32
    %119 = vector.broadcast %cst_93 : f32 to vector<2x32xf32>
    %c0_i32 = arith.constant 0 : i32
    %c7_i32 = arith.constant 7 : i32
    %120 = arith.subi %c7_i32, %c0_i32 : i32
    %121 = vector.broadcast %c0_i32 : i32 to vector<2x1xi32>
    %122 = arith.cmpi slt, %121, %0 : vector<2x1xi32>
    %123 = vector.broadcast %120 : i32 to vector<2x1xi32>
    %124 = arith.cmpi slt, %123, %0 : vector<2x1xi32>
    %125 = arith.index_cast %c0_i32 : i32 to index
    %c0_94 = arith.constant 0 : index
    %c0_95 = arith.constant 0 : index
    %126 = vector.load %arg22[%125, %c0_94, %c0_95] : memref<8x2x128xf32, #tpu.memory_space<vmem>>, vector<1x2x128xf32>
    %127 = vector.shape_cast %126 : vector<1x2x128xf32> to vector<2x128xf32>
    %cst_96 = arith.constant dense<0.000000e+00> : vector<2x128xf32>
    %128 = tpu.matmul %119, %117, %cst_96 {dimension_numbers = #tpu.dot_dimension_numbers<[1], [0], [0], [1], [0, 0, 1, 1], [], []>} : vector<2x32xf32>, vector<32x128xf32>, vector<2x128xf32> -> vector<2x128xf32>
    %129 = arith.addf %127, %128 : vector<2x128xf32>
    %130 = arith.negf %129 : vector<2x128xf32>
    %131 = math.exp %130 : vector<2x128xf32>
    %cst_97 = arith.constant 1.000000e+00 : f32
    %132 = vector.broadcast %cst_97 : f32 to vector<2x128xf32>
    %133 = arith.addf %132, %131 : vector<2x128xf32>
    %134 = arith.divf %132, %133 : vector<2x128xf32>
    %135 = vector.extract_strided_slice %134 {offsets = [0, 0], sizes = [2, 32], strides = [1, 1]} : vector<2x128xf32> to vector<2x32xf32>
    %136 = vector.extract_strided_slice %134 {offsets = [0, 32], sizes = [2, 32], strides = [1, 1]} : vector<2x128xf32> to vector<2x32xf32>
    %137 = vector.extract_strided_slice %134 {offsets = [0, 96], sizes = [2, 32], strides = [1, 1]} : vector<2x128xf32> to vector<2x32xf32>
    %138 = vector.extract_strided_slice %129 {offsets = [0, 64], sizes = [2, 32], strides = [1, 1]} : vector<2x128xf32> to vector<2x32xf32>
    %139 = math.tanh %138 : vector<2x32xf32>
    %140 = arith.mulf %136, %119 : vector<2x32xf32>
    %141 = arith.mulf %135, %139 : vector<2x32xf32>
    %142 = arith.addf %140, %141 : vector<2x32xf32>
    %143 = math.tanh %142 : vector<2x32xf32>
    %144 = arith.mulf %137, %143 : vector<2x32xf32>
    %145 = vector.shape_cast %122 : vector<2x1xi1> to vector<2x1xi1>
    %146 = vector.broadcast %145 : vector<2x1xi1> to vector<2x32xi1>
    %147 = arith.select %146, %144, %119 : vector<2x32xi1>, vector<2x32xf32>
    %148 = vector.shape_cast %122 : vector<2x1xi1> to vector<2x1xi1>
    %149 = vector.broadcast %148 : vector<2x1xi1> to vector<2x32xi1>
    %150 = arith.select %149, %142, %119 : vector<2x32xi1>, vector<2x32xf32>
    %151 = arith.index_cast %120 : i32 to index
    %c0_98 = arith.constant 0 : index
    %c0_99 = arith.constant 0 : index
    %152 = vector.load %arg23[%151, %c0_98, %c0_99] : memref<8x2x128xf32, #tpu.memory_space<vmem>>, vector<1x2x128xf32>
    %153 = vector.shape_cast %152 : vector<1x2x128xf32> to vector<2x128xf32>
    %cst_100 = arith.constant dense<0.000000e+00> : vector<2x128xf32>
    %154 = tpu.matmul %119, %118, %cst_100 {dimension_numbers = #tpu.dot_dimension_numbers<[1], [0], [0], [1], [0, 0, 1, 1], [], []>} : vector<2x32xf32>, vector<32x128xf32>, vector<2x128xf32> -> vector<2x128xf32>
    %155 = arith.addf %153, %154 : vector<2x128xf32>
    %156 = arith.negf %155 : vector<2x128xf32>
    %157 = math.exp %156 : vector<2x128xf32>
    %cst_101 = arith.constant 1.000000e+00 : f32
    %158 = vector.broadcast %cst_101 : f32 to vector<2x128xf32>
    %159 = arith.addf %158, %157 : vector<2x128xf32>
    %160 = arith.divf %158, %159 : vector<2x128xf32>
    %161 = vector.extract_strided_slice %160 {offsets = [0, 0], sizes = [2, 32], strides = [1, 1]} : vector<2x128xf32> to vector<2x32xf32>
    %162 = vector.extract_strided_slice %160 {offsets = [0, 32], sizes = [2, 32], strides = [1, 1]} : vector<2x128xf32> to vector<2x32xf32>
    %163 = vector.extract_strided_slice %160 {offsets = [0, 96], sizes = [2, 32], strides = [1, 1]} : vector<2x128xf32> to vector<2x32xf32>
    %164 = vector.extract_strided_slice %155 {offsets = [0, 64], sizes = [2, 32], strides = [1, 1]} : vector<2x128xf32> to vector<2x32xf32>
    %165 = math.tanh %164 : vector<2x32xf32>
    %166 = arith.mulf %162, %119 : vector<2x32xf32>
    %167 = arith.mulf %161, %165 : vector<2x32xf32>
    %168 = arith.addf %166, %167 : vector<2x32xf32>
    %169 = math.tanh %168 : vector<2x32xf32>
    %170 = arith.mulf %163, %169 : vector<2x32xf32>
    %171 = vector.shape_cast %124 : vector<2x1xi1> to vector<2x1xi1>
    %172 = vector.broadcast %171 : vector<2x1xi1> to vector<2x32xi1>
    %173 = arith.select %172, %170, %119 : vector<2x32xi1>, vector<2x32xf32>
    %174 = vector.shape_cast %124 : vector<2x1xi1> to vector<2x1xi1>
    %175 = vector.broadcast %174 : vector<2x1xi1> to vector<2x32xi1>
    %176 = arith.select %175, %168, %119 : vector<2x32xi1>, vector<2x32xf32>
    %cst_102 = arith.constant 0.000000e+00 : f32
    %177 = vector.shape_cast %122 : vector<2x1xi1> to vector<2x1xi1>
    %178 = vector.broadcast %177 : vector<2x1xi1> to vector<2x32xi1>
    %179 = vector.broadcast %cst_102 : f32 to vector<2x32xf32>
    %180 = arith.select %178, %147, %179 : vector<2x32xi1>, vector<2x32xf32>
    %181 = arith.index_cast %c0_i32 : i32 to index
    %c0_103 = arith.constant 0 : index
    %c0_104 = arith.constant 0 : index
    %182 = vector.load %arg24[%181, %c0_103, %c0_104] : memref<8x2x32xf32, #tpu.memory_space<vmem>>, vector<1x2x32xf32>
    %183 = vector.shape_cast %182 : vector<1x2x32xf32> to vector<2x32xf32>
    %184 = vector.shape_cast %180 : vector<2x32xf32> to vector<1x2x32xf32>
    tpu.vector_store %arg24[%181, %c0_103, %c0_104], %184 {strides = array<i32>} : memref<8x2x32xf32, #tpu.memory_space<vmem>>, vector<1x2x32xf32>,
    %cst_105 = arith.constant 0.000000e+00 : f32
    %185 = vector.shape_cast %124 : vector<2x1xi1> to vector<2x1xi1>
    %186 = vector.broadcast %185 : vector<2x1xi1> to vector<2x32xi1>
    %187 = vector.broadcast %cst_105 : f32 to vector<2x32xf32>
    %188 = arith.select %186, %173, %187 : vector<2x32xi1>, vector<2x32xf32>
    %189 = arith.index_cast %120 : i32 to index
    %c0_106 = arith.constant 0 : index
    %c0_107 = arith.constant 0 : index
    %190 = vector.load %arg25[%189, %c0_106, %c0_107] : memref<8x2x32xf32, #tpu.memory_space<vmem>>, vector<1x2x32xf32>
    %191 = vector.shape_cast %190 : vector<1x2x32xf32> to vector<2x32xf32>
    %192 = vector.shape_cast %188 : vector<2x32xf32> to vector<1x2x32xf32>
    tpu.vector_store %arg25[%189, %c0_106, %c0_107], %192 {strides = array<i32>} : memref<8x2x32xf32, #tpu.memory_space<vmem>>, vector<1x2x32xf32>,
    %c1_i32 = arith.constant 1 : i32
    %c7_i32_108 = arith.constant 7 : i32
    %193 = arith.subi %c7_i32_108, %c1_i32 : i32
    %194 = vector.broadcast %c1_i32 : i32 to vector<2x1xi32>
    %195 = arith.cmpi slt, %194, %0 : vector<2x1xi32>
    %196 = vector.broadcast %193 : i32 to vector<2x1xi32>
    %197 = arith.cmpi slt, %196, %0 : vector<2x1xi32>
    %198 = arith.index_cast %c1_i32 : i32 to index
    %c0_109 = arith.constant 0 : index
    %c0_110 = arith.constant 0 : index
    %199 = vector.load %arg22[%198, %c0_109, %c0_110] : memref<8x2x128xf32, #tpu.memory_space<vmem>>, vector<1x2x128xf32>
    %200 = vector.shape_cast %199 : vector<1x2x128xf32> to vector<2x128xf32>
    %cst_111 = arith.constant dense<0.000000e+00> : vector<2x128xf32>
    %201 = tpu.matmul %147, %117, %cst_111 {dimension_numbers = #tpu.dot_dimension_numbers<[1], [0], [0], [1], [0, 0, 1, 1], [], []>} : vector<2x32xf32>, vector<32x128xf32>, vector<2x128xf32> -> vector<2x128xf32>
    %202 = arith.addf %200, %201 : vector<2x128xf32>
    %203 = arith.negf %202 : vector<2x128xf32>
    %204 = math.exp %203 : vector<2x128xf32>
    %cst_112 = arith.constant 1.000000e+00 : f32
    %205 = vector.broadcast %cst_112 : f32 to vector<2x128xf32>
    %206 = arith.addf %205, %204 : vector<2x128xf32>
    %207 = arith.divf %205, %206 : vector<2x128xf32>
    %208 = vector.extract_strided_slice %207 {offsets = [0, 0], sizes = [2, 32], strides = [1, 1]} : vector<2x128xf32> to vector<2x32xf32>
    %209 = vector.extract_strided_slice %207 {offsets = [0, 32], sizes = [2, 32], strides = [1, 1]} : vector<2x128xf32> to vector<2x32xf32>
    %210 = vector.extract_strided_slice %207 {offsets = [0, 96], sizes = [2, 32], strides = [1, 1]} : vector<2x128xf32> to vector<2x32xf32>
    %211 = vector.extract_strided_slice %202 {offsets = [0, 64], sizes = [2, 32], strides = [1, 1]} : vector<2x128xf32> to vector<2x32xf32>
    %212 = math.tanh %211 : vector<2x32xf32>
    %213 = arith.mulf %209, %150 : vector<2x32xf32>
    %214 = arith.mulf %208, %212 : vector<2x32xf32>
    %215 = arith.addf %213, %214 : vector<2x32xf32>
    %216 = math.tanh %215 : vector<2x32xf32>
    %217 = arith.mulf %210, %216 : vector<2x32xf32>
    %218 = vector.shape_cast %195 : vector<2x1xi1> to vector<2x1xi1>
    %219 = vector.broadcast %218 : vector<2x1xi1> to vector<2x32xi1>
    %220 = arith.select %219, %217, %147 : vector<2x32xi1>, vector<2x32xf32>
    %221 = vector.shape_cast %195 : vector<2x1xi1> to vector<2x1xi1>
    %222 = vector.broadcast %221 : vector<2x1xi1> to vector<2x32xi1>
    %223 = arith.select %222, %215, %150 : vector<2x32xi1>, vector<2x32xf32>
    %224 = arith.index_cast %193 : i32 to index
    %c0_113 = arith.constant 0 : index
    %c0_114 = arith.constant 0 : index
    %225 = vector.load %arg23[%224, %c0_113, %c0_114] : memref<8x2x128xf32, #tpu.memory_space<vmem>>, vector<1x2x128xf32>
    %226 = vector.shape_cast %225 : vector<1x2x128xf32> to vector<2x128xf32>
    %cst_115 = arith.constant dense<0.000000e+00> : vector<2x128xf32>
    %227 = tpu.matmul %173, %118, %cst_115 {dimension_numbers = #tpu.dot_dimension_numbers<[1], [0], [0], [1], [0, 0, 1, 1], [], []>} : vector<2x32xf32>, vector<32x128xf32>, vector<2x128xf32> -> vector<2x128xf32>
    %228 = arith.addf %226, %227 : vector<2x128xf32>
    %229 = arith.negf %228 : vector<2x128xf32>
    %230 = math.exp %229 : vector<2x128xf32>
    %cst_116 = arith.constant 1.000000e+00 : f32
    %231 = vector.broadcast %cst_116 : f32 to vector<2x128xf32>
    %232 = arith.addf %231, %230 : vector<2x128xf32>
    %233 = arith.divf %231, %232 : vector<2x128xf32>
    %234 = vector.extract_strided_slice %233 {offsets = [0, 0], sizes = [2, 32], strides = [1, 1]} : vector<2x128xf32> to vector<2x32xf32>
    %235 = vector.extract_strided_slice %233 {offsets = [0, 32], sizes = [2, 32], strides = [1, 1]} : vector<2x128xf32> to vector<2x32xf32>
    %236 = vector.extract_strided_slice %233 {offsets = [0, 96], sizes = [2, 32], strides = [1, 1]} : vector<2x128xf32> to vector<2x32xf32>
    %237 = vector.extract_strided_slice %228 {offsets = [0, 64], sizes = [2, 32], strides = [1, 1]} : vector<2x128xf32> to vector<2x32xf32>
    %238 = math.tanh %237 : vector<2x32xf32>
    %239 = arith.mulf %235, %176 : vector<2x32xf32>
    %240 = arith.mulf %234, %238 : vector<2x32xf32>
    %241 = arith.addf %239, %240 : vector<2x32xf32>
    %242 = math.tanh %241 : vector<2x32xf32>
    %243 = arith.mulf %236, %242 : vector<2x32xf32>
    %244 = vector.shape_cast %197 : vector<2x1xi1> to vector<2x1xi1>
    %245 = vector.broadcast %244 : vector<2x1xi1> to vector<2x32xi1>
    %246 = arith.select %245, %243, %173 : vector<2x32xi1>, vector<2x32xf32>
    %247 = vector.shape_cast %197 : vector<2x1xi1> to vector<2x1xi1>
    %248 = vector.broadcast %247 : vector<2x1xi1> to vector<2x32xi1>
    %249 = arith.select %248, %241, %176 : vector<2x32xi1>, vector<2x32xf32>
    %cst_117 = arith.constant 0.000000e+00 : f32
    %250 = vector.shape_cast %195 : vector<2x1xi1> to vector<2x1xi1>
    %251 = vector.broadcast %250 : vector<2x1xi1> to vector<2x32xi1>
    %252 = vector.broadcast %cst_117 : f32 to vector<2x32xf32>
    %253 = arith.select %251, %220, %252 : vector<2x32xi1>, vector<2x32xf32>
    %254 = arith.index_cast %c1_i32 : i32 to index
    %c0_118 = arith.constant 0 : index
    %c0_119 = arith.constant 0 : index
    %255 = vector.load %arg24[%254, %c0_118, %c0_119] : memref<8x2x32xf32, #tpu.memory_space<vmem>>, vector<1x2x32xf32>
    %256 = vector.shape_cast %255 : vector<1x2x32xf32> to vector<2x32xf32>
    %257 = vector.shape_cast %253 : vector<2x32xf32> to vector<1x2x32xf32>
    tpu.vector_store %arg24[%254, %c0_118, %c0_119], %257 {strides = array<i32>} : memref<8x2x32xf32, #tpu.memory_space<vmem>>, vector<1x2x32xf32>,
    %cst_120 = arith.constant 0.000000e+00 : f32
    %258 = vector.shape_cast %197 : vector<2x1xi1> to vector<2x1xi1>
    %259 = vector.broadcast %258 : vector<2x1xi1> to vector<2x32xi1>
    %260 = vector.broadcast %cst_120 : f32 to vector<2x32xf32>
    %261 = arith.select %259, %246, %260 : vector<2x32xi1>, vector<2x32xf32>
    %262 = arith.index_cast %193 : i32 to index
    %c0_121 = arith.constant 0 : index
    %c0_122 = arith.constant 0 : index
    %263 = vector.load %arg25[%262, %c0_121, %c0_122] : memref<8x2x32xf32, #tpu.memory_space<vmem>>, vector<1x2x32xf32>
    %264 = vector.shape_cast %263 : vector<1x2x32xf32> to vector<2x32xf32>
    %265 = vector.shape_cast %261 : vector<2x32xf32> to vector<1x2x32xf32>
    tpu.vector_store %arg25[%262, %c0_121, %c0_122], %265 {strides = array<i32>} : memref<8x2x32xf32, #tpu.memory_space<vmem>>, vector<1x2x32xf32>,
    %c2_i32 = arith.constant 2 : i32
    %c7_i32_123 = arith.constant 7 : i32
    %266 = arith.subi %c7_i32_123, %c2_i32 : i32
    %267 = vector.broadcast %c2_i32 : i32 to vector<2x1xi32>
    %268 = arith.cmpi slt, %267, %0 : vector<2x1xi32>
    %269 = vector.broadcast %266 : i32 to vector<2x1xi32>
    %270 = arith.cmpi slt, %269, %0 : vector<2x1xi32>
    %271 = arith.index_cast %c2_i32 : i32 to index
    %c0_124 = arith.constant 0 : index
    %c0_125 = arith.constant 0 : index
    %272 = vector.load %arg22[%271, %c0_124, %c0_125] : memref<8x2x128xf32, #tpu.memory_space<vmem>>, vector<1x2x128xf32>
    %273 = vector.shape_cast %272 : vector<1x2x128xf32> to vector<2x128xf32>
    %cst_126 = arith.constant dense<0.000000e+00> : vector<2x128xf32>
    %274 = tpu.matmul %220, %117, %cst_126 {dimension_numbers = #tpu.dot_dimension_numbers<[1], [0], [0], [1], [0, 0, 1, 1], [], []>} : vector<2x32xf32>, vector<32x128xf32>, vector<2x128xf32> -> vector<2x128xf32>
    %275 = arith.addf %273, %274 : vector<2x128xf32>
    %276 = arith.negf %275 : vector<2x128xf32>
    %277 = math.exp %276 : vector<2x128xf32>
    %cst_127 = arith.constant 1.000000e+00 : f32
    %278 = vector.broadcast %cst_127 : f32 to vector<2x128xf32>
    %279 = arith.addf %278, %277 : vector<2x128xf32>
    %280 = arith.divf %278, %279 : vector<2x128xf32>
    %281 = vector.extract_strided_slice %280 {offsets = [0, 0], sizes = [2, 32], strides = [1, 1]} : vector<2x128xf32> to vector<2x32xf32>
    %282 = vector.extract_strided_slice %280 {offsets = [0, 32], sizes = [2, 32], strides = [1, 1]} : vector<2x128xf32> to vector<2x32xf32>
    %283 = vector.extract_strided_slice %280 {offsets = [0, 96], sizes = [2, 32], strides = [1, 1]} : vector<2x128xf32> to vector<2x32xf32>
    %284 = vector.extract_strided_slice %275 {offsets = [0, 64], sizes = [2, 32], strides = [1, 1]} : vector<2x128xf32> to vector<2x32xf32>
    %285 = math.tanh %284 : vector<2x32xf32>
    %286 = arith.mulf %282, %223 : vector<2x32xf32>
    %287 = arith.mulf %281, %285 : vector<2x32xf32>
    %288 = arith.addf %286, %287 : vector<2x32xf32>
    %289 = math.tanh %288 : vector<2x32xf32>
    %290 = arith.mulf %283, %289 : vector<2x32xf32>
    %291 = vector.shape_cast %268 : vector<2x1xi1> to vector<2x1xi1>
    %292 = vector.broadcast %291 : vector<2x1xi1> to vector<2x32xi1>
    %293 = arith.select %292, %290, %220 : vector<2x32xi1>, vector<2x32xf32>
    %294 = vector.shape_cast %268 : vector<2x1xi1> to vector<2x1xi1>
    %295 = vector.broadcast %294 : vector<2x1xi1> to vector<2x32xi1>
    %296 = arith.select %295, %288, %223 : vector<2x32xi1>, vector<2x32xf32>
    %297 = arith.index_cast %266 : i32 to index
    %c0_128 = arith.constant 0 : index
    %c0_129 = arith.constant 0 : index
    %298 = vector.load %arg23[%297, %c0_128, %c0_129] : memref<8x2x128xf32, #tpu.memory_space<vmem>>, vector<1x2x128xf32>
    %299 = vector.shape_cast %298 : vector<1x2x128xf32> to vector<2x128xf32>
    %cst_130 = arith.constant dense<0.000000e+00> : vector<2x128xf32>
    %300 = tpu.matmul %246, %118, %cst_130 {dimension_numbers = #tpu.dot_dimension_numbers<[1], [0], [0], [1], [0, 0, 1, 1], [], []>} : vector<2x32xf32>, vector<32x128xf32>, vector<2x128xf32> -> vector<2x128xf32>
    %301 = arith.addf %299, %300 : vector<2x128xf32>
    %302 = arith.negf %301 : vector<2x128xf32>
    %303 = math.exp %302 : vector<2x128xf32>
    %cst_131 = arith.constant 1.000000e+00 : f32
    %304 = vector.broadcast %cst_131 : f32 to vector<2x128xf32>
    %305 = arith.addf %304, %303 : vector<2x128xf32>
    %306 = arith.divf %304, %305 : vector<2x128xf32>
    %307 = vector.extract_strided_slice %306 {offsets = [0, 0], sizes = [2, 32], strides = [1, 1]} : vector<2x128xf32> to vector<2x32xf32>
    %308 = vector.extract_strided_slice %306 {offsets = [0, 32], sizes = [2, 32], strides = [1, 1]} : vector<2x128xf32> to vector<2x32xf32>
    %309 = vector.extract_strided_slice %306 {offsets = [0, 96], sizes = [2, 32], strides = [1, 1]} : vector<2x128xf32> to vector<2x32xf32>
    %310 = vector.extract_strided_slice %301 {offsets = [0, 64], sizes = [2, 32], strides = [1, 1]} : vector<2x128xf32> to vector<2x32xf32>
    %311 = math.tanh %310 : vector<2x32xf32>
    %312 = arith.mulf %308, %249 : vector<2x32xf32>
    %313 = arith.mulf %307, %311 : vector<2x32xf32>
    %314 = arith.addf %312, %313 : vector<2x32xf32>
    %315 = math.tanh %314 : vector<2x32xf32>
    %316 = arith.mulf %309, %315 : vector<2x32xf32>
    %317 = vector.shape_cast %270 : vector<2x1xi1> to vector<2x1xi1>
    %318 = vector.broadcast %317 : vector<2x1xi1> to vector<2x32xi1>
    %319 = arith.select %318, %316, %246 : vector<2x32xi1>, vector<2x32xf32>
    %320 = vector.shape_cast %270 : vector<2x1xi1> to vector<2x1xi1>
    %321 = vector.broadcast %320 : vector<2x1xi1> to vector<2x32xi1>
    %322 = arith.select %321, %314, %249 : vector<2x32xi1>, vector<2x32xf32>
    %cst_132 = arith.constant 0.000000e+00 : f32
    %323 = vector.shape_cast %268 : vector<2x1xi1> to vector<2x1xi1>
    %324 = vector.broadcast %323 : vector<2x1xi1> to vector<2x32xi1>
    %325 = vector.broadcast %cst_132 : f32 to vector<2x32xf32>
    %326 = arith.select %324, %293, %325 : vector<2x32xi1>, vector<2x32xf32>
    %327 = arith.index_cast %c2_i32 : i32 to index
    %c0_133 = arith.constant 0 : index
    %c0_134 = arith.constant 0 : index
    %328 = vector.load %arg24[%327, %c0_133, %c0_134] : memref<8x2x32xf32, #tpu.memory_space<vmem>>, vector<1x2x32xf32>
    %329 = vector.shape_cast %328 : vector<1x2x32xf32> to vector<2x32xf32>
    %330 = vector.shape_cast %326 : vector<2x32xf32> to vector<1x2x32xf32>
    tpu.vector_store %arg24[%327, %c0_133, %c0_134], %330 {strides = array<i32>} : memref<8x2x32xf32, #tpu.memory_space<vmem>>, vector<1x2x32xf32>,
    %cst_135 = arith.constant 0.000000e+00 : f32
    %331 = vector.shape_cast %270 : vector<2x1xi1> to vector<2x1xi1>
    %332 = vector.broadcast %331 : vector<2x1xi1> to vector<2x32xi1>
    %333 = vector.broadcast %cst_135 : f32 to vector<2x32xf32>
    %334 = arith.select %332, %319, %333 : vector<2x32xi1>, vector<2x32xf32>
    %335 = arith.index_cast %266 : i32 to index
    %c0_136 = arith.constant 0 : index
    %c0_137 = arith.constant 0 : index
    %336 = vector.load %arg25[%335, %c0_136, %c0_137] : memref<8x2x32xf32, #tpu.memory_space<vmem>>, vector<1x2x32xf32>
    %337 = vector.shape_cast %336 : vector<1x2x32xf32> to vector<2x32xf32>
    %338 = vector.shape_cast %334 : vector<2x32xf32> to vector<1x2x32xf32>
    tpu.vector_store %arg25[%335, %c0_136, %c0_137], %338 {strides = array<i32>} : memref<8x2x32xf32, #tpu.memory_space<vmem>>, vector<1x2x32xf32>,
    %c3_i32 = arith.constant 3 : i32
    %c7_i32_138 = arith.constant 7 : i32
    %339 = arith.subi %c7_i32_138, %c3_i32 : i32
    %340 = vector.broadcast %c3_i32 : i32 to vector<2x1xi32>
    %341 = arith.cmpi slt, %340, %0 : vector<2x1xi32>
    %342 = vector.broadcast %339 : i32 to vector<2x1xi32>
    %343 = arith.cmpi slt, %342, %0 : vector<2x1xi32>
    %344 = arith.index_cast %c3_i32 : i32 to index
    %c0_139 = arith.constant 0 : index
    %c0_140 = arith.constant 0 : index
    %345 = vector.load %arg22[%344, %c0_139, %c0_140] : memref<8x2x128xf32, #tpu.memory_space<vmem>>, vector<1x2x128xf32>
    %346 = vector.shape_cast %345 : vector<1x2x128xf32> to vector<2x128xf32>
    %cst_141 = arith.constant dense<0.000000e+00> : vector<2x128xf32>
    %347 = tpu.matmul %293, %117, %cst_141 {dimension_numbers = #tpu.dot_dimension_numbers<[1], [0], [0], [1], [0, 0, 1, 1], [], []>} : vector<2x32xf32>, vector<32x128xf32>, vector<2x128xf32> -> vector<2x128xf32>
    %348 = arith.addf %346, %347 : vector<2x128xf32>
    %349 = arith.negf %348 : vector<2x128xf32>
    %350 = math.exp %349 : vector<2x128xf32>
    %cst_142 = arith.constant 1.000000e+00 : f32
    %351 = vector.broadcast %cst_142 : f32 to vector<2x128xf32>
    %352 = arith.addf %351, %350 : vector<2x128xf32>
    %353 = arith.divf %351, %352 : vector<2x128xf32>
    %354 = vector.extract_strided_slice %353 {offsets = [0, 0], sizes = [2, 32], strides = [1, 1]} : vector<2x128xf32> to vector<2x32xf32>
    %355 = vector.extract_strided_slice %353 {offsets = [0, 32], sizes = [2, 32], strides = [1, 1]} : vector<2x128xf32> to vector<2x32xf32>
    %356 = vector.extract_strided_slice %353 {offsets = [0, 96], sizes = [2, 32], strides = [1, 1]} : vector<2x128xf32> to vector<2x32xf32>
    %357 = vector.extract_strided_slice %348 {offsets = [0, 64], sizes = [2, 32], strides = [1, 1]} : vector<2x128xf32> to vector<2x32xf32>
    %358 = math.tanh %357 : vector<2x32xf32>
    %359 = arith.mulf %355, %296 : vector<2x32xf32>
    %360 = arith.mulf %354, %358 : vector<2x32xf32>
    %361 = arith.addf %359, %360 : vector<2x32xf32>
    %362 = math.tanh %361 : vector<2x32xf32>
    %363 = arith.mulf %356, %362 : vector<2x32xf32>
    %364 = vector.shape_cast %341 : vector<2x1xi1> to vector<2x1xi1>
    %365 = vector.broadcast %364 : vector<2x1xi1> to vector<2x32xi1>
    %366 = arith.select %365, %363, %293 : vector<2x32xi1>, vector<2x32xf32>
    %367 = vector.shape_cast %341 : vector<2x1xi1> to vector<2x1xi1>
    %368 = vector.broadcast %367 : vector<2x1xi1> to vector<2x32xi1>
    %369 = arith.select %368, %361, %296 : vector<2x32xi1>, vector<2x32xf32>
    %370 = arith.index_cast %339 : i32 to index
    %c0_143 = arith.constant 0 : index
    %c0_144 = arith.constant 0 : index
    %371 = vector.load %arg23[%370, %c0_143, %c0_144] : memref<8x2x128xf32, #tpu.memory_space<vmem>>, vector<1x2x128xf32>
    %372 = vector.shape_cast %371 : vector<1x2x128xf32> to vector<2x128xf32>
    %cst_145 = arith.constant dense<0.000000e+00> : vector<2x128xf32>
    %373 = tpu.matmul %319, %118, %cst_145 {dimension_numbers = #tpu.dot_dimension_numbers<[1], [0], [0], [1], [0, 0, 1, 1], [], []>} : vector<2x32xf32>, vector<32x128xf32>, vector<2x128xf32> -> vector<2x128xf32>
    %374 = arith.addf %372, %373 : vector<2x128xf32>
    %375 = arith.negf %374 : vector<2x128xf32>
    %376 = math.exp %375 : vector<2x128xf32>
    %cst_146 = arith.constant 1.000000e+00 : f32
    %377 = vector.broadcast %cst_146 : f32 to vector<2x128xf32>
    %378 = arith.addf %377, %376 : vector<2x128xf32>
    %379 = arith.divf %377, %378 : vector<2x128xf32>
    %380 = vector.extract_strided_slice %379 {offsets = [0, 0], sizes = [2, 32], strides = [1, 1]} : vector<2x128xf32> to vector<2x32xf32>
    %381 = vector.extract_strided_slice %379 {offsets = [0, 32], sizes = [2, 32], strides = [1, 1]} : vector<2x128xf32> to vector<2x32xf32>
    %382 = vector.extract_strided_slice %379 {offsets = [0, 96], sizes = [2, 32], strides = [1, 1]} : vector<2x128xf32> to vector<2x32xf32>
    %383 = vector.extract_strided_slice %374 {offsets = [0, 64], sizes = [2, 32], strides = [1, 1]} : vector<2x128xf32> to vector<2x32xf32>
    %384 = math.tanh %383 : vector<2x32xf32>
    %385 = arith.mulf %381, %322 : vector<2x32xf32>
    %386 = arith.mulf %380, %384 : vector<2x32xf32>
    %387 = arith.addf %385, %386 : vector<2x32xf32>
    %388 = math.tanh %387 : vector<2x32xf32>
    %389 = arith.mulf %382, %388 : vector<2x32xf32>
    %390 = vector.shape_cast %343 : vector<2x1xi1> to vector<2x1xi1>
    %391 = vector.broadcast %390 : vector<2x1xi1> to vector<2x32xi1>
    %392 = arith.select %391, %389, %319 : vector<2x32xi1>, vector<2x32xf32>
    %393 = vector.shape_cast %343 : vector<2x1xi1> to vector<2x1xi1>
    %394 = vector.broadcast %393 : vector<2x1xi1> to vector<2x32xi1>
    %395 = arith.select %394, %387, %322 : vector<2x32xi1>, vector<2x32xf32>
    %cst_147 = arith.constant 0.000000e+00 : f32
    %396 = vector.shape_cast %341 : vector<2x1xi1> to vector<2x1xi1>
    %397 = vector.broadcast %396 : vector<2x1xi1> to vector<2x32xi1>
    %398 = vector.broadcast %cst_147 : f32 to vector<2x32xf32>
    %399 = arith.select %397, %366, %398 : vector<2x32xi1>, vector<2x32xf32>
    %400 = arith.index_cast %c3_i32 : i32 to index
    %c0_148 = arith.constant 0 : index
    %c0_149 = arith.constant 0 : index
    %401 = vector.load %arg24[%400, %c0_148, %c0_149] : memref<8x2x32xf32, #tpu.memory_space<vmem>>, vector<1x2x32xf32>
    %402 = vector.shape_cast %401 : vector<1x2x32xf32> to vector<2x32xf32>
    %403 = vector.shape_cast %399 : vector<2x32xf32> to vector<1x2x32xf32>
    tpu.vector_store %arg24[%400, %c0_148, %c0_149], %403 {strides = array<i32>} : memref<8x2x32xf32, #tpu.memory_space<vmem>>, vector<1x2x32xf32>,
    %cst_150 = arith.constant 0.000000e+00 : f32
    %404 = vector.shape_cast %343 : vector<2x1xi1> to vector<2x1xi1>
    %405 = vector.broadcast %404 : vector<2x1xi1> to vector<2x32xi1>
    %406 = vector.broadcast %cst_150 : f32 to vector<2x32xf32>
    %407 = arith.select %405, %392, %406 : vector<2x32xi1>, vector<2x32xf32>
    %408 = arith.index_cast %339 : i32 to index
    %c0_151 = arith.constant 0 : index
    %c0_152 = arith.constant 0 : index
    %409 = vector.load %arg25[%408, %c0_151, %c0_152] : memref<8x2x32xf32, #tpu.memory_space<vmem>>, vector<1x2x32xf32>
    %410 = vector.shape_cast %409 : vector<1x2x32xf32> to vector<2x32xf32>
    %411 = vector.shape_cast %407 : vector<2x32xf32> to vector<1x2x32xf32>
    tpu.vector_store %arg25[%408, %c0_151, %c0_152], %411 {strides = array<i32>} : memref<8x2x32xf32, #tpu.memory_space<vmem>>, vector<1x2x32xf32>,
    %c4_i32 = arith.constant 4 : i32
    %c7_i32_153 = arith.constant 7 : i32
    %412 = arith.subi %c7_i32_153, %c4_i32 : i32
    %413 = vector.broadcast %c4_i32 : i32 to vector<2x1xi32>
    %414 = arith.cmpi slt, %413, %0 : vector<2x1xi32>
    %415 = vector.broadcast %412 : i32 to vector<2x1xi32>
    %416 = arith.cmpi slt, %415, %0 : vector<2x1xi32>
    %417 = arith.index_cast %c4_i32 : i32 to index
    %c0_154 = arith.constant 0 : index
    %c0_155 = arith.constant 0 : index
    %418 = vector.load %arg22[%417, %c0_154, %c0_155] : memref<8x2x128xf32, #tpu.memory_space<vmem>>, vector<1x2x128xf32>
    %419 = vector.shape_cast %418 : vector<1x2x128xf32> to vector<2x128xf32>
    %cst_156 = arith.constant dense<0.000000e+00> : vector<2x128xf32>
    %420 = tpu.matmul %366, %117, %cst_156 {dimension_numbers = #tpu.dot_dimension_numbers<[1], [0], [0], [1], [0, 0, 1, 1], [], []>} : vector<2x32xf32>, vector<32x128xf32>, vector<2x128xf32> -> vector<2x128xf32>
    %421 = arith.addf %419, %420 : vector<2x128xf32>
    %422 = arith.negf %421 : vector<2x128xf32>
    %423 = math.exp %422 : vector<2x128xf32>
    %cst_157 = arith.constant 1.000000e+00 : f32
    %424 = vector.broadcast %cst_157 : f32 to vector<2x128xf32>
    %425 = arith.addf %424, %423 : vector<2x128xf32>
    %426 = arith.divf %424, %425 : vector<2x128xf32>
    %427 = vector.extract_strided_slice %426 {offsets = [0, 0], sizes = [2, 32], strides = [1, 1]} : vector<2x128xf32> to vector<2x32xf32>
    %428 = vector.extract_strided_slice %426 {offsets = [0, 32], sizes = [2, 32], strides = [1, 1]} : vector<2x128xf32> to vector<2x32xf32>
    %429 = vector.extract_strided_slice %426 {offsets = [0, 96], sizes = [2, 32], strides = [1, 1]} : vector<2x128xf32> to vector<2x32xf32>
    %430 = vector.extract_strided_slice %421 {offsets = [0, 64], sizes = [2, 32], strides = [1, 1]} : vector<2x128xf32> to vector<2x32xf32>
    %431 = math.tanh %430 : vector<2x32xf32>
    %432 = arith.mulf %428, %369 : vector<2x32xf32>
    %433 = arith.mulf %427, %431 : vector<2x32xf32>
    %434 = arith.addf %432, %433 : vector<2x32xf32>
    %435 = math.tanh %434 : vector<2x32xf32>
    %436 = arith.mulf %429, %435 : vector<2x32xf32>
    %437 = vector.shape_cast %414 : vector<2x1xi1> to vector<2x1xi1>
    %438 = vector.broadcast %437 : vector<2x1xi1> to vector<2x32xi1>
    %439 = arith.select %438, %436, %366 : vector<2x32xi1>, vector<2x32xf32>
    %440 = vector.shape_cast %414 : vector<2x1xi1> to vector<2x1xi1>
    %441 = vector.broadcast %440 : vector<2x1xi1> to vector<2x32xi1>
    %442 = arith.select %441, %434, %369 : vector<2x32xi1>, vector<2x32xf32>
    %443 = arith.index_cast %412 : i32 to index
    %c0_158 = arith.constant 0 : index
    %c0_159 = arith.constant 0 : index
    %444 = vector.load %arg23[%443, %c0_158, %c0_159] : memref<8x2x128xf32, #tpu.memory_space<vmem>>, vector<1x2x128xf32>
    %445 = vector.shape_cast %444 : vector<1x2x128xf32> to vector<2x128xf32>
    %cst_160 = arith.constant dense<0.000000e+00> : vector<2x128xf32>
    %446 = tpu.matmul %392, %118, %cst_160 {dimension_numbers = #tpu.dot_dimension_numbers<[1], [0], [0], [1], [0, 0, 1, 1], [], []>} : vector<2x32xf32>, vector<32x128xf32>, vector<2x128xf32> -> vector<2x128xf32>
    %447 = arith.addf %445, %446 : vector<2x128xf32>
    %448 = arith.negf %447 : vector<2x128xf32>
    %449 = math.exp %448 : vector<2x128xf32>
    %cst_161 = arith.constant 1.000000e+00 : f32
    %450 = vector.broadcast %cst_161 : f32 to vector<2x128xf32>
    %451 = arith.addf %450, %449 : vector<2x128xf32>
    %452 = arith.divf %450, %451 : vector<2x128xf32>
    %453 = vector.extract_strided_slice %452 {offsets = [0, 0], sizes = [2, 32], strides = [1, 1]} : vector<2x128xf32> to vector<2x32xf32>
    %454 = vector.extract_strided_slice %452 {offsets = [0, 32], sizes = [2, 32], strides = [1, 1]} : vector<2x128xf32> to vector<2x32xf32>
    %455 = vector.extract_strided_slice %452 {offsets = [0, 96], sizes = [2, 32], strides = [1, 1]} : vector<2x128xf32> to vector<2x32xf32>
    %456 = vector.extract_strided_slice %447 {offsets = [0, 64], sizes = [2, 32], strides = [1, 1]} : vector<2x128xf32> to vector<2x32xf32>
    %457 = math.tanh %456 : vector<2x32xf32>
    %458 = arith.mulf %454, %395 : vector<2x32xf32>
    %459 = arith.mulf %453, %457 : vector<2x32xf32>
    %460 = arith.addf %458, %459 : vector<2x32xf32>
    %461 = math.tanh %460 : vector<2x32xf32>
    %462 = arith.mulf %455, %461 : vector<2x32xf32>
    %463 = vector.shape_cast %416 : vector<2x1xi1> to vector<2x1xi1>
    %464 = vector.broadcast %463 : vector<2x1xi1> to vector<2x32xi1>
    %465 = arith.select %464, %462, %392 : vector<2x32xi1>, vector<2x32xf32>
    %466 = vector.shape_cast %416 : vector<2x1xi1> to vector<2x1xi1>
    %467 = vector.broadcast %466 : vector<2x1xi1> to vector<2x32xi1>
    %468 = arith.select %467, %460, %395 : vector<2x32xi1>, vector<2x32xf32>
    %cst_162 = arith.constant 0.000000e+00 : f32
    %469 = vector.shape_cast %414 : vector<2x1xi1> to vector<2x1xi1>
    %470 = vector.broadcast %469 : vector<2x1xi1> to vector<2x32xi1>
    %471 = vector.broadcast %cst_162 : f32 to vector<2x32xf32>
    %472 = arith.select %470, %439, %471 : vector<2x32xi1>, vector<2x32xf32>
    %473 = arith.index_cast %c4_i32 : i32 to index
    %c0_163 = arith.constant 0 : index
    %c0_164 = arith.constant 0 : index
    %474 = vector.load %arg24[%473, %c0_163, %c0_164] : memref<8x2x32xf32, #tpu.memory_space<vmem>>, vector<1x2x32xf32>
    %475 = vector.shape_cast %474 : vector<1x2x32xf32> to vector<2x32xf32>
    %476 = vector.shape_cast %472 : vector<2x32xf32> to vector<1x2x32xf32>
    tpu.vector_store %arg24[%473, %c0_163, %c0_164], %476 {strides = array<i32>} : memref<8x2x32xf32, #tpu.memory_space<vmem>>, vector<1x2x32xf32>,
    %cst_165 = arith.constant 0.000000e+00 : f32
    %477 = vector.shape_cast %416 : vector<2x1xi1> to vector<2x1xi1>
    %478 = vector.broadcast %477 : vector<2x1xi1> to vector<2x32xi1>
    %479 = vector.broadcast %cst_165 : f32 to vector<2x32xf32>
    %480 = arith.select %478, %465, %479 : vector<2x32xi1>, vector<2x32xf32>
    %481 = arith.index_cast %412 : i32 to index
    %c0_166 = arith.constant 0 : index
    %c0_167 = arith.constant 0 : index
    %482 = vector.load %arg25[%481, %c0_166, %c0_167] : memref<8x2x32xf32, #tpu.memory_space<vmem>>, vector<1x2x32xf32>
    %483 = vector.shape_cast %482 : vector<1x2x32xf32> to vector<2x32xf32>
    %484 = vector.shape_cast %480 : vector<2x32xf32> to vector<1x2x32xf32>
    tpu.vector_store %arg25[%481, %c0_166, %c0_167], %484 {strides = array<i32>} : memref<8x2x32xf32, #tpu.memory_space<vmem>>, vector<1x2x32xf32>,
    %c5_i32 = arith.constant 5 : i32
    %c7_i32_168 = arith.constant 7 : i32
    %485 = arith.subi %c7_i32_168, %c5_i32 : i32
    %486 = vector.broadcast %c5_i32 : i32 to vector<2x1xi32>
    %487 = arith.cmpi slt, %486, %0 : vector<2x1xi32>
    %488 = vector.broadcast %485 : i32 to vector<2x1xi32>
    %489 = arith.cmpi slt, %488, %0 : vector<2x1xi32>
    %490 = arith.index_cast %c5_i32 : i32 to index
    %c0_169 = arith.constant 0 : index
    %c0_170 = arith.constant 0 : index
    %491 = vector.load %arg22[%490, %c0_169, %c0_170] : memref<8x2x128xf32, #tpu.memory_space<vmem>>, vector<1x2x128xf32>
    %492 = vector.shape_cast %491 : vector<1x2x128xf32> to vector<2x128xf32>
    %cst_171 = arith.constant dense<0.000000e+00> : vector<2x128xf32>
    %493 = tpu.matmul %439, %117, %cst_171 {dimension_numbers = #tpu.dot_dimension_numbers<[1], [0], [0], [1], [0, 0, 1, 1], [], []>} : vector<2x32xf32>, vector<32x128xf32>, vector<2x128xf32> -> vector<2x128xf32>
    %494 = arith.addf %492, %493 : vector<2x128xf32>
    %495 = arith.negf %494 : vector<2x128xf32>
    %496 = math.exp %495 : vector<2x128xf32>
    %cst_172 = arith.constant 1.000000e+00 : f32
    %497 = vector.broadcast %cst_172 : f32 to vector<2x128xf32>
    %498 = arith.addf %497, %496 : vector<2x128xf32>
    %499 = arith.divf %497, %498 : vector<2x128xf32>
    %500 = vector.extract_strided_slice %499 {offsets = [0, 0], sizes = [2, 32], strides = [1, 1]} : vector<2x128xf32> to vector<2x32xf32>
    %501 = vector.extract_strided_slice %499 {offsets = [0, 32], sizes = [2, 32], strides = [1, 1]} : vector<2x128xf32> to vector<2x32xf32>
    %502 = vector.extract_strided_slice %499 {offsets = [0, 96], sizes = [2, 32], strides = [1, 1]} : vector<2x128xf32> to vector<2x32xf32>
    %503 = vector.extract_strided_slice %494 {offsets = [0, 64], sizes = [2, 32], strides = [1, 1]} : vector<2x128xf32> to vector<2x32xf32>
    %504 = math.tanh %503 : vector<2x32xf32>
    %505 = arith.mulf %501, %442 : vector<2x32xf32>
    %506 = arith.mulf %500, %504 : vector<2x32xf32>
    %507 = arith.addf %505, %506 : vector<2x32xf32>
    %508 = math.tanh %507 : vector<2x32xf32>
    %509 = arith.mulf %502, %508 : vector<2x32xf32>
    %510 = vector.shape_cast %487 : vector<2x1xi1> to vector<2x1xi1>
    %511 = vector.broadcast %510 : vector<2x1xi1> to vector<2x32xi1>
    %512 = arith.select %511, %509, %439 : vector<2x32xi1>, vector<2x32xf32>
    %513 = vector.shape_cast %487 : vector<2x1xi1> to vector<2x1xi1>
    %514 = vector.broadcast %513 : vector<2x1xi1> to vector<2x32xi1>
    %515 = arith.select %514, %507, %442 : vector<2x32xi1>, vector<2x32xf32>
    %516 = arith.index_cast %485 : i32 to index
    %c0_173 = arith.constant 0 : index
    %c0_174 = arith.constant 0 : index
    %517 = vector.load %arg23[%516, %c0_173, %c0_174] : memref<8x2x128xf32, #tpu.memory_space<vmem>>, vector<1x2x128xf32>
    %518 = vector.shape_cast %517 : vector<1x2x128xf32> to vector<2x128xf32>
    %cst_175 = arith.constant dense<0.000000e+00> : vector<2x128xf32>
    %519 = tpu.matmul %465, %118, %cst_175 {dimension_numbers = #tpu.dot_dimension_numbers<[1], [0], [0], [1], [0, 0, 1, 1], [], []>} : vector<2x32xf32>, vector<32x128xf32>, vector<2x128xf32> -> vector<2x128xf32>
    %520 = arith.addf %518, %519 : vector<2x128xf32>
    %521 = arith.negf %520 : vector<2x128xf32>
    %522 = math.exp %521 : vector<2x128xf32>
    %cst_176 = arith.constant 1.000000e+00 : f32
    %523 = vector.broadcast %cst_176 : f32 to vector<2x128xf32>
    %524 = arith.addf %523, %522 : vector<2x128xf32>
    %525 = arith.divf %523, %524 : vector<2x128xf32>
    %526 = vector.extract_strided_slice %525 {offsets = [0, 0], sizes = [2, 32], strides = [1, 1]} : vector<2x128xf32> to vector<2x32xf32>
    %527 = vector.extract_strided_slice %525 {offsets = [0, 32], sizes = [2, 32], strides = [1, 1]} : vector<2x128xf32> to vector<2x32xf32>
    %528 = vector.extract_strided_slice %525 {offsets = [0, 96], sizes = [2, 32], strides = [1, 1]} : vector<2x128xf32> to vector<2x32xf32>
    %529 = vector.extract_strided_slice %520 {offsets = [0, 64], sizes = [2, 32], strides = [1, 1]} : vector<2x128xf32> to vector<2x32xf32>
    %530 = math.tanh %529 : vector<2x32xf32>
    %531 = arith.mulf %527, %468 : vector<2x32xf32>
    %532 = arith.mulf %526, %530 : vector<2x32xf32>
    %533 = arith.addf %531, %532 : vector<2x32xf32>
    %534 = math.tanh %533 : vector<2x32xf32>
    %535 = arith.mulf %528, %534 : vector<2x32xf32>
    %536 = vector.shape_cast %489 : vector<2x1xi1> to vector<2x1xi1>
    %537 = vector.broadcast %536 : vector<2x1xi1> to vector<2x32xi1>
    %538 = arith.select %537, %535, %465 : vector<2x32xi1>, vector<2x32xf32>
    %539 = vector.shape_cast %489 : vector<2x1xi1> to vector<2x1xi1>
    %540 = vector.broadcast %539 : vector<2x1xi1> to vector<2x32xi1>
    %541 = arith.select %540, %533, %468 : vector<2x32xi1>, vector<2x32xf32>
    %cst_177 = arith.constant 0.000000e+00 : f32
    %542 = vector.shape_cast %487 : vector<2x1xi1> to vector<2x1xi1>
    %543 = vector.broadcast %542 : vector<2x1xi1> to vector<2x32xi1>
    %544 = vector.broadcast %cst_177 : f32 to vector<2x32xf32>
    %545 = arith.select %543, %512, %544 : vector<2x32xi1>, vector<2x32xf32>
    %546 = arith.index_cast %c5_i32 : i32 to index
    %c0_178 = arith.constant 0 : index
    %c0_179 = arith.constant 0 : index
    %547 = vector.load %arg24[%546, %c0_178, %c0_179] : memref<8x2x32xf32, #tpu.memory_space<vmem>>, vector<1x2x32xf32>
    %548 = vector.shape_cast %547 : vector<1x2x32xf32> to vector<2x32xf32>
    %549 = vector.shape_cast %545 : vector<2x32xf32> to vector<1x2x32xf32>
    tpu.vector_store %arg24[%546, %c0_178, %c0_179], %549 {strides = array<i32>} : memref<8x2x32xf32, #tpu.memory_space<vmem>>, vector<1x2x32xf32>,
    %cst_180 = arith.constant 0.000000e+00 : f32
    %550 = vector.shape_cast %489 : vector<2x1xi1> to vector<2x1xi1>
    %551 = vector.broadcast %550 : vector<2x1xi1> to vector<2x32xi1>
    %552 = vector.broadcast %cst_180 : f32 to vector<2x32xf32>
    %553 = arith.select %551, %538, %552 : vector<2x32xi1>, vector<2x32xf32>
    %554 = arith.index_cast %485 : i32 to index
    %c0_181 = arith.constant 0 : index
    %c0_182 = arith.constant 0 : index
    %555 = vector.load %arg25[%554, %c0_181, %c0_182] : memref<8x2x32xf32, #tpu.memory_space<vmem>>, vector<1x2x32xf32>
    %556 = vector.shape_cast %555 : vector<1x2x32xf32> to vector<2x32xf32>
    %557 = vector.shape_cast %553 : vector<2x32xf32> to vector<1x2x32xf32>
    tpu.vector_store %arg25[%554, %c0_181, %c0_182], %557 {strides = array<i32>} : memref<8x2x32xf32, #tpu.memory_space<vmem>>, vector<1x2x32xf32>,
    %c6_i32 = arith.constant 6 : i32
    %c7_i32_183 = arith.constant 7 : i32
    %558 = arith.subi %c7_i32_183, %c6_i32 : i32
    %559 = vector.broadcast %c6_i32 : i32 to vector<2x1xi32>
    %560 = arith.cmpi slt, %559, %0 : vector<2x1xi32>
    %561 = vector.broadcast %558 : i32 to vector<2x1xi32>
    %562 = arith.cmpi slt, %561, %0 : vector<2x1xi32>
    %563 = arith.index_cast %c6_i32 : i32 to index
    %c0_184 = arith.constant 0 : index
    %c0_185 = arith.constant 0 : index
    %564 = vector.load %arg22[%563, %c0_184, %c0_185] : memref<8x2x128xf32, #tpu.memory_space<vmem>>, vector<1x2x128xf32>
    %565 = vector.shape_cast %564 : vector<1x2x128xf32> to vector<2x128xf32>
    %cst_186 = arith.constant dense<0.000000e+00> : vector<2x128xf32>
    %566 = tpu.matmul %512, %117, %cst_186 {dimension_numbers = #tpu.dot_dimension_numbers<[1], [0], [0], [1], [0, 0, 1, 1], [], []>} : vector<2x32xf32>, vector<32x128xf32>, vector<2x128xf32> -> vector<2x128xf32>
    %567 = arith.addf %565, %566 : vector<2x128xf32>
    %568 = arith.negf %567 : vector<2x128xf32>
    %569 = math.exp %568 : vector<2x128xf32>
    %cst_187 = arith.constant 1.000000e+00 : f32
    %570 = vector.broadcast %cst_187 : f32 to vector<2x128xf32>
    %571 = arith.addf %570, %569 : vector<2x128xf32>
    %572 = arith.divf %570, %571 : vector<2x128xf32>
    %573 = vector.extract_strided_slice %572 {offsets = [0, 0], sizes = [2, 32], strides = [1, 1]} : vector<2x128xf32> to vector<2x32xf32>
    %574 = vector.extract_strided_slice %572 {offsets = [0, 32], sizes = [2, 32], strides = [1, 1]} : vector<2x128xf32> to vector<2x32xf32>
    %575 = vector.extract_strided_slice %572 {offsets = [0, 96], sizes = [2, 32], strides = [1, 1]} : vector<2x128xf32> to vector<2x32xf32>
    %576 = vector.extract_strided_slice %567 {offsets = [0, 64], sizes = [2, 32], strides = [1, 1]} : vector<2x128xf32> to vector<2x32xf32>
    %577 = math.tanh %576 : vector<2x32xf32>
    %578 = arith.mulf %574, %515 : vector<2x32xf32>
    %579 = arith.mulf %573, %577 : vector<2x32xf32>
    %580 = arith.addf %578, %579 : vector<2x32xf32>
    %581 = math.tanh %580 : vector<2x32xf32>
    %582 = arith.mulf %575, %581 : vector<2x32xf32>
    %583 = vector.shape_cast %560 : vector<2x1xi1> to vector<2x1xi1>
    %584 = vector.broadcast %583 : vector<2x1xi1> to vector<2x32xi1>
    %585 = arith.select %584, %582, %512 : vector<2x32xi1>, vector<2x32xf32>
    %586 = vector.shape_cast %560 : vector<2x1xi1> to vector<2x1xi1>
    %587 = vector.broadcast %586 : vector<2x1xi1> to vector<2x32xi1>
    %588 = arith.select %587, %580, %515 : vector<2x32xi1>, vector<2x32xf32>
    %589 = arith.index_cast %558 : i32 to index
    %c0_188 = arith.constant 0 : index
    %c0_189 = arith.constant 0 : index
    %590 = vector.load %arg23[%589, %c0_188, %c0_189] : memref<8x2x128xf32, #tpu.memory_space<vmem>>, vector<1x2x128xf32>
    %591 = vector.shape_cast %590 : vector<1x2x128xf32> to vector<2x128xf32>
    %cst_190 = arith.constant dense<0.000000e+00> : vector<2x128xf32>
    %592 = tpu.matmul %538, %118, %cst_190 {dimension_numbers = #tpu.dot_dimension_numbers<[1], [0], [0], [1], [0, 0, 1, 1], [], []>} : vector<2x32xf32>, vector<32x128xf32>, vector<2x128xf32> -> vector<2x128xf32>
    %593 = arith.addf %591, %592 : vector<2x128xf32>
    %594 = arith.negf %593 : vector<2x128xf32>
    %595 = math.exp %594 : vector<2x128xf32>
    %cst_191 = arith.constant 1.000000e+00 : f32
    %596 = vector.broadcast %cst_191 : f32 to vector<2x128xf32>
    %597 = arith.addf %596, %595 : vector<2x128xf32>
    %598 = arith.divf %596, %597 : vector<2x128xf32>
    %599 = vector.extract_strided_slice %598 {offsets = [0, 0], sizes = [2, 32], strides = [1, 1]} : vector<2x128xf32> to vector<2x32xf32>
    %600 = vector.extract_strided_slice %598 {offsets = [0, 32], sizes = [2, 32], strides = [1, 1]} : vector<2x128xf32> to vector<2x32xf32>
    %601 = vector.extract_strided_slice %598 {offsets = [0, 96], sizes = [2, 32], strides = [1, 1]} : vector<2x128xf32> to vector<2x32xf32>
    %602 = vector.extract_strided_slice %593 {offsets = [0, 64], sizes = [2, 32], strides = [1, 1]} : vector<2x128xf32> to vector<2x32xf32>
    %603 = math.tanh %602 : vector<2x32xf32>
    %604 = arith.mulf %600, %541 : vector<2x32xf32>
    %605 = arith.mulf %599, %603 : vector<2x32xf32>
    %606 = arith.addf %604, %605 : vector<2x32xf32>
    %607 = math.tanh %606 : vector<2x32xf32>
    %608 = arith.mulf %601, %607 : vector<2x32xf32>
    %609 = vector.shape_cast %562 : vector<2x1xi1> to vector<2x1xi1>
    %610 = vector.broadcast %609 : vector<2x1xi1> to vector<2x32xi1>
    %611 = arith.select %610, %608, %538 : vector<2x32xi1>, vector<2x32xf32>
    %612 = vector.shape_cast %562 : vector<2x1xi1> to vector<2x1xi1>
    %613 = vector.broadcast %612 : vector<2x1xi1> to vector<2x32xi1>
    %614 = arith.select %613, %606, %541 : vector<2x32xi1>, vector<2x32xf32>
    %cst_192 = arith.constant 0.000000e+00 : f32
    %615 = vector.shape_cast %560 : vector<2x1xi1> to vector<2x1xi1>
    %616 = vector.broadcast %615 : vector<2x1xi1> to vector<2x32xi1>
    %617 = vector.broadcast %cst_192 : f32 to vector<2x32xf32>
    %618 = arith.select %616, %585, %617 : vector<2x32xi1>, vector<2x32xf32>
    %619 = arith.index_cast %c6_i32 : i32 to index
    %c0_193 = arith.constant 0 : index
    %c0_194 = arith.constant 0 : index
    %620 = vector.load %arg24[%619, %c0_193, %c0_194] : memref<8x2x32xf32, #tpu.memory_space<vmem>>, vector<1x2x32xf32>
    %621 = vector.shape_cast %620 : vector<1x2x32xf32> to vector<2x32xf32>
    %622 = vector.shape_cast %618 : vector<2x32xf32> to vector<1x2x32xf32>
    tpu.vector_store %arg24[%619, %c0_193, %c0_194], %622 {strides = array<i32>} : memref<8x2x32xf32, #tpu.memory_space<vmem>>, vector<1x2x32xf32>,
    %cst_195 = arith.constant 0.000000e+00 : f32
    %623 = vector.shape_cast %562 : vector<2x1xi1> to vector<2x1xi1>
    %624 = vector.broadcast %623 : vector<2x1xi1> to vector<2x32xi1>
    %625 = vector.broadcast %cst_195 : f32 to vector<2x32xf32>
    %626 = arith.select %624, %611, %625 : vector<2x32xi1>, vector<2x32xf32>
    %627 = arith.index_cast %558 : i32 to index
    %c0_196 = arith.constant 0 : index
    %c0_197 = arith.constant 0 : index
    %628 = vector.load %arg25[%627, %c0_196, %c0_197] : memref<8x2x32xf32, #tpu.memory_space<vmem>>, vector<1x2x32xf32>
    %629 = vector.shape_cast %628 : vector<1x2x32xf32> to vector<2x32xf32>
    %630 = vector.shape_cast %626 : vector<2x32xf32> to vector<1x2x32xf32>
    tpu.vector_store %arg25[%627, %c0_196, %c0_197], %630 {strides = array<i32>} : memref<8x2x32xf32, #tpu.memory_space<vmem>>, vector<1x2x32xf32>,
    %c7_i32_198 = arith.constant 7 : i32
    %c7_i32_199 = arith.constant 7 : i32
    %631 = arith.subi %c7_i32_199, %c7_i32_198 : i32
    %632 = vector.broadcast %c7_i32_198 : i32 to vector<2x1xi32>
    %633 = arith.cmpi slt, %632, %0 : vector<2x1xi32>
    %634 = vector.broadcast %631 : i32 to vector<2x1xi32>
    %635 = arith.cmpi slt, %634, %0 : vector<2x1xi32>
    %636 = arith.index_cast %c7_i32_198 : i32 to index
    %c0_200 = arith.constant 0 : index
    %c0_201 = arith.constant 0 : index
    %637 = vector.load %arg22[%636, %c0_200, %c0_201] : memref<8x2x128xf32, #tpu.memory_space<vmem>>, vector<1x2x128xf32>
    %638 = vector.shape_cast %637 : vector<1x2x128xf32> to vector<2x128xf32>
    %cst_202 = arith.constant dense<0.000000e+00> : vector<2x128xf32>
    %639 = tpu.matmul %585, %117, %cst_202 {dimension_numbers = #tpu.dot_dimension_numbers<[1], [0], [0], [1], [0, 0, 1, 1], [], []>} : vector<2x32xf32>, vector<32x128xf32>, vector<2x128xf32> -> vector<2x128xf32>
    %640 = arith.addf %638, %639 : vector<2x128xf32>
    %641 = arith.negf %640 : vector<2x128xf32>
    %642 = math.exp %641 : vector<2x128xf32>
    %cst_203 = arith.constant 1.000000e+00 : f32
    %643 = vector.broadcast %cst_203 : f32 to vector<2x128xf32>
    %644 = arith.addf %643, %642 : vector<2x128xf32>
    %645 = arith.divf %643, %644 : vector<2x128xf32>
    %646 = vector.extract_strided_slice %645 {offsets = [0, 0], sizes = [2, 32], strides = [1, 1]} : vector<2x128xf32> to vector<2x32xf32>
    %647 = vector.extract_strided_slice %645 {offsets = [0, 32], sizes = [2, 32], strides = [1, 1]} : vector<2x128xf32> to vector<2x32xf32>
    %648 = vector.extract_strided_slice %645 {offsets = [0, 96], sizes = [2, 32], strides = [1, 1]} : vector<2x128xf32> to vector<2x32xf32>
    %649 = vector.extract_strided_slice %640 {offsets = [0, 64], sizes = [2, 32], strides = [1, 1]} : vector<2x128xf32> to vector<2x32xf32>
    %650 = math.tanh %649 : vector<2x32xf32>
    %651 = arith.mulf %647, %588 : vector<2x32xf32>
    %652 = arith.mulf %646, %650 : vector<2x32xf32>
    %653 = arith.addf %651, %652 : vector<2x32xf32>
    %654 = math.tanh %653 : vector<2x32xf32>
    %655 = arith.mulf %648, %654 : vector<2x32xf32>
    %656 = vector.shape_cast %633 : vector<2x1xi1> to vector<2x1xi1>
    %657 = vector.broadcast %656 : vector<2x1xi1> to vector<2x32xi1>
    %658 = arith.select %657, %655, %585 : vector<2x32xi1>, vector<2x32xf32>
    %659 = vector.shape_cast %633 : vector<2x1xi1> to vector<2x1xi1>
    %660 = vector.broadcast %659 : vector<2x1xi1> to vector<2x32xi1>
    %661 = arith.select %660, %653, %588 : vector<2x32xi1>, vector<2x32xf32>
    %662 = arith.index_cast %631 : i32 to index
    %c0_204 = arith.constant 0 : index
    %c0_205 = arith.constant 0 : index
    %663 = vector.load %arg23[%662, %c0_204, %c0_205] : memref<8x2x128xf32, #tpu.memory_space<vmem>>, vector<1x2x128xf32>
    %664 = vector.shape_cast %663 : vector<1x2x128xf32> to vector<2x128xf32>
    %cst_206 = arith.constant dense<0.000000e+00> : vector<2x128xf32>
    %665 = tpu.matmul %611, %118, %cst_206 {dimension_numbers = #tpu.dot_dimension_numbers<[1], [0], [0], [1], [0, 0, 1, 1], [], []>} : vector<2x32xf32>, vector<32x128xf32>, vector<2x128xf32> -> vector<2x128xf32>
    %666 = arith.addf %664, %665 : vector<2x128xf32>
    %667 = arith.negf %666 : vector<2x128xf32>
    %668 = math.exp %667 : vector<2x128xf32>
    %cst_207 = arith.constant 1.000000e+00 : f32
    %669 = vector.broadcast %cst_207 : f32 to vector<2x128xf32>
    %670 = arith.addf %669, %668 : vector<2x128xf32>
    %671 = arith.divf %669, %670 : vector<2x128xf32>
    %672 = vector.extract_strided_slice %671 {offsets = [0, 0], sizes = [2, 32], strides = [1, 1]} : vector<2x128xf32> to vector<2x32xf32>
    %673 = vector.extract_strided_slice %671 {offsets = [0, 32], sizes = [2, 32], strides = [1, 1]} : vector<2x128xf32> to vector<2x32xf32>
    %674 = vector.extract_strided_slice %671 {offsets = [0, 96], sizes = [2, 32], strides = [1, 1]} : vector<2x128xf32> to vector<2x32xf32>
    %675 = vector.extract_strided_slice %666 {offsets = [0, 64], sizes = [2, 32], strides = [1, 1]} : vector<2x128xf32> to vector<2x32xf32>
    %676 = math.tanh %675 : vector<2x32xf32>
    %677 = arith.mulf %673, %614 : vector<2x32xf32>
    %678 = arith.mulf %672, %676 : vector<2x32xf32>
    %679 = arith.addf %677, %678 : vector<2x32xf32>
    %680 = math.tanh %679 : vector<2x32xf32>
    %681 = arith.mulf %674, %680 : vector<2x32xf32>
    %682 = vector.shape_cast %635 : vector<2x1xi1> to vector<2x1xi1>
    %683 = vector.broadcast %682 : vector<2x1xi1> to vector<2x32xi1>
    %684 = arith.select %683, %681, %611 : vector<2x32xi1>, vector<2x32xf32>
    %685 = vector.shape_cast %635 : vector<2x1xi1> to vector<2x1xi1>
    %686 = vector.broadcast %685 : vector<2x1xi1> to vector<2x32xi1>
    %687 = arith.select %686, %679, %614 : vector<2x32xi1>, vector<2x32xf32>
    %cst_208 = arith.constant 0.000000e+00 : f32
    %688 = vector.shape_cast %633 : vector<2x1xi1> to vector<2x1xi1>
    %689 = vector.broadcast %688 : vector<2x1xi1> to vector<2x32xi1>
    %690 = vector.broadcast %cst_208 : f32 to vector<2x32xf32>
    %691 = arith.select %689, %658, %690 : vector<2x32xi1>, vector<2x32xf32>
    %692 = arith.index_cast %c7_i32_198 : i32 to index
    %c0_209 = arith.constant 0 : index
    %c0_210 = arith.constant 0 : index
    %693 = vector.load %arg24[%692, %c0_209, %c0_210] : memref<8x2x32xf32, #tpu.memory_space<vmem>>, vector<1x2x32xf32>
    %694 = vector.shape_cast %693 : vector<1x2x32xf32> to vector<2x32xf32>
    %695 = vector.shape_cast %691 : vector<2x32xf32> to vector<1x2x32xf32>
    tpu.vector_store %arg24[%692, %c0_209, %c0_210], %695 {strides = array<i32>} : memref<8x2x32xf32, #tpu.memory_space<vmem>>, vector<1x2x32xf32>,
    %cst_211 = arith.constant 0.000000e+00 : f32
    %696 = vector.shape_cast %635 : vector<2x1xi1> to vector<2x1xi1>
    %697 = vector.broadcast %696 : vector<2x1xi1> to vector<2x32xi1>
    %698 = vector.broadcast %cst_211 : f32 to vector<2x32xf32>
    %699 = arith.select %697, %684, %698 : vector<2x32xi1>, vector<2x32xf32>
    %700 = arith.index_cast %631 : i32 to index
    %c0_212 = arith.constant 0 : index
    %c0_213 = arith.constant 0 : index
    %701 = vector.load %arg25[%700, %c0_212, %c0_213] : memref<8x2x32xf32, #tpu.memory_space<vmem>>, vector<1x2x32xf32>
    %702 = vector.shape_cast %701 : vector<1x2x32xf32> to vector<2x32xf32>
    %703 = vector.shape_cast %699 : vector<2x32xf32> to vector<1x2x32xf32>
    tpu.vector_store %arg25[%700, %c0_212, %c0_213], %703 {strides = array<i32>} : memref<8x2x32xf32, #tpu.memory_space<vmem>>, vector<1x2x32xf32>,
    %c8_i32 = arith.constant 8 : i32
    %c0_214 = arith.constant 0 : index
    %c0_215 = arith.constant 0 : index
    %704 = vector.load %arg8[%c0_214, %c0_215] : memref<32x128xf32, #tpu.memory_space<vmem>>, vector<32x128xf32>
    %c0_216 = arith.constant 0 : index
    %c0_217 = arith.constant 0 : index
    %705 = vector.load %arg9[%c0_216, %c0_217] : memref<32x128xf32, #tpu.memory_space<vmem>>, vector<32x128xf32>
    %c0_218 = arith.constant 0 : index
    %c0_219 = arith.constant 0 : index
    %706 = vector.load %arg10[%c0_218, %c0_219] : memref<1x128xf32, #tpu.memory_space<vmem>>, vector<1x128xf32>
    %c0_220 = arith.constant 0 : index
    %c0_221 = arith.constant 0 : index
    %707 = vector.load %arg12[%c0_220, %c0_221] : memref<32x128xf32, #tpu.memory_space<vmem>>, vector<32x128xf32>
    %c0_222 = arith.constant 0 : index
    %c0_223 = arith.constant 0 : index
    %708 = vector.load %arg13[%c0_222, %c0_223] : memref<32x128xf32, #tpu.memory_space<vmem>>, vector<32x128xf32>
    %c0_224 = arith.constant 0 : index
    %c0_225 = arith.constant 0 : index
    %709 = vector.load %arg14[%c0_224, %c0_225] : memref<1x128xf32, #tpu.memory_space<vmem>>, vector<1x128xf32>
    %c0_226 = arith.constant 0 : index
    %c0_227 = arith.constant 0 : index
    %c0_228 = arith.constant 0 : index
    %710 = vector.load %arg24[%c0_226, %c0_227, %c0_228] : memref<8x2x32xf32, #tpu.memory_space<vmem>>, vector<1x2x32xf32>
    %711 = vector.shape_cast %710 : vector<1x2x32xf32> to vector<2x32xf32>
    %c0_229 = arith.constant 0 : index
    %c0_230 = arith.constant 0 : index
    %c0_231 = arith.constant 0 : index
    %712 = vector.load %arg25[%c0_229, %c0_230, %c0_231] : memref<8x2x32xf32, #tpu.memory_space<vmem>>, vector<1x2x32xf32>
    %713 = vector.shape_cast %712 : vector<1x2x32xf32> to vector<2x32xf32>
    %cst_232 = arith.constant dense<0.000000e+00> : vector<2x128xf32>
    %714 = tpu.matmul %711, %704, %cst_232 {dimension_numbers = #tpu.dot_dimension_numbers<[1], [0], [0], [1], [0, 0, 1, 1], [], []>} : vector<2x32xf32>, vector<32x128xf32>, vector<2x128xf32> -> vector<2x128xf32>
    %cst_233 = arith.constant dense<0.000000e+00> : vector<2x128xf32>
    %715 = tpu.matmul %713, %705, %cst_233 {dimension_numbers = #tpu.dot_dimension_numbers<[1], [0], [0], [1], [0, 0, 1, 1], [], []>} : vector<2x32xf32>, vector<32x128xf32>, vector<2x128xf32> -> vector<2x128xf32>
    %716 = arith.addf %714, %715 : vector<2x128xf32>
    %717 = vector.broadcast %706 : vector<1x128xf32> to vector<2x128xf32>
    %718 = arith.addf %716, %717 : vector<2x128xf32>
    %c0_234 = arith.constant 0 : index
    %c0_235 = arith.constant 0 : index
    %c0_236 = arith.constant 0 : index
    %719 = vector.load %arg26[%c0_234, %c0_235, %c0_236] : memref<8x2x128xf32, #tpu.memory_space<vmem>>, vector<1x2x128xf32>
    %720 = vector.shape_cast %719 : vector<1x2x128xf32> to vector<2x128xf32>
    %721 = vector.shape_cast %718 : vector<2x128xf32> to vector<1x2x128xf32>
    tpu.vector_store %arg26[%c0_234, %c0_235, %c0_236], %721 {strides = array<i32>} : memref<8x2x128xf32, #tpu.memory_space<vmem>>, vector<1x2x128xf32>,
    %cst_237 = arith.constant dense<0.000000e+00> : vector<2x128xf32>
    %722 = tpu.matmul %711, %707, %cst_237 {dimension_numbers = #tpu.dot_dimension_numbers<[1], [0], [0], [1], [0, 0, 1, 1], [], []>} : vector<2x32xf32>, vector<32x128xf32>, vector<2x128xf32> -> vector<2x128xf32>
    %cst_238 = arith.constant dense<0.000000e+00> : vector<2x128xf32>
    %723 = tpu.matmul %713, %708, %cst_238 {dimension_numbers = #tpu.dot_dimension_numbers<[1], [0], [0], [1], [0, 0, 1, 1], [], []>} : vector<2x32xf32>, vector<32x128xf32>, vector<2x128xf32> -> vector<2x128xf32>
    %724 = arith.addf %722, %723 : vector<2x128xf32>
    %725 = vector.broadcast %709 : vector<1x128xf32> to vector<2x128xf32>
    %726 = arith.addf %724, %725 : vector<2x128xf32>
    %c0_239 = arith.constant 0 : index
    %c0_240 = arith.constant 0 : index
    %c0_241 = arith.constant 0 : index
    %727 = vector.load %arg27[%c0_239, %c0_240, %c0_241] : memref<8x2x128xf32, #tpu.memory_space<vmem>>, vector<1x2x128xf32>
    %728 = vector.shape_cast %727 : vector<1x2x128xf32> to vector<2x128xf32>
    %729 = vector.shape_cast %726 : vector<2x128xf32> to vector<1x2x128xf32>
    tpu.vector_store %arg27[%c0_239, %c0_240, %c0_241], %729 {strides = array<i32>} : memref<8x2x128xf32, #tpu.memory_space<vmem>>, vector<1x2x128xf32>,
    %c1_242 = arith.constant 1 : index
    %c0_243 = arith.constant 0 : index
    %c0_244 = arith.constant 0 : index
    %730 = vector.load %arg24[%c1_242, %c0_243, %c0_244] : memref<8x2x32xf32, #tpu.memory_space<vmem>>, vector<1x2x32xf32>
    %731 = vector.shape_cast %730 : vector<1x2x32xf32> to vector<2x32xf32>
    %c1_245 = arith.constant 1 : index
    %c0_246 = arith.constant 0 : index
    %c0_247 = arith.constant 0 : index
    %732 = vector.load %arg25[%c1_245, %c0_246, %c0_247] : memref<8x2x32xf32, #tpu.memory_space<vmem>>, vector<1x2x32xf32>
    %733 = vector.shape_cast %732 : vector<1x2x32xf32> to vector<2x32xf32>
    %cst_248 = arith.constant dense<0.000000e+00> : vector<2x128xf32>
    %734 = tpu.matmul %731, %704, %cst_248 {dimension_numbers = #tpu.dot_dimension_numbers<[1], [0], [0], [1], [0, 0, 1, 1], [], []>} : vector<2x32xf32>, vector<32x128xf32>, vector<2x128xf32> -> vector<2x128xf32>
    %cst_249 = arith.constant dense<0.000000e+00> : vector<2x128xf32>
    %735 = tpu.matmul %733, %705, %cst_249 {dimension_numbers = #tpu.dot_dimension_numbers<[1], [0], [0], [1], [0, 0, 1, 1], [], []>} : vector<2x32xf32>, vector<32x128xf32>, vector<2x128xf32> -> vector<2x128xf32>
    %736 = arith.addf %734, %735 : vector<2x128xf32>
    %737 = vector.broadcast %706 : vector<1x128xf32> to vector<2x128xf32>
    %738 = arith.addf %736, %737 : vector<2x128xf32>
    %c1_250 = arith.constant 1 : index
    %c0_251 = arith.constant 0 : index
    %c0_252 = arith.constant 0 : index
    %739 = vector.load %arg26[%c1_250, %c0_251, %c0_252] : memref<8x2x128xf32, #tpu.memory_space<vmem>>, vector<1x2x128xf32>
    %740 = vector.shape_cast %739 : vector<1x2x128xf32> to vector<2x128xf32>
    %741 = vector.shape_cast %738 : vector<2x128xf32> to vector<1x2x128xf32>
    tpu.vector_store %arg26[%c1_250, %c0_251, %c0_252], %741 {strides = array<i32>} : memref<8x2x128xf32, #tpu.memory_space<vmem>>, vector<1x2x128xf32>,
    %cst_253 = arith.constant dense<0.000000e+00> : vector<2x128xf32>
    %742 = tpu.matmul %731, %707, %cst_253 {dimension_numbers = #tpu.dot_dimension_numbers<[1], [0], [0], [1], [0, 0, 1, 1], [], []>} : vector<2x32xf32>, vector<32x128xf32>, vector<2x128xf32> -> vector<2x128xf32>
    %cst_254 = arith.constant dense<0.000000e+00> : vector<2x128xf32>
    %743 = tpu.matmul %733, %708, %cst_254 {dimension_numbers = #tpu.dot_dimension_numbers<[1], [0], [0], [1], [0, 0, 1, 1], [], []>} : vector<2x32xf32>, vector<32x128xf32>, vector<2x128xf32> -> vector<2x128xf32>
    %744 = arith.addf %742, %743 : vector<2x128xf32>
    %745 = vector.broadcast %709 : vector<1x128xf32> to vector<2x128xf32>
    %746 = arith.addf %744, %745 : vector<2x128xf32>
    %c1_255 = arith.constant 1 : index
    %c0_256 = arith.constant 0 : index
    %c0_257 = arith.constant 0 : index
    %747 = vector.load %arg27[%c1_255, %c0_256, %c0_257] : memref<8x2x128xf32, #tpu.memory_space<vmem>>, vector<1x2x128xf32>
    %748 = vector.shape_cast %747 : vector<1x2x128xf32> to vector<2x128xf32>
    %749 = vector.shape_cast %746 : vector<2x128xf32> to vector<1x2x128xf32>
    tpu.vector_store %arg27[%c1_255, %c0_256, %c0_257], %749 {strides = array<i32>} : memref<8x2x128xf32, #tpu.memory_space<vmem>>, vector<1x2x128xf32>,
    %c2_258 = arith.constant 2 : index
    %c0_259 = arith.constant 0 : index
    %c0_260 = arith.constant 0 : index
    %750 = vector.load %arg24[%c2_258, %c0_259, %c0_260] : memref<8x2x32xf32, #tpu.memory_space<vmem>>, vector<1x2x32xf32>
    %751 = vector.shape_cast %750 : vector<1x2x32xf32> to vector<2x32xf32>
    %c2_261 = arith.constant 2 : index
    %c0_262 = arith.constant 0 : index
    %c0_263 = arith.constant 0 : index
    %752 = vector.load %arg25[%c2_261, %c0_262, %c0_263] : memref<8x2x32xf32, #tpu.memory_space<vmem>>, vector<1x2x32xf32>
    %753 = vector.shape_cast %752 : vector<1x2x32xf32> to vector<2x32xf32>
    %cst_264 = arith.constant dense<0.000000e+00> : vector<2x128xf32>
    %754 = tpu.matmul %751, %704, %cst_264 {dimension_numbers = #tpu.dot_dimension_numbers<[1], [0], [0], [1], [0, 0, 1, 1], [], []>} : vector<2x32xf32>, vector<32x128xf32>, vector<2x128xf32> -> vector<2x128xf32>
    %cst_265 = arith.constant dense<0.000000e+00> : vector<2x128xf32>
    %755 = tpu.matmul %753, %705, %cst_265 {dimension_numbers = #tpu.dot_dimension_numbers<[1], [0], [0], [1], [0, 0, 1, 1], [], []>} : vector<2x32xf32>, vector<32x128xf32>, vector<2x128xf32> -> vector<2x128xf32>
    %756 = arith.addf %754, %755 : vector<2x128xf32>
    %757 = vector.broadcast %706 : vector<1x128xf32> to vector<2x128xf32>
    %758 = arith.addf %756, %757 : vector<2x128xf32>
    %c2_266 = arith.constant 2 : index
    %c0_267 = arith.constant 0 : index
    %c0_268 = arith.constant 0 : index
    %759 = vector.load %arg26[%c2_266, %c0_267, %c0_268] : memref<8x2x128xf32, #tpu.memory_space<vmem>>, vector<1x2x128xf32>
    %760 = vector.shape_cast %759 : vector<1x2x128xf32> to vector<2x128xf32>
    %761 = vector.shape_cast %758 : vector<2x128xf32> to vector<1x2x128xf32>
    tpu.vector_store %arg26[%c2_266, %c0_267, %c0_268], %761 {strides = array<i32>} : memref<8x2x128xf32, #tpu.memory_space<vmem>>, vector<1x2x128xf32>,
    %cst_269 = arith.constant dense<0.000000e+00> : vector<2x128xf32>
    %762 = tpu.matmul %751, %707, %cst_269 {dimension_numbers = #tpu.dot_dimension_numbers<[1], [0], [0], [1], [0, 0, 1, 1], [], []>} : vector<2x32xf32>, vector<32x128xf32>, vector<2x128xf32> -> vector<2x128xf32>
    %cst_270 = arith.constant dense<0.000000e+00> : vector<2x128xf32>
    %763 = tpu.matmul %753, %708, %cst_270 {dimension_numbers = #tpu.dot_dimension_numbers<[1], [0], [0], [1], [0, 0, 1, 1], [], []>} : vector<2x32xf32>, vector<32x128xf32>, vector<2x128xf32> -> vector<2x128xf32>
    %764 = arith.addf %762, %763 : vector<2x128xf32>
    %765 = vector.broadcast %709 : vector<1x128xf32> to vector<2x128xf32>
    %766 = arith.addf %764, %765 : vector<2x128xf32>
    %c2_271 = arith.constant 2 : index
    %c0_272 = arith.constant 0 : index
    %c0_273 = arith.constant 0 : index
    %767 = vector.load %arg27[%c2_271, %c0_272, %c0_273] : memref<8x2x128xf32, #tpu.memory_space<vmem>>, vector<1x2x128xf32>
    %768 = vector.shape_cast %767 : vector<1x2x128xf32> to vector<2x128xf32>
    %769 = vector.shape_cast %766 : vector<2x128xf32> to vector<1x2x128xf32>
    tpu.vector_store %arg27[%c2_271, %c0_272, %c0_273], %769 {strides = array<i32>} : memref<8x2x128xf32, #tpu.memory_space<vmem>>, vector<1x2x128xf32>,
    %c3_274 = arith.constant 3 : index
    %c0_275 = arith.constant 0 : index
    %c0_276 = arith.constant 0 : index
    %770 = vector.load %arg24[%c3_274, %c0_275, %c0_276] : memref<8x2x32xf32, #tpu.memory_space<vmem>>, vector<1x2x32xf32>
    %771 = vector.shape_cast %770 : vector<1x2x32xf32> to vector<2x32xf32>
    %c3_277 = arith.constant 3 : index
    %c0_278 = arith.constant 0 : index
    %c0_279 = arith.constant 0 : index
    %772 = vector.load %arg25[%c3_277, %c0_278, %c0_279] : memref<8x2x32xf32, #tpu.memory_space<vmem>>, vector<1x2x32xf32>
    %773 = vector.shape_cast %772 : vector<1x2x32xf32> to vector<2x32xf32>
    %cst_280 = arith.constant dense<0.000000e+00> : vector<2x128xf32>
    %774 = tpu.matmul %771, %704, %cst_280 {dimension_numbers = #tpu.dot_dimension_numbers<[1], [0], [0], [1], [0, 0, 1, 1], [], []>} : vector<2x32xf32>, vector<32x128xf32>, vector<2x128xf32> -> vector<2x128xf32>
    %cst_281 = arith.constant dense<0.000000e+00> : vector<2x128xf32>
    %775 = tpu.matmul %773, %705, %cst_281 {dimension_numbers = #tpu.dot_dimension_numbers<[1], [0], [0], [1], [0, 0, 1, 1], [], []>} : vector<2x32xf32>, vector<32x128xf32>, vector<2x128xf32> -> vector<2x128xf32>
    %776 = arith.addf %774, %775 : vector<2x128xf32>
    %777 = vector.broadcast %706 : vector<1x128xf32> to vector<2x128xf32>
    %778 = arith.addf %776, %777 : vector<2x128xf32>
    %c3_282 = arith.constant 3 : index
    %c0_283 = arith.constant 0 : index
    %c0_284 = arith.constant 0 : index
    %779 = vector.load %arg26[%c3_282, %c0_283, %c0_284] : memref<8x2x128xf32, #tpu.memory_space<vmem>>, vector<1x2x128xf32>
    %780 = vector.shape_cast %779 : vector<1x2x128xf32> to vector<2x128xf32>
    %781 = vector.shape_cast %778 : vector<2x128xf32> to vector<1x2x128xf32>
    tpu.vector_store %arg26[%c3_282, %c0_283, %c0_284], %781 {strides = array<i32>} : memref<8x2x128xf32, #tpu.memory_space<vmem>>, vector<1x2x128xf32>,
    %cst_285 = arith.constant dense<0.000000e+00> : vector<2x128xf32>
    %782 = tpu.matmul %771, %707, %cst_285 {dimension_numbers = #tpu.dot_dimension_numbers<[1], [0], [0], [1], [0, 0, 1, 1], [], []>} : vector<2x32xf32>, vector<32x128xf32>, vector<2x128xf32> -> vector<2x128xf32>
    %cst_286 = arith.constant dense<0.000000e+00> : vector<2x128xf32>
    %783 = tpu.matmul %773, %708, %cst_286 {dimension_numbers = #tpu.dot_dimension_numbers<[1], [0], [0], [1], [0, 0, 1, 1], [], []>} : vector<2x32xf32>, vector<32x128xf32>, vector<2x128xf32> -> vector<2x128xf32>
    %784 = arith.addf %782, %783 : vector<2x128xf32>
    %785 = vector.broadcast %709 : vector<1x128xf32> to vector<2x128xf32>
    %786 = arith.addf %784, %785 : vector<2x128xf32>
    %c3_287 = arith.constant 3 : index
    %c0_288 = arith.constant 0 : index
    %c0_289 = arith.constant 0 : index
    %787 = vector.load %arg27[%c3_287, %c0_288, %c0_289] : memref<8x2x128xf32, #tpu.memory_space<vmem>>, vector<1x2x128xf32>
    %788 = vector.shape_cast %787 : vector<1x2x128xf32> to vector<2x128xf32>
    %789 = vector.shape_cast %786 : vector<2x128xf32> to vector<1x2x128xf32>
    tpu.vector_store %arg27[%c3_287, %c0_288, %c0_289], %789 {strides = array<i32>} : memref<8x2x128xf32, #tpu.memory_space<vmem>>, vector<1x2x128xf32>,
    %c4_290 = arith.constant 4 : index
    %c0_291 = arith.constant 0 : index
    %c0_292 = arith.constant 0 : index
    %790 = vector.load %arg24[%c4_290, %c0_291, %c0_292] : memref<8x2x32xf32, #tpu.memory_space<vmem>>, vector<1x2x32xf32>
    %791 = vector.shape_cast %790 : vector<1x2x32xf32> to vector<2x32xf32>
    %c4_293 = arith.constant 4 : index
    %c0_294 = arith.constant 0 : index
    %c0_295 = arith.constant 0 : index
    %792 = vector.load %arg25[%c4_293, %c0_294, %c0_295] : memref<8x2x32xf32, #tpu.memory_space<vmem>>, vector<1x2x32xf32>
    %793 = vector.shape_cast %792 : vector<1x2x32xf32> to vector<2x32xf32>
    %cst_296 = arith.constant dense<0.000000e+00> : vector<2x128xf32>
    %794 = tpu.matmul %791, %704, %cst_296 {dimension_numbers = #tpu.dot_dimension_numbers<[1], [0], [0], [1], [0, 0, 1, 1], [], []>} : vector<2x32xf32>, vector<32x128xf32>, vector<2x128xf32> -> vector<2x128xf32>
    %cst_297 = arith.constant dense<0.000000e+00> : vector<2x128xf32>
    %795 = tpu.matmul %793, %705, %cst_297 {dimension_numbers = #tpu.dot_dimension_numbers<[1], [0], [0], [1], [0, 0, 1, 1], [], []>} : vector<2x32xf32>, vector<32x128xf32>, vector<2x128xf32> -> vector<2x128xf32>
    %796 = arith.addf %794, %795 : vector<2x128xf32>
    %797 = vector.broadcast %706 : vector<1x128xf32> to vector<2x128xf32>
    %798 = arith.addf %796, %797 : vector<2x128xf32>
    %c4_298 = arith.constant 4 : index
    %c0_299 = arith.constant 0 : index
    %c0_300 = arith.constant 0 : index
    %799 = vector.load %arg26[%c4_298, %c0_299, %c0_300] : memref<8x2x128xf32, #tpu.memory_space<vmem>>, vector<1x2x128xf32>
    %800 = vector.shape_cast %799 : vector<1x2x128xf32> to vector<2x128xf32>
    %801 = vector.shape_cast %798 : vector<2x128xf32> to vector<1x2x128xf32>
    tpu.vector_store %arg26[%c4_298, %c0_299, %c0_300], %801 {strides = array<i32>} : memref<8x2x128xf32, #tpu.memory_space<vmem>>, vector<1x2x128xf32>,
    %cst_301 = arith.constant dense<0.000000e+00> : vector<2x128xf32>
    %802 = tpu.matmul %791, %707, %cst_301 {dimension_numbers = #tpu.dot_dimension_numbers<[1], [0], [0], [1], [0, 0, 1, 1], [], []>} : vector<2x32xf32>, vector<32x128xf32>, vector<2x128xf32> -> vector<2x128xf32>
    %cst_302 = arith.constant dense<0.000000e+00> : vector<2x128xf32>
    %803 = tpu.matmul %793, %708, %cst_302 {dimension_numbers = #tpu.dot_dimension_numbers<[1], [0], [0], [1], [0, 0, 1, 1], [], []>} : vector<2x32xf32>, vector<32x128xf32>, vector<2x128xf32> -> vector<2x128xf32>
    %804 = arith.addf %802, %803 : vector<2x128xf32>
    %805 = vector.broadcast %709 : vector<1x128xf32> to vector<2x128xf32>
    %806 = arith.addf %804, %805 : vector<2x128xf32>
    %c4_303 = arith.constant 4 : index
    %c0_304 = arith.constant 0 : index
    %c0_305 = arith.constant 0 : index
    %807 = vector.load %arg27[%c4_303, %c0_304, %c0_305] : memref<8x2x128xf32, #tpu.memory_space<vmem>>, vector<1x2x128xf32>
    %808 = vector.shape_cast %807 : vector<1x2x128xf32> to vector<2x128xf32>
    %809 = vector.shape_cast %806 : vector<2x128xf32> to vector<1x2x128xf32>
    tpu.vector_store %arg27[%c4_303, %c0_304, %c0_305], %809 {strides = array<i32>} : memref<8x2x128xf32, #tpu.memory_space<vmem>>, vector<1x2x128xf32>,
    %c5_306 = arith.constant 5 : index
    %c0_307 = arith.constant 0 : index
    %c0_308 = arith.constant 0 : index
    %810 = vector.load %arg24[%c5_306, %c0_307, %c0_308] : memref<8x2x32xf32, #tpu.memory_space<vmem>>, vector<1x2x32xf32>
    %811 = vector.shape_cast %810 : vector<1x2x32xf32> to vector<2x32xf32>
    %c5_309 = arith.constant 5 : index
    %c0_310 = arith.constant 0 : index
    %c0_311 = arith.constant 0 : index
    %812 = vector.load %arg25[%c5_309, %c0_310, %c0_311] : memref<8x2x32xf32, #tpu.memory_space<vmem>>, vector<1x2x32xf32>
    %813 = vector.shape_cast %812 : vector<1x2x32xf32> to vector<2x32xf32>
    %cst_312 = arith.constant dense<0.000000e+00> : vector<2x128xf32>
    %814 = tpu.matmul %811, %704, %cst_312 {dimension_numbers = #tpu.dot_dimension_numbers<[1], [0], [0], [1], [0, 0, 1, 1], [], []>} : vector<2x32xf32>, vector<32x128xf32>, vector<2x128xf32> -> vector<2x128xf32>
    %cst_313 = arith.constant dense<0.000000e+00> : vector<2x128xf32>
    %815 = tpu.matmul %813, %705, %cst_313 {dimension_numbers = #tpu.dot_dimension_numbers<[1], [0], [0], [1], [0, 0, 1, 1], [], []>} : vector<2x32xf32>, vector<32x128xf32>, vector<2x128xf32> -> vector<2x128xf32>
    %816 = arith.addf %814, %815 : vector<2x128xf32>
    %817 = vector.broadcast %706 : vector<1x128xf32> to vector<2x128xf32>
    %818 = arith.addf %816, %817 : vector<2x128xf32>
    %c5_314 = arith.constant 5 : index
    %c0_315 = arith.constant 0 : index
    %c0_316 = arith.constant 0 : index
    %819 = vector.load %arg26[%c5_314, %c0_315, %c0_316] : memref<8x2x128xf32, #tpu.memory_space<vmem>>, vector<1x2x128xf32>
    %820 = vector.shape_cast %819 : vector<1x2x128xf32> to vector<2x128xf32>
    %821 = vector.shape_cast %818 : vector<2x128xf32> to vector<1x2x128xf32>
    tpu.vector_store %arg26[%c5_314, %c0_315, %c0_316], %821 {strides = array<i32>} : memref<8x2x128xf32, #tpu.memory_space<vmem>>, vector<1x2x128xf32>,
    %cst_317 = arith.constant dense<0.000000e+00> : vector<2x128xf32>
    %822 = tpu.matmul %811, %707, %cst_317 {dimension_numbers = #tpu.dot_dimension_numbers<[1], [0], [0], [1], [0, 0, 1, 1], [], []>} : vector<2x32xf32>, vector<32x128xf32>, vector<2x128xf32> -> vector<2x128xf32>
    %cst_318 = arith.constant dense<0.000000e+00> : vector<2x128xf32>
    %823 = tpu.matmul %813, %708, %cst_318 {dimension_numbers = #tpu.dot_dimension_numbers<[1], [0], [0], [1], [0, 0, 1, 1], [], []>} : vector<2x32xf32>, vector<32x128xf32>, vector<2x128xf32> -> vector<2x128xf32>
    %824 = arith.addf %822, %823 : vector<2x128xf32>
    %825 = vector.broadcast %709 : vector<1x128xf32> to vector<2x128xf32>
    %826 = arith.addf %824, %825 : vector<2x128xf32>
    %c5_319 = arith.constant 5 : index
    %c0_320 = arith.constant 0 : index
    %c0_321 = arith.constant 0 : index
    %827 = vector.load %arg27[%c5_319, %c0_320, %c0_321] : memref<8x2x128xf32, #tpu.memory_space<vmem>>, vector<1x2x128xf32>
    %828 = vector.shape_cast %827 : vector<1x2x128xf32> to vector<2x128xf32>
    %829 = vector.shape_cast %826 : vector<2x128xf32> to vector<1x2x128xf32>
    tpu.vector_store %arg27[%c5_319, %c0_320, %c0_321], %829 {strides = array<i32>} : memref<8x2x128xf32, #tpu.memory_space<vmem>>, vector<1x2x128xf32>,
    %c6_322 = arith.constant 6 : index
    %c0_323 = arith.constant 0 : index
    %c0_324 = arith.constant 0 : index
    %830 = vector.load %arg24[%c6_322, %c0_323, %c0_324] : memref<8x2x32xf32, #tpu.memory_space<vmem>>, vector<1x2x32xf32>
    %831 = vector.shape_cast %830 : vector<1x2x32xf32> to vector<2x32xf32>
    %c6_325 = arith.constant 6 : index
    %c0_326 = arith.constant 0 : index
    %c0_327 = arith.constant 0 : index
    %832 = vector.load %arg25[%c6_325, %c0_326, %c0_327] : memref<8x2x32xf32, #tpu.memory_space<vmem>>, vector<1x2x32xf32>
    %833 = vector.shape_cast %832 : vector<1x2x32xf32> to vector<2x32xf32>
    %cst_328 = arith.constant dense<0.000000e+00> : vector<2x128xf32>
    %834 = tpu.matmul %831, %704, %cst_328 {dimension_numbers = #tpu.dot_dimension_numbers<[1], [0], [0], [1], [0, 0, 1, 1], [], []>} : vector<2x32xf32>, vector<32x128xf32>, vector<2x128xf32> -> vector<2x128xf32>
    %cst_329 = arith.constant dense<0.000000e+00> : vector<2x128xf32>
    %835 = tpu.matmul %833, %705, %cst_329 {dimension_numbers = #tpu.dot_dimension_numbers<[1], [0], [0], [1], [0, 0, 1, 1], [], []>} : vector<2x32xf32>, vector<32x128xf32>, vector<2x128xf32> -> vector<2x128xf32>
    %836 = arith.addf %834, %835 : vector<2x128xf32>
    %837 = vector.broadcast %706 : vector<1x128xf32> to vector<2x128xf32>
    %838 = arith.addf %836, %837 : vector<2x128xf32>
    %c6_330 = arith.constant 6 : index
    %c0_331 = arith.constant 0 : index
    %c0_332 = arith.constant 0 : index
    %839 = vector.load %arg26[%c6_330, %c0_331, %c0_332] : memref<8x2x128xf32, #tpu.memory_space<vmem>>, vector<1x2x128xf32>
    %840 = vector.shape_cast %839 : vector<1x2x128xf32> to vector<2x128xf32>
    %841 = vector.shape_cast %838 : vector<2x128xf32> to vector<1x2x128xf32>
    tpu.vector_store %arg26[%c6_330, %c0_331, %c0_332], %841 {strides = array<i32>} : memref<8x2x128xf32, #tpu.memory_space<vmem>>, vector<1x2x128xf32>,
    %cst_333 = arith.constant dense<0.000000e+00> : vector<2x128xf32>
    %842 = tpu.matmul %831, %707, %cst_333 {dimension_numbers = #tpu.dot_dimension_numbers<[1], [0], [0], [1], [0, 0, 1, 1], [], []>} : vector<2x32xf32>, vector<32x128xf32>, vector<2x128xf32> -> vector<2x128xf32>
    %cst_334 = arith.constant dense<0.000000e+00> : vector<2x128xf32>
    %843 = tpu.matmul %833, %708, %cst_334 {dimension_numbers = #tpu.dot_dimension_numbers<[1], [0], [0], [1], [0, 0, 1, 1], [], []>} : vector<2x32xf32>, vector<32x128xf32>, vector<2x128xf32> -> vector<2x128xf32>
    %844 = arith.addf %842, %843 : vector<2x128xf32>
    %845 = vector.broadcast %709 : vector<1x128xf32> to vector<2x128xf32>
    %846 = arith.addf %844, %845 : vector<2x128xf32>
    %c6_335 = arith.constant 6 : index
    %c0_336 = arith.constant 0 : index
    %c0_337 = arith.constant 0 : index
    %847 = vector.load %arg27[%c6_335, %c0_336, %c0_337] : memref<8x2x128xf32, #tpu.memory_space<vmem>>, vector<1x2x128xf32>
    %848 = vector.shape_cast %847 : vector<1x2x128xf32> to vector<2x128xf32>
    %849 = vector.shape_cast %846 : vector<2x128xf32> to vector<1x2x128xf32>
    tpu.vector_store %arg27[%c6_335, %c0_336, %c0_337], %849 {strides = array<i32>} : memref<8x2x128xf32, #tpu.memory_space<vmem>>, vector<1x2x128xf32>,
    %c7_338 = arith.constant 7 : index
    %c0_339 = arith.constant 0 : index
    %c0_340 = arith.constant 0 : index
    %850 = vector.load %arg24[%c7_338, %c0_339, %c0_340] : memref<8x2x32xf32, #tpu.memory_space<vmem>>, vector<1x2x32xf32>
    %851 = vector.shape_cast %850 : vector<1x2x32xf32> to vector<2x32xf32>
    %c7_341 = arith.constant 7 : index
    %c0_342 = arith.constant 0 : index
    %c0_343 = arith.constant 0 : index
    %852 = vector.load %arg25[%c7_341, %c0_342, %c0_343] : memref<8x2x32xf32, #tpu.memory_space<vmem>>, vector<1x2x32xf32>
    %853 = vector.shape_cast %852 : vector<1x2x32xf32> to vector<2x32xf32>
    %cst_344 = arith.constant dense<0.000000e+00> : vector<2x128xf32>
    %854 = tpu.matmul %851, %704, %cst_344 {dimension_numbers = #tpu.dot_dimension_numbers<[1], [0], [0], [1], [0, 0, 1, 1], [], []>} : vector<2x32xf32>, vector<32x128xf32>, vector<2x128xf32> -> vector<2x128xf32>
    %cst_345 = arith.constant dense<0.000000e+00> : vector<2x128xf32>
    %855 = tpu.matmul %853, %705, %cst_345 {dimension_numbers = #tpu.dot_dimension_numbers<[1], [0], [0], [1], [0, 0, 1, 1], [], []>} : vector<2x32xf32>, vector<32x128xf32>, vector<2x128xf32> -> vector<2x128xf32>
    %856 = arith.addf %854, %855 : vector<2x128xf32>
    %857 = vector.broadcast %706 : vector<1x128xf32> to vector<2x128xf32>
    %858 = arith.addf %856, %857 : vector<2x128xf32>
    %c7_346 = arith.constant 7 : index
    %c0_347 = arith.constant 0 : index
    %c0_348 = arith.constant 0 : index
    %859 = vector.load %arg26[%c7_346, %c0_347, %c0_348] : memref<8x2x128xf32, #tpu.memory_space<vmem>>, vector<1x2x128xf32>
    %860 = vector.shape_cast %859 : vector<1x2x128xf32> to vector<2x128xf32>
    %861 = vector.shape_cast %858 : vector<2x128xf32> to vector<1x2x128xf32>
    tpu.vector_store %arg26[%c7_346, %c0_347, %c0_348], %861 {strides = array<i32>} : memref<8x2x128xf32, #tpu.memory_space<vmem>>, vector<1x2x128xf32>,
    %cst_349 = arith.constant dense<0.000000e+00> : vector<2x128xf32>
    %862 = tpu.matmul %851, %707, %cst_349 {dimension_numbers = #tpu.dot_dimension_numbers<[1], [0], [0], [1], [0, 0, 1, 1], [], []>} : vector<2x32xf32>, vector<32x128xf32>, vector<2x128xf32> -> vector<2x128xf32>
    %cst_350 = arith.constant dense<0.000000e+00> : vector<2x128xf32>
    %863 = tpu.matmul %853, %708, %cst_350 {dimension_numbers = #tpu.dot_dimension_numbers<[1], [0], [0], [1], [0, 0, 1, 1], [], []>} : vector<2x32xf32>, vector<32x128xf32>, vector<2x128xf32> -> vector<2x128xf32>
    %864 = arith.addf %862, %863 : vector<2x128xf32>
    %865 = vector.broadcast %709 : vector<1x128xf32> to vector<2x128xf32>
    %866 = arith.addf %864, %865 : vector<2x128xf32>
    %c7_351 = arith.constant 7 : index
    %c0_352 = arith.constant 0 : index
    %c0_353 = arith.constant 0 : index
    %867 = vector.load %arg27[%c7_351, %c0_352, %c0_353] : memref<8x2x128xf32, #tpu.memory_space<vmem>>, vector<1x2x128xf32>
    %868 = vector.shape_cast %867 : vector<1x2x128xf32> to vector<2x128xf32>
    %869 = vector.shape_cast %866 : vector<2x128xf32> to vector<1x2x128xf32>
    tpu.vector_store %arg27[%c7_351, %c0_352, %c0_353], %869 {strides = array<i32>} : memref<8x2x128xf32, #tpu.memory_space<vmem>>, vector<1x2x128xf32>,
    %c0_354 = arith.constant 0 : index
    %c0_355 = arith.constant 0 : index
    %870 = vector.load %arg11[%c0_354, %c0_355] : memref<32x128xf32, #tpu.memory_space<vmem>>, vector<32x128xf32>
    %c0_356 = arith.constant 0 : index
    %c0_357 = arith.constant 0 : index
    %871 = vector.load %arg15[%c0_356, %c0_357] : memref<32x128xf32, #tpu.memory_space<vmem>>, vector<32x128xf32>
    %c0_i32_358 = arith.constant 0 : i32
    %c7_i32_359 = arith.constant 7 : i32
    %872 = arith.subi %c7_i32_359, %c0_i32_358 : i32
    %873 = vector.broadcast %c0_i32_358 : i32 to vector<2x1xi32>
    %874 = arith.cmpi slt, %873, %0 : vector<2x1xi32>
    %875 = vector.broadcast %872 : i32 to vector<2x1xi32>
    %876 = arith.cmpi slt, %875, %0 : vector<2x1xi32>
    %877 = arith.index_cast %c0_i32_358 : i32 to index
    %c0_360 = arith.constant 0 : index
    %c0_361 = arith.constant 0 : index
    %878 = vector.load %arg26[%877, %c0_360, %c0_361] : memref<8x2x128xf32, #tpu.memory_space<vmem>>, vector<1x2x128xf32>
    %879 = vector.shape_cast %878 : vector<1x2x128xf32> to vector<2x128xf32>
    %cst_362 = arith.constant dense<0.000000e+00> : vector<2x128xf32>
    %880 = tpu.matmul %119, %870, %cst_362 {dimension_numbers = #tpu.dot_dimension_numbers<[1], [0], [0], [1], [0, 0, 1, 1], [], []>} : vector<2x32xf32>, vector<32x128xf32>, vector<2x128xf32> -> vector<2x128xf32>
    %881 = arith.addf %879, %880 : vector<2x128xf32>
    %882 = arith.negf %881 : vector<2x128xf32>
    %883 = math.exp %882 : vector<2x128xf32>
    %cst_363 = arith.constant 1.000000e+00 : f32
    %884 = vector.broadcast %cst_363 : f32 to vector<2x128xf32>
    %885 = arith.addf %884, %883 : vector<2x128xf32>
    %886 = arith.divf %884, %885 : vector<2x128xf32>
    %887 = vector.extract_strided_slice %886 {offsets = [0, 0], sizes = [2, 32], strides = [1, 1]} : vector<2x128xf32> to vector<2x32xf32>
    %888 = vector.extract_strided_slice %886 {offsets = [0, 32], sizes = [2, 32], strides = [1, 1]} : vector<2x128xf32> to vector<2x32xf32>
    %889 = vector.extract_strided_slice %886 {offsets = [0, 96], sizes = [2, 32], strides = [1, 1]} : vector<2x128xf32> to vector<2x32xf32>
    %890 = vector.extract_strided_slice %881 {offsets = [0, 64], sizes = [2, 32], strides = [1, 1]} : vector<2x128xf32> to vector<2x32xf32>
    %891 = math.tanh %890 : vector<2x32xf32>
    %892 = arith.mulf %888, %119 : vector<2x32xf32>
    %893 = arith.mulf %887, %891 : vector<2x32xf32>
    %894 = arith.addf %892, %893 : vector<2x32xf32>
    %895 = math.tanh %894 : vector<2x32xf32>
    %896 = arith.mulf %889, %895 : vector<2x32xf32>
    %897 = vector.shape_cast %874 : vector<2x1xi1> to vector<2x1xi1>
    %898 = vector.broadcast %897 : vector<2x1xi1> to vector<2x32xi1>
    %899 = arith.select %898, %896, %119 : vector<2x32xi1>, vector<2x32xf32>
    %900 = vector.shape_cast %874 : vector<2x1xi1> to vector<2x1xi1>
    %901 = vector.broadcast %900 : vector<2x1xi1> to vector<2x32xi1>
    %902 = arith.select %901, %894, %119 : vector<2x32xi1>, vector<2x32xf32>
    %903 = arith.index_cast %872 : i32 to index
    %c0_364 = arith.constant 0 : index
    %c0_365 = arith.constant 0 : index
    %904 = vector.load %arg27[%903, %c0_364, %c0_365] : memref<8x2x128xf32, #tpu.memory_space<vmem>>, vector<1x2x128xf32>
    %905 = vector.shape_cast %904 : vector<1x2x128xf32> to vector<2x128xf32>
    %cst_366 = arith.constant dense<0.000000e+00> : vector<2x128xf32>
    %906 = tpu.matmul %119, %871, %cst_366 {dimension_numbers = #tpu.dot_dimension_numbers<[1], [0], [0], [1], [0, 0, 1, 1], [], []>} : vector<2x32xf32>, vector<32x128xf32>, vector<2x128xf32> -> vector<2x128xf32>
    %907 = arith.addf %905, %906 : vector<2x128xf32>
    %908 = arith.negf %907 : vector<2x128xf32>
    %909 = math.exp %908 : vector<2x128xf32>
    %cst_367 = arith.constant 1.000000e+00 : f32
    %910 = vector.broadcast %cst_367 : f32 to vector<2x128xf32>
    %911 = arith.addf %910, %909 : vector<2x128xf32>
    %912 = arith.divf %910, %911 : vector<2x128xf32>
    %913 = vector.extract_strided_slice %912 {offsets = [0, 0], sizes = [2, 32], strides = [1, 1]} : vector<2x128xf32> to vector<2x32xf32>
    %914 = vector.extract_strided_slice %912 {offsets = [0, 32], sizes = [2, 32], strides = [1, 1]} : vector<2x128xf32> to vector<2x32xf32>
    %915 = vector.extract_strided_slice %912 {offsets = [0, 96], sizes = [2, 32], strides = [1, 1]} : vector<2x128xf32> to vector<2x32xf32>
    %916 = vector.extract_strided_slice %907 {offsets = [0, 64], sizes = [2, 32], strides = [1, 1]} : vector<2x128xf32> to vector<2x32xf32>
    %917 = math.tanh %916 : vector<2x32xf32>
    %918 = arith.mulf %914, %119 : vector<2x32xf32>
    %919 = arith.mulf %913, %917 : vector<2x32xf32>
    %920 = arith.addf %918, %919 : vector<2x32xf32>
    %921 = math.tanh %920 : vector<2x32xf32>
    %922 = arith.mulf %915, %921 : vector<2x32xf32>
    %923 = vector.shape_cast %876 : vector<2x1xi1> to vector<2x1xi1>
    %924 = vector.broadcast %923 : vector<2x1xi1> to vector<2x32xi1>
    %925 = arith.select %924, %922, %119 : vector<2x32xi1>, vector<2x32xf32>
    %926 = vector.shape_cast %876 : vector<2x1xi1> to vector<2x1xi1>
    %927 = vector.broadcast %926 : vector<2x1xi1> to vector<2x32xi1>
    %928 = arith.select %927, %920, %119 : vector<2x32xi1>, vector<2x32xf32>
    %c1_i32_368 = arith.constant 1 : i32
    %c7_i32_369 = arith.constant 7 : i32
    %929 = arith.subi %c7_i32_369, %c1_i32_368 : i32
    %930 = vector.broadcast %c1_i32_368 : i32 to vector<2x1xi32>
    %931 = arith.cmpi slt, %930, %0 : vector<2x1xi32>
    %932 = vector.broadcast %929 : i32 to vector<2x1xi32>
    %933 = arith.cmpi slt, %932, %0 : vector<2x1xi32>
    %934 = arith.index_cast %c1_i32_368 : i32 to index
    %c0_370 = arith.constant 0 : index
    %c0_371 = arith.constant 0 : index
    %935 = vector.load %arg26[%934, %c0_370, %c0_371] : memref<8x2x128xf32, #tpu.memory_space<vmem>>, vector<1x2x128xf32>
    %936 = vector.shape_cast %935 : vector<1x2x128xf32> to vector<2x128xf32>
    %cst_372 = arith.constant dense<0.000000e+00> : vector<2x128xf32>
    %937 = tpu.matmul %899, %870, %cst_372 {dimension_numbers = #tpu.dot_dimension_numbers<[1], [0], [0], [1], [0, 0, 1, 1], [], []>} : vector<2x32xf32>, vector<32x128xf32>, vector<2x128xf32> -> vector<2x128xf32>
    %938 = arith.addf %936, %937 : vector<2x128xf32>
    %939 = arith.negf %938 : vector<2x128xf32>
    %940 = math.exp %939 : vector<2x128xf32>
    %cst_373 = arith.constant 1.000000e+00 : f32
    %941 = vector.broadcast %cst_373 : f32 to vector<2x128xf32>
    %942 = arith.addf %941, %940 : vector<2x128xf32>
    %943 = arith.divf %941, %942 : vector<2x128xf32>
    %944 = vector.extract_strided_slice %943 {offsets = [0, 0], sizes = [2, 32], strides = [1, 1]} : vector<2x128xf32> to vector<2x32xf32>
    %945 = vector.extract_strided_slice %943 {offsets = [0, 32], sizes = [2, 32], strides = [1, 1]} : vector<2x128xf32> to vector<2x32xf32>
    %946 = vector.extract_strided_slice %943 {offsets = [0, 96], sizes = [2, 32], strides = [1, 1]} : vector<2x128xf32> to vector<2x32xf32>
    %947 = vector.extract_strided_slice %938 {offsets = [0, 64], sizes = [2, 32], strides = [1, 1]} : vector<2x128xf32> to vector<2x32xf32>
    %948 = math.tanh %947 : vector<2x32xf32>
    %949 = arith.mulf %945, %902 : vector<2x32xf32>
    %950 = arith.mulf %944, %948 : vector<2x32xf32>
    %951 = arith.addf %949, %950 : vector<2x32xf32>
    %952 = math.tanh %951 : vector<2x32xf32>
    %953 = arith.mulf %946, %952 : vector<2x32xf32>
    %954 = vector.shape_cast %931 : vector<2x1xi1> to vector<2x1xi1>
    %955 = vector.broadcast %954 : vector<2x1xi1> to vector<2x32xi1>
    %956 = arith.select %955, %953, %899 : vector<2x32xi1>, vector<2x32xf32>
    %957 = vector.shape_cast %931 : vector<2x1xi1> to vector<2x1xi1>
    %958 = vector.broadcast %957 : vector<2x1xi1> to vector<2x32xi1>
    %959 = arith.select %958, %951, %902 : vector<2x32xi1>, vector<2x32xf32>
    %960 = arith.index_cast %929 : i32 to index
    %c0_374 = arith.constant 0 : index
    %c0_375 = arith.constant 0 : index
    %961 = vector.load %arg27[%960, %c0_374, %c0_375] : memref<8x2x128xf32, #tpu.memory_space<vmem>>, vector<1x2x128xf32>
    %962 = vector.shape_cast %961 : vector<1x2x128xf32> to vector<2x128xf32>
    %cst_376 = arith.constant dense<0.000000e+00> : vector<2x128xf32>
    %963 = tpu.matmul %925, %871, %cst_376 {dimension_numbers = #tpu.dot_dimension_numbers<[1], [0], [0], [1], [0, 0, 1, 1], [], []>} : vector<2x32xf32>, vector<32x128xf32>, vector<2x128xf32> -> vector<2x128xf32>
    %964 = arith.addf %962, %963 : vector<2x128xf32>
    %965 = arith.negf %964 : vector<2x128xf32>
    %966 = math.exp %965 : vector<2x128xf32>
    %cst_377 = arith.constant 1.000000e+00 : f32
    %967 = vector.broadcast %cst_377 : f32 to vector<2x128xf32>
    %968 = arith.addf %967, %966 : vector<2x128xf32>
    %969 = arith.divf %967, %968 : vector<2x128xf32>
    %970 = vector.extract_strided_slice %969 {offsets = [0, 0], sizes = [2, 32], strides = [1, 1]} : vector<2x128xf32> to vector<2x32xf32>
    %971 = vector.extract_strided_slice %969 {offsets = [0, 32], sizes = [2, 32], strides = [1, 1]} : vector<2x128xf32> to vector<2x32xf32>
    %972 = vector.extract_strided_slice %969 {offsets = [0, 96], sizes = [2, 32], strides = [1, 1]} : vector<2x128xf32> to vector<2x32xf32>
    %973 = vector.extract_strided_slice %964 {offsets = [0, 64], sizes = [2, 32], strides = [1, 1]} : vector<2x128xf32> to vector<2x32xf32>
    %974 = math.tanh %973 : vector<2x32xf32>
    %975 = arith.mulf %971, %928 : vector<2x32xf32>
    %976 = arith.mulf %970, %974 : vector<2x32xf32>
    %977 = arith.addf %975, %976 : vector<2x32xf32>
    %978 = math.tanh %977 : vector<2x32xf32>
    %979 = arith.mulf %972, %978 : vector<2x32xf32>
    %980 = vector.shape_cast %933 : vector<2x1xi1> to vector<2x1xi1>
    %981 = vector.broadcast %980 : vector<2x1xi1> to vector<2x32xi1>
    %982 = arith.select %981, %979, %925 : vector<2x32xi1>, vector<2x32xf32>
    %983 = vector.shape_cast %933 : vector<2x1xi1> to vector<2x1xi1>
    %984 = vector.broadcast %983 : vector<2x1xi1> to vector<2x32xi1>
    %985 = arith.select %984, %977, %928 : vector<2x32xi1>, vector<2x32xf32>
    %c2_i32_378 = arith.constant 2 : i32
    %c7_i32_379 = arith.constant 7 : i32
    %986 = arith.subi %c7_i32_379, %c2_i32_378 : i32
    %987 = vector.broadcast %c2_i32_378 : i32 to vector<2x1xi32>
    %988 = arith.cmpi slt, %987, %0 : vector<2x1xi32>
    %989 = vector.broadcast %986 : i32 to vector<2x1xi32>
    %990 = arith.cmpi slt, %989, %0 : vector<2x1xi32>
    %991 = arith.index_cast %c2_i32_378 : i32 to index
    %c0_380 = arith.constant 0 : index
    %c0_381 = arith.constant 0 : index
    %992 = vector.load %arg26[%991, %c0_380, %c0_381] : memref<8x2x128xf32, #tpu.memory_space<vmem>>, vector<1x2x128xf32>
    %993 = vector.shape_cast %992 : vector<1x2x128xf32> to vector<2x128xf32>
    %cst_382 = arith.constant dense<0.000000e+00> : vector<2x128xf32>
    %994 = tpu.matmul %956, %870, %cst_382 {dimension_numbers = #tpu.dot_dimension_numbers<[1], [0], [0], [1], [0, 0, 1, 1], [], []>} : vector<2x32xf32>, vector<32x128xf32>, vector<2x128xf32> -> vector<2x128xf32>
    %995 = arith.addf %993, %994 : vector<2x128xf32>
    %996 = arith.negf %995 : vector<2x128xf32>
    %997 = math.exp %996 : vector<2x128xf32>
    %cst_383 = arith.constant 1.000000e+00 : f32
    %998 = vector.broadcast %cst_383 : f32 to vector<2x128xf32>
    %999 = arith.addf %998, %997 : vector<2x128xf32>
    %1000 = arith.divf %998, %999 : vector<2x128xf32>
    %1001 = vector.extract_strided_slice %1000 {offsets = [0, 0], sizes = [2, 32], strides = [1, 1]} : vector<2x128xf32> to vector<2x32xf32>
    %1002 = vector.extract_strided_slice %1000 {offsets = [0, 32], sizes = [2, 32], strides = [1, 1]} : vector<2x128xf32> to vector<2x32xf32>
    %1003 = vector.extract_strided_slice %1000 {offsets = [0, 96], sizes = [2, 32], strides = [1, 1]} : vector<2x128xf32> to vector<2x32xf32>
    %1004 = vector.extract_strided_slice %995 {offsets = [0, 64], sizes = [2, 32], strides = [1, 1]} : vector<2x128xf32> to vector<2x32xf32>
    %1005 = math.tanh %1004 : vector<2x32xf32>
    %1006 = arith.mulf %1002, %959 : vector<2x32xf32>
    %1007 = arith.mulf %1001, %1005 : vector<2x32xf32>
    %1008 = arith.addf %1006, %1007 : vector<2x32xf32>
    %1009 = math.tanh %1008 : vector<2x32xf32>
    %1010 = arith.mulf %1003, %1009 : vector<2x32xf32>
    %1011 = vector.shape_cast %988 : vector<2x1xi1> to vector<2x1xi1>
    %1012 = vector.broadcast %1011 : vector<2x1xi1> to vector<2x32xi1>
    %1013 = arith.select %1012, %1010, %956 : vector<2x32xi1>, vector<2x32xf32>
    %1014 = vector.shape_cast %988 : vector<2x1xi1> to vector<2x1xi1>
    %1015 = vector.broadcast %1014 : vector<2x1xi1> to vector<2x32xi1>
    %1016 = arith.select %1015, %1008, %959 : vector<2x32xi1>, vector<2x32xf32>
    %1017 = arith.index_cast %986 : i32 to index
    %c0_384 = arith.constant 0 : index
    %c0_385 = arith.constant 0 : index
    %1018 = vector.load %arg27[%1017, %c0_384, %c0_385] : memref<8x2x128xf32, #tpu.memory_space<vmem>>, vector<1x2x128xf32>
    %1019 = vector.shape_cast %1018 : vector<1x2x128xf32> to vector<2x128xf32>
    %cst_386 = arith.constant dense<0.000000e+00> : vector<2x128xf32>
    %1020 = tpu.matmul %982, %871, %cst_386 {dimension_numbers = #tpu.dot_dimension_numbers<[1], [0], [0], [1], [0, 0, 1, 1], [], []>} : vector<2x32xf32>, vector<32x128xf32>, vector<2x128xf32> -> vector<2x128xf32>
    %1021 = arith.addf %1019, %1020 : vector<2x128xf32>
    %1022 = arith.negf %1021 : vector<2x128xf32>
    %1023 = math.exp %1022 : vector<2x128xf32>
    %cst_387 = arith.constant 1.000000e+00 : f32
    %1024 = vector.broadcast %cst_387 : f32 to vector<2x128xf32>
    %1025 = arith.addf %1024, %1023 : vector<2x128xf32>
    %1026 = arith.divf %1024, %1025 : vector<2x128xf32>
    %1027 = vector.extract_strided_slice %1026 {offsets = [0, 0], sizes = [2, 32], strides = [1, 1]} : vector<2x128xf32> to vector<2x32xf32>
    %1028 = vector.extract_strided_slice %1026 {offsets = [0, 32], sizes = [2, 32], strides = [1, 1]} : vector<2x128xf32> to vector<2x32xf32>
    %1029 = vector.extract_strided_slice %1026 {offsets = [0, 96], sizes = [2, 32], strides = [1, 1]} : vector<2x128xf32> to vector<2x32xf32>
    %1030 = vector.extract_strided_slice %1021 {offsets = [0, 64], sizes = [2, 32], strides = [1, 1]} : vector<2x128xf32> to vector<2x32xf32>
    %1031 = math.tanh %1030 : vector<2x32xf32>
    %1032 = arith.mulf %1028, %985 : vector<2x32xf32>
    %1033 = arith.mulf %1027, %1031 : vector<2x32xf32>
    %1034 = arith.addf %1032, %1033 : vector<2x32xf32>
    %1035 = math.tanh %1034 : vector<2x32xf32>
    %1036 = arith.mulf %1029, %1035 : vector<2x32xf32>
    %1037 = vector.shape_cast %990 : vector<2x1xi1> to vector<2x1xi1>
    %1038 = vector.broadcast %1037 : vector<2x1xi1> to vector<2x32xi1>
    %1039 = arith.select %1038, %1036, %982 : vector<2x32xi1>, vector<2x32xf32>
    %1040 = vector.shape_cast %990 : vector<2x1xi1> to vector<2x1xi1>
    %1041 = vector.broadcast %1040 : vector<2x1xi1> to vector<2x32xi1>
    %1042 = arith.select %1041, %1034, %985 : vector<2x32xi1>, vector<2x32xf32>
    %c3_i32_388 = arith.constant 3 : i32
    %c7_i32_389 = arith.constant 7 : i32
    %1043 = arith.subi %c7_i32_389, %c3_i32_388 : i32
    %1044 = vector.broadcast %c3_i32_388 : i32 to vector<2x1xi32>
    %1045 = arith.cmpi slt, %1044, %0 : vector<2x1xi32>
    %1046 = vector.broadcast %1043 : i32 to vector<2x1xi32>
    %1047 = arith.cmpi slt, %1046, %0 : vector<2x1xi32>
    %1048 = arith.index_cast %c3_i32_388 : i32 to index
    %c0_390 = arith.constant 0 : index
    %c0_391 = arith.constant 0 : index
    %1049 = vector.load %arg26[%1048, %c0_390, %c0_391] : memref<8x2x128xf32, #tpu.memory_space<vmem>>, vector<1x2x128xf32>
    %1050 = vector.shape_cast %1049 : vector<1x2x128xf32> to vector<2x128xf32>
    %cst_392 = arith.constant dense<0.000000e+00> : vector<2x128xf32>
    %1051 = tpu.matmul %1013, %870, %cst_392 {dimension_numbers = #tpu.dot_dimension_numbers<[1], [0], [0], [1], [0, 0, 1, 1], [], []>} : vector<2x32xf32>, vector<32x128xf32>, vector<2x128xf32> -> vector<2x128xf32>
    %1052 = arith.addf %1050, %1051 : vector<2x128xf32>
    %1053 = arith.negf %1052 : vector<2x128xf32>
    %1054 = math.exp %1053 : vector<2x128xf32>
    %cst_393 = arith.constant 1.000000e+00 : f32
    %1055 = vector.broadcast %cst_393 : f32 to vector<2x128xf32>
    %1056 = arith.addf %1055, %1054 : vector<2x128xf32>
    %1057 = arith.divf %1055, %1056 : vector<2x128xf32>
    %1058 = vector.extract_strided_slice %1057 {offsets = [0, 0], sizes = [2, 32], strides = [1, 1]} : vector<2x128xf32> to vector<2x32xf32>
    %1059 = vector.extract_strided_slice %1057 {offsets = [0, 32], sizes = [2, 32], strides = [1, 1]} : vector<2x128xf32> to vector<2x32xf32>
    %1060 = vector.extract_strided_slice %1057 {offsets = [0, 96], sizes = [2, 32], strides = [1, 1]} : vector<2x128xf32> to vector<2x32xf32>
    %1061 = vector.extract_strided_slice %1052 {offsets = [0, 64], sizes = [2, 32], strides = [1, 1]} : vector<2x128xf32> to vector<2x32xf32>
    %1062 = math.tanh %1061 : vector<2x32xf32>
    %1063 = arith.mulf %1059, %1016 : vector<2x32xf32>
    %1064 = arith.mulf %1058, %1062 : vector<2x32xf32>
    %1065 = arith.addf %1063, %1064 : vector<2x32xf32>
    %1066 = math.tanh %1065 : vector<2x32xf32>
    %1067 = arith.mulf %1060, %1066 : vector<2x32xf32>
    %1068 = vector.shape_cast %1045 : vector<2x1xi1> to vector<2x1xi1>
    %1069 = vector.broadcast %1068 : vector<2x1xi1> to vector<2x32xi1>
    %1070 = arith.select %1069, %1067, %1013 : vector<2x32xi1>, vector<2x32xf32>
    %1071 = vector.shape_cast %1045 : vector<2x1xi1> to vector<2x1xi1>
    %1072 = vector.broadcast %1071 : vector<2x1xi1> to vector<2x32xi1>
    %1073 = arith.select %1072, %1065, %1016 : vector<2x32xi1>, vector<2x32xf32>
    %1074 = arith.index_cast %1043 : i32 to index
    %c0_394 = arith.constant 0 : index
    %c0_395 = arith.constant 0 : index
    %1075 = vector.load %arg27[%1074, %c0_394, %c0_395] : memref<8x2x128xf32, #tpu.memory_space<vmem>>, vector<1x2x128xf32>
    %1076 = vector.shape_cast %1075 : vector<1x2x128xf32> to vector<2x128xf32>
    %cst_396 = arith.constant dense<0.000000e+00> : vector<2x128xf32>
    %1077 = tpu.matmul %1039, %871, %cst_396 {dimension_numbers = #tpu.dot_dimension_numbers<[1], [0], [0], [1], [0, 0, 1, 1], [], []>} : vector<2x32xf32>, vector<32x128xf32>, vector<2x128xf32> -> vector<2x128xf32>
    %1078 = arith.addf %1076, %1077 : vector<2x128xf32>
    %1079 = arith.negf %1078 : vector<2x128xf32>
    %1080 = math.exp %1079 : vector<2x128xf32>
    %cst_397 = arith.constant 1.000000e+00 : f32
    %1081 = vector.broadcast %cst_397 : f32 to vector<2x128xf32>
    %1082 = arith.addf %1081, %1080 : vector<2x128xf32>
    %1083 = arith.divf %1081, %1082 : vector<2x128xf32>
    %1084 = vector.extract_strided_slice %1083 {offsets = [0, 0], sizes = [2, 32], strides = [1, 1]} : vector<2x128xf32> to vector<2x32xf32>
    %1085 = vector.extract_strided_slice %1083 {offsets = [0, 32], sizes = [2, 32], strides = [1, 1]} : vector<2x128xf32> to vector<2x32xf32>
    %1086 = vector.extract_strided_slice %1083 {offsets = [0, 96], sizes = [2, 32], strides = [1, 1]} : vector<2x128xf32> to vector<2x32xf32>
    %1087 = vector.extract_strided_slice %1078 {offsets = [0, 64], sizes = [2, 32], strides = [1, 1]} : vector<2x128xf32> to vector<2x32xf32>
    %1088 = math.tanh %1087 : vector<2x32xf32>
    %1089 = arith.mulf %1085, %1042 : vector<2x32xf32>
    %1090 = arith.mulf %1084, %1088 : vector<2x32xf32>
    %1091 = arith.addf %1089, %1090 : vector<2x32xf32>
    %1092 = math.tanh %1091 : vector<2x32xf32>
    %1093 = arith.mulf %1086, %1092 : vector<2x32xf32>
    %1094 = vector.shape_cast %1047 : vector<2x1xi1> to vector<2x1xi1>
    %1095 = vector.broadcast %1094 : vector<2x1xi1> to vector<2x32xi1>
    %1096 = arith.select %1095, %1093, %1039 : vector<2x32xi1>, vector<2x32xf32>
    %1097 = vector.shape_cast %1047 : vector<2x1xi1> to vector<2x1xi1>
    %1098 = vector.broadcast %1097 : vector<2x1xi1> to vector<2x32xi1>
    %1099 = arith.select %1098, %1091, %1042 : vector<2x32xi1>, vector<2x32xf32>
    %c4_i32_398 = arith.constant 4 : i32
    %c7_i32_399 = arith.constant 7 : i32
    %1100 = arith.subi %c7_i32_399, %c4_i32_398 : i32
    %1101 = vector.broadcast %c4_i32_398 : i32 to vector<2x1xi32>
    %1102 = arith.cmpi slt, %1101, %0 : vector<2x1xi32>
    %1103 = vector.broadcast %1100 : i32 to vector<2x1xi32>
    %1104 = arith.cmpi slt, %1103, %0 : vector<2x1xi32>
    %1105 = arith.index_cast %c4_i32_398 : i32 to index
    %c0_400 = arith.constant 0 : index
    %c0_401 = arith.constant 0 : index
    %1106 = vector.load %arg26[%1105, %c0_400, %c0_401] : memref<8x2x128xf32, #tpu.memory_space<vmem>>, vector<1x2x128xf32>
    %1107 = vector.shape_cast %1106 : vector<1x2x128xf32> to vector<2x128xf32>
    %cst_402 = arith.constant dense<0.000000e+00> : vector<2x128xf32>
    %1108 = tpu.matmul %1070, %870, %cst_402 {dimension_numbers = #tpu.dot_dimension_numbers<[1], [0], [0], [1], [0, 0, 1, 1], [], []>} : vector<2x32xf32>, vector<32x128xf32>, vector<2x128xf32> -> vector<2x128xf32>
    %1109 = arith.addf %1107, %1108 : vector<2x128xf32>
    %1110 = arith.negf %1109 : vector<2x128xf32>
    %1111 = math.exp %1110 : vector<2x128xf32>
    %cst_403 = arith.constant 1.000000e+00 : f32
    %1112 = vector.broadcast %cst_403 : f32 to vector<2x128xf32>
    %1113 = arith.addf %1112, %1111 : vector<2x128xf32>
    %1114 = arith.divf %1112, %1113 : vector<2x128xf32>
    %1115 = vector.extract_strided_slice %1114 {offsets = [0, 0], sizes = [2, 32], strides = [1, 1]} : vector<2x128xf32> to vector<2x32xf32>
    %1116 = vector.extract_strided_slice %1114 {offsets = [0, 32], sizes = [2, 32], strides = [1, 1]} : vector<2x128xf32> to vector<2x32xf32>
    %1117 = vector.extract_strided_slice %1114 {offsets = [0, 96], sizes = [2, 32], strides = [1, 1]} : vector<2x128xf32> to vector<2x32xf32>
    %1118 = vector.extract_strided_slice %1109 {offsets = [0, 64], sizes = [2, 32], strides = [1, 1]} : vector<2x128xf32> to vector<2x32xf32>
    %1119 = math.tanh %1118 : vector<2x32xf32>
    %1120 = arith.mulf %1116, %1073 : vector<2x32xf32>
    %1121 = arith.mulf %1115, %1119 : vector<2x32xf32>
    %1122 = arith.addf %1120, %1121 : vector<2x32xf32>
    %1123 = math.tanh %1122 : vector<2x32xf32>
    %1124 = arith.mulf %1117, %1123 : vector<2x32xf32>
    %1125 = vector.shape_cast %1102 : vector<2x1xi1> to vector<2x1xi1>
    %1126 = vector.broadcast %1125 : vector<2x1xi1> to vector<2x32xi1>
    %1127 = arith.select %1126, %1124, %1070 : vector<2x32xi1>, vector<2x32xf32>
    %1128 = vector.shape_cast %1102 : vector<2x1xi1> to vector<2x1xi1>
    %1129 = vector.broadcast %1128 : vector<2x1xi1> to vector<2x32xi1>
    %1130 = arith.select %1129, %1122, %1073 : vector<2x32xi1>, vector<2x32xf32>
    %1131 = arith.index_cast %1100 : i32 to index
    %c0_404 = arith.constant 0 : index
    %c0_405 = arith.constant 0 : index
    %1132 = vector.load %arg27[%1131, %c0_404, %c0_405] : memref<8x2x128xf32, #tpu.memory_space<vmem>>, vector<1x2x128xf32>
    %1133 = vector.shape_cast %1132 : vector<1x2x128xf32> to vector<2x128xf32>
    %cst_406 = arith.constant dense<0.000000e+00> : vector<2x128xf32>
    %1134 = tpu.matmul %1096, %871, %cst_406 {dimension_numbers = #tpu.dot_dimension_numbers<[1], [0], [0], [1], [0, 0, 1, 1], [], []>} : vector<2x32xf32>, vector<32x128xf32>, vector<2x128xf32> -> vector<2x128xf32>
    %1135 = arith.addf %1133, %1134 : vector<2x128xf32>
    %1136 = arith.negf %1135 : vector<2x128xf32>
    %1137 = math.exp %1136 : vector<2x128xf32>
    %cst_407 = arith.constant 1.000000e+00 : f32
    %1138 = vector.broadcast %cst_407 : f32 to vector<2x128xf32>
    %1139 = arith.addf %1138, %1137 : vector<2x128xf32>
    %1140 = arith.divf %1138, %1139 : vector<2x128xf32>
    %1141 = vector.extract_strided_slice %1140 {offsets = [0, 0], sizes = [2, 32], strides = [1, 1]} : vector<2x128xf32> to vector<2x32xf32>
    %1142 = vector.extract_strided_slice %1140 {offsets = [0, 32], sizes = [2, 32], strides = [1, 1]} : vector<2x128xf32> to vector<2x32xf32>
    %1143 = vector.extract_strided_slice %1140 {offsets = [0, 96], sizes = [2, 32], strides = [1, 1]} : vector<2x128xf32> to vector<2x32xf32>
    %1144 = vector.extract_strided_slice %1135 {offsets = [0, 64], sizes = [2, 32], strides = [1, 1]} : vector<2x128xf32> to vector<2x32xf32>
    %1145 = math.tanh %1144 : vector<2x32xf32>
    %1146 = arith.mulf %1142, %1099 : vector<2x32xf32>
    %1147 = arith.mulf %1141, %1145 : vector<2x32xf32>
    %1148 = arith.addf %1146, %1147 : vector<2x32xf32>
    %1149 = math.tanh %1148 : vector<2x32xf32>
    %1150 = arith.mulf %1143, %1149 : vector<2x32xf32>
    %1151 = vector.shape_cast %1104 : vector<2x1xi1> to vector<2x1xi1>
    %1152 = vector.broadcast %1151 : vector<2x1xi1> to vector<2x32xi1>
    %1153 = arith.select %1152, %1150, %1096 : vector<2x32xi1>, vector<2x32xf32>
    %1154 = vector.shape_cast %1104 : vector<2x1xi1> to vector<2x1xi1>
    %1155 = vector.broadcast %1154 : vector<2x1xi1> to vector<2x32xi1>
    %1156 = arith.select %1155, %1148, %1099 : vector<2x32xi1>, vector<2x32xf32>
    %c5_i32_408 = arith.constant 5 : i32
    %c7_i32_409 = arith.constant 7 : i32
    %1157 = arith.subi %c7_i32_409, %c5_i32_408 : i32
    %1158 = vector.broadcast %c5_i32_408 : i32 to vector<2x1xi32>
    %1159 = arith.cmpi slt, %1158, %0 : vector<2x1xi32>
    %1160 = vector.broadcast %1157 : i32 to vector<2x1xi32>
    %1161 = arith.cmpi slt, %1160, %0 : vector<2x1xi32>
    %1162 = arith.index_cast %c5_i32_408 : i32 to index
    %c0_410 = arith.constant 0 : index
    %c0_411 = arith.constant 0 : index
    %1163 = vector.load %arg26[%1162, %c0_410, %c0_411] : memref<8x2x128xf32, #tpu.memory_space<vmem>>, vector<1x2x128xf32>
    %1164 = vector.shape_cast %1163 : vector<1x2x128xf32> to vector<2x128xf32>
    %cst_412 = arith.constant dense<0.000000e+00> : vector<2x128xf32>
    %1165 = tpu.matmul %1127, %870, %cst_412 {dimension_numbers = #tpu.dot_dimension_numbers<[1], [0], [0], [1], [0, 0, 1, 1], [], []>} : vector<2x32xf32>, vector<32x128xf32>, vector<2x128xf32> -> vector<2x128xf32>
    %1166 = arith.addf %1164, %1165 : vector<2x128xf32>
    %1167 = arith.negf %1166 : vector<2x128xf32>
    %1168 = math.exp %1167 : vector<2x128xf32>
    %cst_413 = arith.constant 1.000000e+00 : f32
    %1169 = vector.broadcast %cst_413 : f32 to vector<2x128xf32>
    %1170 = arith.addf %1169, %1168 : vector<2x128xf32>
    %1171 = arith.divf %1169, %1170 : vector<2x128xf32>
    %1172 = vector.extract_strided_slice %1171 {offsets = [0, 0], sizes = [2, 32], strides = [1, 1]} : vector<2x128xf32> to vector<2x32xf32>
    %1173 = vector.extract_strided_slice %1171 {offsets = [0, 32], sizes = [2, 32], strides = [1, 1]} : vector<2x128xf32> to vector<2x32xf32>
    %1174 = vector.extract_strided_slice %1171 {offsets = [0, 96], sizes = [2, 32], strides = [1, 1]} : vector<2x128xf32> to vector<2x32xf32>
    %1175 = vector.extract_strided_slice %1166 {offsets = [0, 64], sizes = [2, 32], strides = [1, 1]} : vector<2x128xf32> to vector<2x32xf32>
    %1176 = math.tanh %1175 : vector<2x32xf32>
    %1177 = arith.mulf %1173, %1130 : vector<2x32xf32>
    %1178 = arith.mulf %1172, %1176 : vector<2x32xf32>
    %1179 = arith.addf %1177, %1178 : vector<2x32xf32>
    %1180 = math.tanh %1179 : vector<2x32xf32>
    %1181 = arith.mulf %1174, %1180 : vector<2x32xf32>
    %1182 = vector.shape_cast %1159 : vector<2x1xi1> to vector<2x1xi1>
    %1183 = vector.broadcast %1182 : vector<2x1xi1> to vector<2x32xi1>
    %1184 = arith.select %1183, %1181, %1127 : vector<2x32xi1>, vector<2x32xf32>
    %1185 = vector.shape_cast %1159 : vector<2x1xi1> to vector<2x1xi1>
    %1186 = vector.broadcast %1185 : vector<2x1xi1> to vector<2x32xi1>
    %1187 = arith.select %1186, %1179, %1130 : vector<2x32xi1>, vector<2x32xf32>
    %1188 = arith.index_cast %1157 : i32 to index
    %c0_414 = arith.constant 0 : index
    %c0_415 = arith.constant 0 : index
    %1189 = vector.load %arg27[%1188, %c0_414, %c0_415] : memref<8x2x128xf32, #tpu.memory_space<vmem>>, vector<1x2x128xf32>
    %1190 = vector.shape_cast %1189 : vector<1x2x128xf32> to vector<2x128xf32>
    %cst_416 = arith.constant dense<0.000000e+00> : vector<2x128xf32>
    %1191 = tpu.matmul %1153, %871, %cst_416 {dimension_numbers = #tpu.dot_dimension_numbers<[1], [0], [0], [1], [0, 0, 1, 1], [], []>} : vector<2x32xf32>, vector<32x128xf32>, vector<2x128xf32> -> vector<2x128xf32>
    %1192 = arith.addf %1190, %1191 : vector<2x128xf32>
    %1193 = arith.negf %1192 : vector<2x128xf32>
    %1194 = math.exp %1193 : vector<2x128xf32>
    %cst_417 = arith.constant 1.000000e+00 : f32
    %1195 = vector.broadcast %cst_417 : f32 to vector<2x128xf32>
    %1196 = arith.addf %1195, %1194 : vector<2x128xf32>
    %1197 = arith.divf %1195, %1196 : vector<2x128xf32>
    %1198 = vector.extract_strided_slice %1197 {offsets = [0, 0], sizes = [2, 32], strides = [1, 1]} : vector<2x128xf32> to vector<2x32xf32>
    %1199 = vector.extract_strided_slice %1197 {offsets = [0, 32], sizes = [2, 32], strides = [1, 1]} : vector<2x128xf32> to vector<2x32xf32>
    %1200 = vector.extract_strided_slice %1197 {offsets = [0, 96], sizes = [2, 32], strides = [1, 1]} : vector<2x128xf32> to vector<2x32xf32>
    %1201 = vector.extract_strided_slice %1192 {offsets = [0, 64], sizes = [2, 32], strides = [1, 1]} : vector<2x128xf32> to vector<2x32xf32>
    %1202 = math.tanh %1201 : vector<2x32xf32>
    %1203 = arith.mulf %1199, %1156 : vector<2x32xf32>
    %1204 = arith.mulf %1198, %1202 : vector<2x32xf32>
    %1205 = arith.addf %1203, %1204 : vector<2x32xf32>
    %1206 = math.tanh %1205 : vector<2x32xf32>
    %1207 = arith.mulf %1200, %1206 : vector<2x32xf32>
    %1208 = vector.shape_cast %1161 : vector<2x1xi1> to vector<2x1xi1>
    %1209 = vector.broadcast %1208 : vector<2x1xi1> to vector<2x32xi1>
    %1210 = arith.select %1209, %1207, %1153 : vector<2x32xi1>, vector<2x32xf32>
    %1211 = vector.shape_cast %1161 : vector<2x1xi1> to vector<2x1xi1>
    %1212 = vector.broadcast %1211 : vector<2x1xi1> to vector<2x32xi1>
    %1213 = arith.select %1212, %1205, %1156 : vector<2x32xi1>, vector<2x32xf32>
    %c6_i32_418 = arith.constant 6 : i32
    %c7_i32_419 = arith.constant 7 : i32
    %1214 = arith.subi %c7_i32_419, %c6_i32_418 : i32
    %1215 = vector.broadcast %c6_i32_418 : i32 to vector<2x1xi32>
    %1216 = arith.cmpi slt, %1215, %0 : vector<2x1xi32>
    %1217 = vector.broadcast %1214 : i32 to vector<2x1xi32>
    %1218 = arith.cmpi slt, %1217, %0 : vector<2x1xi32>
    %1219 = arith.index_cast %c6_i32_418 : i32 to index
    %c0_420 = arith.constant 0 : index
    %c0_421 = arith.constant 0 : index
    %1220 = vector.load %arg26[%1219, %c0_420, %c0_421] : memref<8x2x128xf32, #tpu.memory_space<vmem>>, vector<1x2x128xf32>
    %1221 = vector.shape_cast %1220 : vector<1x2x128xf32> to vector<2x128xf32>
    %cst_422 = arith.constant dense<0.000000e+00> : vector<2x128xf32>
    %1222 = tpu.matmul %1184, %870, %cst_422 {dimension_numbers = #tpu.dot_dimension_numbers<[1], [0], [0], [1], [0, 0, 1, 1], [], []>} : vector<2x32xf32>, vector<32x128xf32>, vector<2x128xf32> -> vector<2x128xf32>
    %1223 = arith.addf %1221, %1222 : vector<2x128xf32>
    %1224 = arith.negf %1223 : vector<2x128xf32>
    %1225 = math.exp %1224 : vector<2x128xf32>
    %cst_423 = arith.constant 1.000000e+00 : f32
    %1226 = vector.broadcast %cst_423 : f32 to vector<2x128xf32>
    %1227 = arith.addf %1226, %1225 : vector<2x128xf32>
    %1228 = arith.divf %1226, %1227 : vector<2x128xf32>
    %1229 = vector.extract_strided_slice %1228 {offsets = [0, 0], sizes = [2, 32], strides = [1, 1]} : vector<2x128xf32> to vector<2x32xf32>
    %1230 = vector.extract_strided_slice %1228 {offsets = [0, 32], sizes = [2, 32], strides = [1, 1]} : vector<2x128xf32> to vector<2x32xf32>
    %1231 = vector.extract_strided_slice %1228 {offsets = [0, 96], sizes = [2, 32], strides = [1, 1]} : vector<2x128xf32> to vector<2x32xf32>
    %1232 = vector.extract_strided_slice %1223 {offsets = [0, 64], sizes = [2, 32], strides = [1, 1]} : vector<2x128xf32> to vector<2x32xf32>
    %1233 = math.tanh %1232 : vector<2x32xf32>
    %1234 = arith.mulf %1230, %1187 : vector<2x32xf32>
    %1235 = arith.mulf %1229, %1233 : vector<2x32xf32>
    %1236 = arith.addf %1234, %1235 : vector<2x32xf32>
    %1237 = math.tanh %1236 : vector<2x32xf32>
    %1238 = arith.mulf %1231, %1237 : vector<2x32xf32>
    %1239 = vector.shape_cast %1216 : vector<2x1xi1> to vector<2x1xi1>
    %1240 = vector.broadcast %1239 : vector<2x1xi1> to vector<2x32xi1>
    %1241 = arith.select %1240, %1238, %1184 : vector<2x32xi1>, vector<2x32xf32>
    %1242 = vector.shape_cast %1216 : vector<2x1xi1> to vector<2x1xi1>
    %1243 = vector.broadcast %1242 : vector<2x1xi1> to vector<2x32xi1>
    %1244 = arith.select %1243, %1236, %1187 : vector<2x32xi1>, vector<2x32xf32>
    %1245 = arith.index_cast %1214 : i32 to index
    %c0_424 = arith.constant 0 : index
    %c0_425 = arith.constant 0 : index
    %1246 = vector.load %arg27[%1245, %c0_424, %c0_425] : memref<8x2x128xf32, #tpu.memory_space<vmem>>, vector<1x2x128xf32>
    %1247 = vector.shape_cast %1246 : vector<1x2x128xf32> to vector<2x128xf32>
    %cst_426 = arith.constant dense<0.000000e+00> : vector<2x128xf32>
    %1248 = tpu.matmul %1210, %871, %cst_426 {dimension_numbers = #tpu.dot_dimension_numbers<[1], [0], [0], [1], [0, 0, 1, 1], [], []>} : vector<2x32xf32>, vector<32x128xf32>, vector<2x128xf32> -> vector<2x128xf32>
    %1249 = arith.addf %1247, %1248 : vector<2x128xf32>
    %1250 = arith.negf %1249 : vector<2x128xf32>
    %1251 = math.exp %1250 : vector<2x128xf32>
    %cst_427 = arith.constant 1.000000e+00 : f32
    %1252 = vector.broadcast %cst_427 : f32 to vector<2x128xf32>
    %1253 = arith.addf %1252, %1251 : vector<2x128xf32>
    %1254 = arith.divf %1252, %1253 : vector<2x128xf32>
    %1255 = vector.extract_strided_slice %1254 {offsets = [0, 0], sizes = [2, 32], strides = [1, 1]} : vector<2x128xf32> to vector<2x32xf32>
    %1256 = vector.extract_strided_slice %1254 {offsets = [0, 32], sizes = [2, 32], strides = [1, 1]} : vector<2x128xf32> to vector<2x32xf32>
    %1257 = vector.extract_strided_slice %1254 {offsets = [0, 96], sizes = [2, 32], strides = [1, 1]} : vector<2x128xf32> to vector<2x32xf32>
    %1258 = vector.extract_strided_slice %1249 {offsets = [0, 64], sizes = [2, 32], strides = [1, 1]} : vector<2x128xf32> to vector<2x32xf32>
    %1259 = math.tanh %1258 : vector<2x32xf32>
    %1260 = arith.mulf %1256, %1213 : vector<2x32xf32>
    %1261 = arith.mulf %1255, %1259 : vector<2x32xf32>
    %1262 = arith.addf %1260, %1261 : vector<2x32xf32>
    %1263 = math.tanh %1262 : vector<2x32xf32>
    %1264 = arith.mulf %1257, %1263 : vector<2x32xf32>
    %1265 = vector.shape_cast %1218 : vector<2x1xi1> to vector<2x1xi1>
    %1266 = vector.broadcast %1265 : vector<2x1xi1> to vector<2x32xi1>
    %1267 = arith.select %1266, %1264, %1210 : vector<2x32xi1>, vector<2x32xf32>
    %1268 = vector.shape_cast %1218 : vector<2x1xi1> to vector<2x1xi1>
    %1269 = vector.broadcast %1268 : vector<2x1xi1> to vector<2x32xi1>
    %1270 = arith.select %1269, %1262, %1213 : vector<2x32xi1>, vector<2x32xf32>
    %c7_i32_428 = arith.constant 7 : i32
    %c7_i32_429 = arith.constant 7 : i32
    %1271 = arith.subi %c7_i32_429, %c7_i32_428 : i32
    %1272 = vector.broadcast %c7_i32_428 : i32 to vector<2x1xi32>
    %1273 = arith.cmpi slt, %1272, %0 : vector<2x1xi32>
    %1274 = vector.broadcast %1271 : i32 to vector<2x1xi32>
    %1275 = arith.cmpi slt, %1274, %0 : vector<2x1xi32>
    %1276 = arith.index_cast %c7_i32_428 : i32 to index
    %c0_430 = arith.constant 0 : index
    %c0_431 = arith.constant 0 : index
    %1277 = vector.load %arg26[%1276, %c0_430, %c0_431] : memref<8x2x128xf32, #tpu.memory_space<vmem>>, vector<1x2x128xf32>
    %1278 = vector.shape_cast %1277 : vector<1x2x128xf32> to vector<2x128xf32>
    %cst_432 = arith.constant dense<0.000000e+00> : vector<2x128xf32>
    %1279 = tpu.matmul %1241, %870, %cst_432 {dimension_numbers = #tpu.dot_dimension_numbers<[1], [0], [0], [1], [0, 0, 1, 1], [], []>} : vector<2x32xf32>, vector<32x128xf32>, vector<2x128xf32> -> vector<2x128xf32>
    %1280 = arith.addf %1278, %1279 : vector<2x128xf32>
    %1281 = arith.negf %1280 : vector<2x128xf32>
    %1282 = math.exp %1281 : vector<2x128xf32>
    %cst_433 = arith.constant 1.000000e+00 : f32
    %1283 = vector.broadcast %cst_433 : f32 to vector<2x128xf32>
    %1284 = arith.addf %1283, %1282 : vector<2x128xf32>
    %1285 = arith.divf %1283, %1284 : vector<2x128xf32>
    %1286 = vector.extract_strided_slice %1285 {offsets = [0, 0], sizes = [2, 32], strides = [1, 1]} : vector<2x128xf32> to vector<2x32xf32>
    %1287 = vector.extract_strided_slice %1285 {offsets = [0, 32], sizes = [2, 32], strides = [1, 1]} : vector<2x128xf32> to vector<2x32xf32>
    %1288 = vector.extract_strided_slice %1285 {offsets = [0, 96], sizes = [2, 32], strides = [1, 1]} : vector<2x128xf32> to vector<2x32xf32>
    %1289 = vector.extract_strided_slice %1280 {offsets = [0, 64], sizes = [2, 32], strides = [1, 1]} : vector<2x128xf32> to vector<2x32xf32>
    %1290 = math.tanh %1289 : vector<2x32xf32>
    %1291 = arith.mulf %1287, %1244 : vector<2x32xf32>
    %1292 = arith.mulf %1286, %1290 : vector<2x32xf32>
    %1293 = arith.addf %1291, %1292 : vector<2x32xf32>
    %1294 = math.tanh %1293 : vector<2x32xf32>
    %1295 = arith.mulf %1288, %1294 : vector<2x32xf32>
    %1296 = vector.shape_cast %1273 : vector<2x1xi1> to vector<2x1xi1>
    %1297 = vector.broadcast %1296 : vector<2x1xi1> to vector<2x32xi1>
    %1298 = arith.select %1297, %1295, %1241 : vector<2x32xi1>, vector<2x32xf32>
    %1299 = vector.shape_cast %1273 : vector<2x1xi1> to vector<2x1xi1>
    %1300 = vector.broadcast %1299 : vector<2x1xi1> to vector<2x32xi1>
    %1301 = arith.select %1300, %1293, %1244 : vector<2x32xi1>, vector<2x32xf32>
    %1302 = arith.index_cast %1271 : i32 to index
    %c0_434 = arith.constant 0 : index
    %c0_435 = arith.constant 0 : index
    %1303 = vector.load %arg27[%1302, %c0_434, %c0_435] : memref<8x2x128xf32, #tpu.memory_space<vmem>>, vector<1x2x128xf32>
    %1304 = vector.shape_cast %1303 : vector<1x2x128xf32> to vector<2x128xf32>
    %cst_436 = arith.constant dense<0.000000e+00> : vector<2x128xf32>
    %1305 = tpu.matmul %1267, %871, %cst_436 {dimension_numbers = #tpu.dot_dimension_numbers<[1], [0], [0], [1], [0, 0, 1, 1], [], []>} : vector<2x32xf32>, vector<32x128xf32>, vector<2x128xf32> -> vector<2x128xf32>
    %1306 = arith.addf %1304, %1305 : vector<2x128xf32>
    %1307 = arith.negf %1306 : vector<2x128xf32>
    %1308 = math.exp %1307 : vector<2x128xf32>
    %cst_437 = arith.constant 1.000000e+00 : f32
    %1309 = vector.broadcast %cst_437 : f32 to vector<2x128xf32>
    %1310 = arith.addf %1309, %1308 : vector<2x128xf32>
    %1311 = arith.divf %1309, %1310 : vector<2x128xf32>
    %1312 = vector.extract_strided_slice %1311 {offsets = [0, 0], sizes = [2, 32], strides = [1, 1]} : vector<2x128xf32> to vector<2x32xf32>
    %1313 = vector.extract_strided_slice %1311 {offsets = [0, 32], sizes = [2, 32], strides = [1, 1]} : vector<2x128xf32> to vector<2x32xf32>
    %1314 = vector.extract_strided_slice %1311 {offsets = [0, 96], sizes = [2, 32], strides = [1, 1]} : vector<2x128xf32> to vector<2x32xf32>
    %1315 = vector.extract_strided_slice %1306 {offsets = [0, 64], sizes = [2, 32], strides = [1, 1]} : vector<2x128xf32> to vector<2x32xf32>
    %1316 = math.tanh %1315 : vector<2x32xf32>
    %1317 = arith.mulf %1313, %1270 : vector<2x32xf32>
    %1318 = arith.mulf %1312, %1316 : vector<2x32xf32>
    %1319 = arith.addf %1317, %1318 : vector<2x32xf32>
    %1320 = math.tanh %1319 : vector<2x32xf32>
    %1321 = arith.mulf %1314, %1320 : vector<2x32xf32>
    %1322 = vector.shape_cast %1275 : vector<2x1xi1> to vector<2x1xi1>
    %1323 = vector.broadcast %1322 : vector<2x1xi1> to vector<2x32xi1>
    %1324 = arith.select %1323, %1321, %1267 : vector<2x32xi1>, vector<2x32xf32>
    %1325 = vector.shape_cast %1275 : vector<2x1xi1> to vector<2x1xi1>
    %1326 = vector.broadcast %1325 : vector<2x1xi1> to vector<2x32xi1>
    %1327 = arith.select %1326, %1319, %1270 : vector<2x32xi1>, vector<2x32xf32>
    %c8_i32_438 = arith.constant 8 : i32
    %c0_439 = arith.constant 0 : index
    %c0_440 = arith.constant 0 : index
    %1328 = vector.load %arg16[%c0_439, %c0_440] : memref<32x32xf32, #tpu.memory_space<vmem>>, vector<32x32xf32>
    %cst_441 = arith.constant dense<0.000000e+00> : vector<2x32xf32>
    %1329 = tpu.matmul %1298, %1328, %cst_441 {dimension_numbers = #tpu.dot_dimension_numbers<[1], [0], [0], [1], [0, 0, 1, 1], [], []>} : vector<2x32xf32>, vector<32x32xf32>, vector<2x32xf32> -> vector<2x32xf32>
    %c0_442 = arith.constant 0 : index
    %c0_443 = arith.constant 0 : index
    %1330 = vector.load %arg17[%c0_442, %c0_443] : memref<32x32xf32, #tpu.memory_space<vmem>>, vector<32x32xf32>
    %cst_444 = arith.constant dense<0.000000e+00> : vector<2x32xf32>
    %1331 = tpu.matmul %1324, %1330, %cst_444 {dimension_numbers = #tpu.dot_dimension_numbers<[1], [0], [0], [1], [0, 0, 1, 1], [], []>} : vector<2x32xf32>, vector<32x32xf32>, vector<2x32xf32> -> vector<2x32xf32>
    %1332 = arith.addf %1329, %1331 : vector<2x32xf32>
    %c0_445 = arith.constant 0 : index
    %c0_446 = arith.constant 0 : index
    %1333 = vector.load %arg18[%c0_445, %c0_446] : memref<1x32xf32, #tpu.memory_space<vmem>>, vector<1x32xf32>
    %1334 = vector.broadcast %1333 : vector<1x32xf32> to vector<2x32xf32>
    %1335 = arith.addf %1332, %1334 : vector<2x32xf32>
    %cst_447 = arith.constant 0.000000e+00 : f32
    %1336 = vector.broadcast %cst_447 : f32 to vector<2x32xf32>
    %1337 = arith.maximumf %1335, %1336 : vector<2x32xf32>
    %c0_448 = arith.constant 0 : index
    %c0_449 = arith.constant 0 : index
    %1338 = vector.load %arg19[%c0_448, %c0_449] : memref<32x4xf32, #tpu.memory_space<vmem>>, vector<32x4xf32>
    %cst_450 = arith.constant dense<0.000000e+00> : vector<2x4xf32>
    %1339 = tpu.matmul %1337, %1338, %cst_450 {dimension_numbers = #tpu.dot_dimension_numbers<[1], [0], [0], [1], [0, 0, 1, 1], [], []>} : vector<2x32xf32>, vector<32x4xf32>, vector<2x4xf32> -> vector<2x4xf32>
    %c0_451 = arith.constant 0 : index
    %c0_452 = arith.constant 0 : index
    %1340 = vector.load %arg20[%c0_451, %c0_452] : memref<1x4xf32, #tpu.memory_space<vmem>>, vector<1x4xf32>
    %1341 = vector.broadcast %1340 : vector<1x4xf32> to vector<2x4xf32>
    %1342 = arith.addf %1339, %1341 : vector<2x4xf32>
    %c0_453 = arith.constant 0 : index
    %c0_454 = arith.constant 0 : index
    %1343 = vector.load %arg21[%c0_453, %c0_454] : memref<2x4xf32, #tpu.memory_space<vmem>>, vector<2x4xf32>
    tpu.vector_store %arg21[%c0_453, %c0_454], %1342 {strides = array<i32>} : memref<2x4xf32, #tpu.memory_space<vmem>>, vector<2x4xf32>,
    return
  }
}

</mosaic_0001>

<bundles_post_ra>
// kernel: rnn_forward.1
= control target key start
LH: loop header
LB: loop body
LE: loop exit
PB: predicated region body
PF: predicated region fallthrough
CT: control target
= control target key end

     0   :  { %s11290_s0 = inlined_call_operand.vmem [shape: s32[2,1], index: 0, kind: input, shape index: {}]   ;;  %s11291_s1 = inlined_call_operand.vmem [shape: f32[8,2,32], index: 1, kind: input, shape index: {}]   ;;  %s11292_s2 = inlined_call_operand.vmem [shape: f32[32,128], index: 2, kind: input, shape index: {}]   ;;  %s11293_s3 = inlined_call_operand.vmem [shape: f32[1,128], index: 3, kind: input, shape index: {}]   ;;  %s11294_s4 = inlined_call_operand.vmem [shape: f32[32,128], index: 4, kind: input, shape index: {}]   ;;  %s11295_s5 = inlined_call_operand.vmem [shape: f32[32,128], index: 5, kind: input, shape index: {}]   ;;  %s11296_s6 = inlined_call_operand.vmem [shape: f32[1,128], index: 6, kind: input, shape index: {}]   ;;  %s11297_s7 = inlined_call_operand.vmem [shape: f32[32,128], index: 7, kind: input, shape index: {}]   ;;  %s11298_s8 = inlined_call_operand.vmem [shape: f32[32,128], index: 8, kind: input, shape index: {}]   ;;  %s11299_s9 = inlined_call_operand.vmem [shape: f32[32,128], index: 9, kind: input, shape index: {}]   ;;  %s11300_s10 = inlined_call_operand.vmem [shape: f32[1,128], index: 10, kind: input, shape index: {}]   ;;  %s11301_s11 = inlined_call_operand.vmem [shape: f32[32,128], index: 11, kind: input, shape index: {}]   ;;  %s11302_s12 = inlined_call_operand.vmem [shape: f32[32,128], index: 12, kind: input, shape index: {}]   ;;  %s11303_s13 = inlined_call_operand.vmem [shape: f32[32,128], index: 13, kind: input, shape index: {}]   ;;  %s11304_s14 = inlined_call_operand.vmem [shape: f32[1,128], index: 14, kind: input, shape index: {}]   ;;  %s11305_s15 = inlined_call_operand.vmem [shape: f32[32,128], index: 15, kind: input, shape index: {}]   ;;  %s11306_s16 = inlined_call_operand.vmem [shape: f32[32,32], index: 16, kind: input, shape index: {}]   ;;  %s11307_s17 = inlined_call_operand.vmem [shape: f32[32,32], index: 17, kind: input, shape index: {}]   ;;  %s11308_s18 = inlined_call_operand.vmem [shape: f32[1,32], index: 18, kind: input, shape index: {}]   ;;  %s11309_s19 = inlined_call_operand.vmem [shape: f32[32,4], index: 19, kind: input, shape index: {}]   ;;  %s11310_s20 = inlined_call_operand.vmem [shape: f32[1,4], index: 20, kind: input, shape index: {}]   ;;  %s11311_s21 = inlined_call_operand.hbm [shape: f32[2,4], index: 21, kind: output, shape index: {}]  }
   0x1   :  { %11316 = sst [smem:[#allocation11_spill]] %s11290_s0 }
   0x2   :  { %11317 = sst [smem:[#allocation12_spill]] %s11291_s1 }
   0x3   :  { %11318 = sst [smem:[#allocation13_spill]] %s11292_s2 }
   0x4   :  { %11319 = sst [smem:[#allocation14_spill]] %s11293_s3 }
   0x5   :  { %11320 = sst [smem:[#allocation15_spill]] %s11294_s4 }
   0x6   :  { %11321 = sst [smem:[#allocation16_spill]] %s11295_s5 }
   0x7   :  { %s11322_s26 = sld [smem:[#allocation13_spill]]  ;;  %s11323_s0 = sld [smem:[#allocation16_spill]]  ;;  %v9608_v3 = vmov 0.0|0.0   ;;  %vm9609_vm0 = vmmov 0   ;;  %v9610_v11 = vmov 0.0   ;;  %vm87_vm1 = vcmask 261120  }
   0x8   :  { %8821 = vmatprep.subr.bf16.mxu0 %v9608_v3  ;;  %8827 = vmatprep.subr.bf16.mxu1 %v9608_v3  ;;  %s11324_s28 = sld [smem:[#allocation12_spill]] }
   0x9   :  { %7927 = vmatprep.mubr.msk.f32.mxu1 %vm9609_vm0, %v9610_v11  ;;  %7916 = vmatprep.mubr.msk.f32.mxu0 %vm9609_vm0, %v9610_v11 }
   0xd   :  { %v70_v0 = vld [vmem:[%s11322_s26] sm:$0xff]  ;;  %v71_v1 = vld [vmem:[%s11322_s26 + $0x8] sm:$0xff]  ;;  %v72_v6 = vld [vmem:[%s11322_s26 + $0x10] sm:$0xff] }
   0xe   :  { %v75_v2 = vld [vmem:[%s11323_s0] sm:$0xff]  ;;  %v9736_v4 = vpack.c.bf16 %v71_v1, %v70_v0  ;;  %v76_v5 = vld [vmem:[%s11323_s0 + $0x8] sm:$0xff]  ;;  %v73_v7 = vld [vmem:[%s11322_s26 + $0x18] sm:$0xff] }
   0xf   :  { %v9747_v8 = vpack.c.bf16 %v76_v5, %v75_v2  ;;  %v77_v9 = vld [vmem:[%s11323_s0 + $0x10] sm:$0xff]  ;;  %v78_v10 = vld [vmem:[%s11323_s0 + $0x18] sm:$0xff]  ;;  %v9760_v12 = vpack.c.bf16 %v73_v7, %v72_v6  ;;  %v80_v14 = vld [vmem:[%s11324_s28] sm:$0x3] }
  0x10   :  { %8823 = vmatpush3.bf16.msra.mxu0 %v9736_v4  ;;  %v9764_v13 = vpack.c.bf16 %v78_v10, %v77_v9 }
  0x11   :  { %8829 = vmatpush3.bf16.msra.mxu1 %v9747_v8  ;;  %8824 = vmatprep.subr.bf16.mxu0 %v9608_v3 }
  0x12   :  { %8830 = vmatprep.subr.bf16.mxu1 %v9608_v3 }
  0x14   :  { %8826 = vmatpush3.bf16.msra.mxu0 %v9760_v12 }
  0x15   :  { %8832 = vmatpush3.bf16.msra.mxu1 %v9764_v13  ;;  %8833 = vmatprep.subr.bf16.mxu0 %v9608_v3 }
  0x16   :  { %26 = vsyncpa [#allocation9], 0  ;;  %8839 = vmatprep.subr.bf16.mxu1 %v9608_v3  ;;  %v7373_v15 = vld [vmem:[%s11324_s28 + $0x2] sm:$0x3]  ;;  %v7376_v16 = vld [vmem:[%s11324_s28 + $0x4] sm:$0x3] }
  0x17   :  { %7917 = vmatmul.mubr.msk.f32.vlgmr.msra.gmra.mrb[0].mxu0 %vm87_vm1, %v80_v14  ;;  %v7379_v17 = vld [vmem:[%s11324_s28 + $0x6] sm:$0x3]  ;;  %v7382_v18 = vld [vmem:[%s11324_s28 + $0x8] sm:$0x3]  ;;  %v7385_v19 = vld [vmem:[%s11324_s28 + $0xa] sm:$0x3] }
  0x18   :  { %7928 = vmatmul.mubr.msk.f32.vlgmr.msra.gmra.mrb[0].mxu1 %vm87_vm1, %v80_v14  ;;  %8835 = vmatpush3.bf16.msra.mxu0 %v9736_v4  ;;  %v7388_v20 = vld [vmem:[%s11324_s28 + $0xc] sm:$0x3]  ;;  %s11325_s29 = sld [smem:[#allocation15_spill]]  ;;  %v1286_v23 = vld [vmem:[%s11297_s7] sm:$0xff]  ;;  %v7391_v25 = vld [vmem:[%s11324_s28 + $0xe] sm:$0x3] }
  0x19   :  { %8841 = vmatpush3.bf16.msra.mxu1 %v9747_v8  ;;  %8836 = vmatprep.subr.bf16.mxu0 %v9608_v3  ;;  %v1287_v24 = vld [vmem:[%s11297_s7 + $0x8] sm:$0xff]  ;;  %v1288_v30 = vld [vmem:[%s11297_s7 + $0x10] sm:$0xff]  ;;  %v1289_v31 = vld [vmem:[%s11297_s7 + $0x18] sm:$0xff]  ;;  %v9611_v34 = vmov 0   ;;  %s11326_s30 = sld [smem:[#allocation14_spill]]  ;;  %s11327_s1 = sld [smem:[#allocation11_spill]] }
  0x1a   :  { %8842 = vmatprep.subr.bf16.mxu1 %v9608_v3  ;;  %7949 = vmatprep.mubr.msk.f32.mxu1 %vm9609_vm0, %v9610_v11  ;;  %v9906_v27 = vpack.c.bf16 %v1287_v24, %v1286_v23  ;;  %v9928_v33 = vpack.c.bf16 %v1289_v31, %v1288_v30  ;;  %v7371_v36 = vld [vmem:[%s11296_s6] ss:$0 sm:$0xff]  ;;  %s9612_s24 = smov 64   ;;  %s9613_s2 = smov 32   ;;  %vm1505_vm5 = vcmask 254976  }
  0x1b   :  { %7938 = vmatprep.mubr.msk.f32.mxu0 %vm9609_vm0, %v9610_v11  ;;  %9326 = vset.pattern.permute.xlu1 %v9611_v34 }
  0x1c   :  { %8838 = vmatpush3.bf16.msra.mxu0 %v9760_v12  ;;  %9327 = vset.pattern.permute.xlu0 %v9611_v34 }
  0x1d   :  { %8844 = vmatpush3.bf16.msra.mxu1 %v9764_v13  ;;  %8845 = vmatprep.subr.bf16.mxu0 %v9608_v3 }
  0x1e   :  { %8851 = vmatprep.subr.bf16.mxu1 %v9608_v3  ;;  %v1282_v21 = vld [vmem:[%s11325_s29] sm:$0xff]  ;;  %v1283_v22 = vld [vmem:[%s11325_s29 + $0x8] sm:$0xff]  ;;  %v1284_v28 = vld [vmem:[%s11325_s29 + $0x10] sm:$0xff] }
  0x1f   :  { %7939 = vmatmul.mubr.msk.f32.vlgmr.msra.gmra.mrb[2].mxu0 %vm87_vm1, %v7373_v15  ;;  %v9902_v26 = vpack.c.bf16 %v1283_v22, %v1282_v21  ;;  %v1285_v29 = vld [vmem:[%s11325_s29 + $0x18] sm:$0xff]  ;;  %v7369_v35 = vld [vmem:[%s11326_s30] ss:$0 sm:$0xff] }
  0x20   :  { %7950 = vmatmul.mubr.msk.f32.vlgmr.msra.gmra.mrb[2].mxu1 %vm87_vm1, %v7373_v15  ;;  %8847 = vmatpush3.bf16.msra.mxu0 %v9736_v4  ;;  %v9924_v32 = vpack.c.bf16 %v1285_v29, %v1284_v28 }
  0x21   :  { %8853 = vmatpush3.bf16.msra.mxu1 %v9747_v8  ;;  %8848 = vmatprep.subr.bf16.mxu0 %v9608_v3 }
  0x22   :  { %8854 = vmatprep.subr.bf16.mxu1 %v9608_v3  ;;  %7971 = vmatprep.mubr.msk.f32.mxu1 %vm9609_vm0, %v9610_v11 }
  0x23   :  { %7960 = vmatprep.mubr.msk.f32.mxu0 %vm9609_vm0, %v9610_v11 }
  0x24   :  { %8850 = vmatpush3.bf16.msra.mxu0 %v9760_v12 }
  0x25   :  { %8856 = vmatpush3.bf16.msra.mxu1 %v9764_v13  ;;  %8857 = vmatprep.subr.bf16.mxu0 %v9608_v3 }
  0x26   :  { %8863 = vmatprep.subr.bf16.mxu1 %v9608_v3 }
  0x27   :  { %7961 = vmatmul.mubr.msk.f32.vlgmr.msra.gmra.mrb[4].mxu0 %vm87_vm1, %v7376_v16 }
  0x28   :  { %7972 = vmatmul.mubr.msk.f32.vlgmr.msra.gmra.mrb[4].mxu1 %vm87_vm1, %v7376_v16  ;;  %8859 = vmatpush3.bf16.msra.mxu0 %v9736_v4 }
  0x29   :  { %8865 = vmatpush3.bf16.msra.mxu1 %v9747_v8  ;;  %8860 = vmatprep.subr.bf16.mxu0 %v9608_v3 }
  0x2a   :  { %8866 = vmatprep.subr.bf16.mxu1 %v9608_v3  ;;  %7993 = vmatprep.mubr.msk.f32.mxu1 %vm9609_vm0, %v9610_v11 }
  0x2b   :  { %7982 = vmatprep.mubr.msk.f32.mxu0 %vm9609_vm0, %v9610_v11 }
  0x2c   :  { %8862 = vmatpush3.bf16.msra.mxu0 %v9760_v12 }
  0x2d   :  { %8868 = vmatpush3.bf16.msra.mxu1 %v9764_v13  ;;  %8869 = vmatprep.subr.bf16.mxu0 %v9608_v3 }
  0x2e   :  { %8875 = vmatprep.subr.bf16.mxu1 %v9608_v3 }
  0x2f   :  { %7983 = vmatmul.mubr.msk.f32.vlgmr.msra.gmra.mrb[6].mxu0 %vm87_vm1, %v7379_v17 }
  0x30   :  { %7994 = vmatmul.mubr.msk.f32.vlgmr.msra.gmra.mrb[6].mxu1 %vm87_vm1, %v7379_v17  ;;  %8871 = vmatpush3.bf16.msra.mxu0 %v9736_v4 }
  0x31   :  { %8877 = vmatpush3.bf16.msra.mxu1 %v9747_v8  ;;  %8872 = vmatprep.subr.bf16.mxu0 %v9608_v3 }
  0x32   :  { %8878 = vmatprep.subr.bf16.mxu1 %v9608_v3  ;;  %8015 = vmatprep.mubr.msk.f32.mxu1 %vm9609_vm0, %v9610_v11 }
  0x33   :  { %8004 = vmatprep.mubr.msk.f32.mxu0 %vm9609_vm0, %v9610_v11 }
  0x34   :  { %8874 = vmatpush3.bf16.msra.mxu0 %v9760_v12 }
  0x35   :  { %8880 = vmatpush3.bf16.msra.mxu1 %v9764_v13  ;;  %8881 = vmatprep.subr.bf16.mxu0 %v9608_v3 }
  0x36   :  { %8887 = vmatprep.subr.bf16.mxu1 %v9608_v3 }
  0x37   :  { %8005 = vmatmul.mubr.msk.f32.vlgmr.msra.gmra.mrb[8].mxu0 %vm87_vm1, %v7382_v18 }
  0x38   :  { %8016 = vmatmul.mubr.msk.f32.vlgmr.msra.gmra.mrb[8].mxu1 %vm87_vm1, %v7382_v18  ;;  %8883 = vmatpush3.bf16.msra.mxu0 %v9736_v4 }
  0x39   :  { %8889 = vmatpush3.bf16.msra.mxu1 %v9747_v8  ;;  %8884 = vmatprep.subr.bf16.mxu0 %v9608_v3 }
  0x3a   :  { %8890 = vmatprep.subr.bf16.mxu1 %v9608_v3  ;;  %8037 = vmatprep.mubr.msk.f32.mxu1 %vm9609_vm0, %v9610_v11 }
  0x3b   :  { %8026 = vmatprep.mubr.msk.f32.mxu0 %vm9609_vm0, %v9610_v11 }
  0x3c   :  { %8886 = vmatpush3.bf16.msra.mxu0 %v9760_v12 }
  0x3d   :  { %8892 = vmatpush3.bf16.msra.mxu1 %v9764_v13  ;;  %8893 = vmatprep.subr.bf16.mxu0 %v9608_v3 }
  0x3e   :  { %8899 = vmatprep.subr.bf16.mxu1 %v9608_v3 }
  0x3f   :  { %8027 = vmatmul.mubr.msk.f32.vlgmr.msra.gmra.mrb[10].mxu0 %vm87_vm1, %v7385_v19 }
  0x40   :  { %8038 = vmatmul.mubr.msk.f32.vlgmr.msra.gmra.mrb[10].mxu1 %vm87_vm1, %v7385_v19  ;;  %8895 = vmatpush3.bf16.msra.mxu0 %v9736_v4 }
  0x41   :  { %8901 = vmatpush3.bf16.msra.mxu1 %v9747_v8  ;;  %8896 = vmatprep.subr.bf16.mxu0 %v9608_v3 }
  0x42   :  { %8902 = vmatprep.subr.bf16.mxu1 %v9608_v3  ;;  %8059 = vmatprep.mubr.msk.f32.mxu1 %vm9609_vm0, %v9610_v11 }
  0x43   :  { %8048 = vmatprep.mubr.msk.f32.mxu0 %vm9609_vm0, %v9610_v11 }
  0x44   :  { %8898 = vmatpush3.bf16.msra.mxu0 %v9760_v12 }
  0x45   :  { %8904 = vmatpush3.bf16.msra.mxu1 %v9764_v13  ;;  %8905 = vmatprep.subr.bf16.mxu0 %v9608_v3 }
  0x46   :  { %8911 = vmatprep.subr.bf16.mxu1 %v9608_v3 }
  0x47   :  { %8049 = vmatmul.mubr.msk.f32.vlgmr.msra.gmra.mrb[12].mxu0 %vm87_vm1, %v7388_v20 }
  0x48   :  { %8060 = vmatmul.mubr.msk.f32.vlgmr.msra.gmra.mrb[12].mxu1 %vm87_vm1, %v7388_v20  ;;  %8907 = vmatpush3.bf16.msra.mxu0 %v9736_v4 }
  0x49   :  { %8913 = vmatpush3.bf16.msra.mxu1 %v9747_v8  ;;  %8908 = vmatprep.subr.bf16.mxu0 %v9608_v3 }
  0x4a   :  { %8914 = vmatprep.subr.bf16.mxu1 %v9608_v3  ;;  %8081 = vmatprep.mubr.msk.f32.mxu1 %vm9609_vm0, %v9610_v11 }
  0x4b   :  { %8070 = vmatprep.mubr.msk.f32.mxu0 %vm9609_vm0, %v9610_v11 }
  0x4c   :  { %8910 = vmatpush3.bf16.msra.mxu0 %v9760_v12 }
  0x4d   :  { %8916 = vmatpush3.bf16.msra.mxu1 %v9764_v13  ;;  %8917 = vmatprep.subr.bf16.mxu0 %v9608_v3 }
  0x4e   :  { %8923 = vmatprep.subr.bf16.mxu1 %v9608_v3 }
  0x4f   :  { %8071 = vmatmul.mubr.msk.f32.vlgmr.msra.gmra.mrb[14].mxu0 %vm87_vm1, %v7391_v25 }
  0x50   :  { %8082 = vmatmul.mubr.msk.f32.vlgmr.msra.gmra.mrb[14].mxu1 %vm87_vm1, %v7391_v25  ;;  %8919 = vmatpush3.bf16.msra.mxu0 %v9902_v26 }
  0x51   :  { %8925 = vmatpush3.bf16.msra.mxu1 %v9906_v27  ;;  %8920 = vmatprep.subr.bf16.mxu0 %v9608_v3 }
  0x52   :  { %8926 = vmatprep.subr.bf16.mxu1 %v9608_v3  ;;  %8092 = vmatprep.mubr.msk.f32.mxu0 %vm9609_vm0, %v9610_v11 }
  0x53   :  { %8103 = vmatprep.mubr.msk.f32.mxu1 %vm9609_vm0, %v9610_v11 }
  0x54   :  { %8922 = vmatpush3.bf16.msra.mxu0 %v9924_v32 }
  0x55   :  { %8928 = vmatpush3.bf16.msra.mxu1 %v9928_v33  ;;  %8929 = vmatprep.subr.bf16.mxu0 %v9608_v3 }
  0x56   :  { %8935 = vmatprep.subr.bf16.mxu1 %v9608_v3 }
  0x57   :  { %8093 = vmatmul.mubr.f32.vlgmr.msra.gmra.mrb[16].mxu0 %v9610_v11 }
  0x58   :  { %8104 = vmatmul.mubr.f32.vlgmr.msra.gmra.mrb[16].mxu1 %v9610_v11  ;;  %8931 = vmatpush3.bf16.msra.mxu0 %v9902_v26 }
  0x59   :  { %8937 = vmatpush3.bf16.msra.mxu1 %v9906_v27  ;;  %8125 = vmatprep.mubr.msk.f32.mxu1 %vm9609_vm0, %v9610_v11 }
  0x5a   :  { %8938 = vmatprep.subr.bf16.mxu1 %v9608_v3  ;;  %8932 = vmatprep.subr.bf16.mxu0 %v9608_v3 }
  0x5b   :  { %8114 = vmatprep.mubr.msk.f32.mxu0 %vm9609_vm0, %v9610_v11 }
  0x5c   :  { %8934 = vmatpush3.bf16.msra.mxu0 %v9924_v32 }
  0x5d   :  { %8940 = vmatpush3.bf16.msra.mxu1 %v9928_v33  ;;  %8941 = vmatprep.subr.bf16.mxu0 %v9608_v3 }
  0x5e   :  { %8947 = vmatprep.subr.bf16.mxu1 %v9608_v3 }
  0xea   :  { %v157_v37 = vpop.f32.mrb[0].mxu0 }
  0xeb   :  { %v234_v38 = vpop.f32.mrb[0].mxu1  ;;  %v158_v39 = vadd.f32 %v7369_v35, %v157_v37  ;;  %v7918_v40 = vpop.f32.mrb[1].mxu0 }
  0xec   :  { %v235_v41 = vadd.f32 %v7371_v36, %v234_v38  ;;  %v7929_v42 = vpop.f32.mrb[1].mxu1  ;;  %v9964_v38 = vld [vmem:[%s11327_s1] sm:$0x3] }
  0xed   :  { %161 = vst [vmem:[#allocation2] sm:$0x3] %v158_v39  ;;  %vm1291_vm2 = vcmp.gt.s32.totalorder %v9964_v38, 7  ;;  %vm1290_vm3 = vcmp.gt.s32.totalorder %v9964_v38, 0  ;;  %vm1514_vm7 = vcmp.gt.s32.totalorder %v9964_v38, 6  ;;  %vm1513_vm8 = vcmp.gt.s32.totalorder %v9964_v38, 1 }
  0xee   :  { %238 = vst [vmem:[#allocation3] sm:$0x3] %v235_v41  ;;  %vm1740_vm11 = vcmp.gt.s32.totalorder %v9964_v38, 5  ;;  %vm1739_vm12 = vcmp.gt.s32.totalorder %v9964_v38, 2  ;;  %vm1972_vm15 = vcmp.gt.s32.totalorder %v9964_v38, 4 }
  0xf2   :  { %v310_v43 = vpop.f32.mrb[2].mxu0 }
  0xf3   :  { %v382_v44 = vpop.f32.mrb[2].mxu1  ;;  %v311_v45 = vadd.f32 %v7369_v35, %v310_v43  ;;  %v7940_v46 = vpop.f32.mrb[3].mxu0 }
  0xf4   :  { %v383_v47 = vadd.f32 %v7371_v36, %v382_v44  ;;  %v7951_v48 = vpop.f32.mrb[3].mxu1  ;;  %v1292_v23 = vld [vmem:[#allocation2] sm:$0x3] }
  0xf5   :  { %315 = vst [vmem:[#allocation2 + $0x2] sm:$0x3] %v311_v45 }
  0xf6   :  { %387 = vst [vmem:[#allocation3 + $0x2] sm:$0x3] %v383_v47 }
  0xfa   :  { %v459_v49 = vpop.f32.mrb[4].mxu0 }
  0xfb   :  { %v531_v50 = vpop.f32.mrb[4].mxu1  ;;  %v460_v51 = vadd.f32 %v7369_v35, %v459_v49  ;;  %v7962_v52 = vpop.f32.mrb[5].mxu0 }
  0xfc   :  { %v532_v53 = vadd.f32 %v7371_v36, %v531_v50  ;;  %v7973_v54 = vpop.f32.mrb[5].mxu1  ;;  %v1391_v52 = vsel %vm1290_vm3, 1, %v9611_v34 }
  0xfd   :  { %464 = vst [vmem:[#allocation2 + $0x4] sm:$0x3] %v460_v51 }
  0xfe   :  { %536 = vst [vmem:[#allocation3 + $0x4] sm:$0x3] %v532_v53 }
 0x102   :  { %v608_v55 = vpop.f32.mrb[6].mxu0 }
 0x103   :  { %v680_v56 = vpop.f32.mrb[6].mxu1  ;;  %v609_v57 = vadd.f32 %v7369_v35, %v608_v55  ;;  %v7984_v58 = vpop.f32.mrb[7].mxu0 }
 0x104   :  { %v681_v59 = vadd.f32 %v7371_v36, %v680_v56  ;;  %v7995_v60 = vpop.f32.mrb[7].mxu1 }
 0x105   :  { %613 = vst [vmem:[#allocation2 + $0x6] sm:$0x3] %v609_v57 }
 0x106   :  { %685 = vst [vmem:[#allocation3 + $0x6] sm:$0x3] %v681_v59 }
 0x10a   :  { %v757_v61 = vpop.f32.mrb[8].mxu0 }
 0x10b   :  { %v829_v62 = vpop.f32.mrb[8].mxu1  ;;  %v758_v63 = vadd.f32 %v7369_v35, %v757_v61  ;;  %v8006_v0 = vpop.f32.mrb[9].mxu0 }
 0x10c   :  { %v830_v1 = vadd.f32 %v7371_v36, %v829_v62  ;;  %v8017_v2 = vpop.f32.mrb[9].mxu1 }
 0x10d   :  { %762 = vst [vmem:[#allocation2 + $0x8] sm:$0x3] %v758_v63 }
 0x10e   :  { %834 = vst [vmem:[#allocation3 + $0x8] sm:$0x3] %v830_v1 }
 0x112   :  { %v906_v4 = vpop.f32.mrb[10].mxu0 }
 0x113   :  { %v978_v5 = vpop.f32.mrb[10].mxu1  ;;  %v907_v6 = vadd.f32 %v7369_v35, %v906_v4  ;;  %v8028_v7 = vpop.f32.mrb[11].mxu0 }
 0x114   :  { %v979_v8 = vadd.f32 %v7371_v36, %v978_v5  ;;  %v8039_v9 = vpop.f32.mrb[11].mxu1 }
 0x115   :  { %911 = vst [vmem:[#allocation2 + $0xa] sm:$0x3] %v907_v6 }
 0x116   :  { %983 = vst [vmem:[#allocation3 + $0xa] sm:$0x3] %v979_v8 }
 0x11a   :  { %v1055_v10 = vpop.f32.mrb[12].mxu0 }
 0x11b   :  { %v1127_v12 = vpop.f32.mrb[12].mxu1  ;;  %v1056_v13 = vadd.f32 %v7369_v35, %v1055_v10  ;;  %v8050_v14 = vpop.f32.mrb[13].mxu0 }
 0x11c   :  { %v1128_v15 = vadd.f32 %v7371_v36, %v1127_v12  ;;  %v8061_v16 = vpop.f32.mrb[13].mxu1 }
 0x11d   :  { %1060 = vst [vmem:[#allocation2 + $0xc] sm:$0x3] %v1056_v13 }
 0x11e   :  { %1132 = vst [vmem:[#allocation3 + $0xc] sm:$0x3] %v1128_v15 }
 0x122   :  { %v1204_v17 = vpop.f32.mrb[14].mxu0 }
 0x123   :  { %v1276_v18 = vpop.f32.mrb[14].mxu1  ;;  %v1205_v19 = vadd.f32 %v7369_v35, %v1204_v17  ;;  %v8072_v20 = vpop.f32.mrb[15].mxu0  ;;  %v1515_v17 = vld [vmem:[#allocation2 + $0x2] sm:$0x3] }
 0x124   :  { %v1277_v21 = vadd.f32 %v7371_v36, %v1276_v18  ;;  %v8083_v22 = vpop.f32.mrb[15].mxu1  ;;  %v1494_v36 = vsel %vm1291_vm2, 1, %v9611_v34  ;;  %vm1971_vm2 = vcmp.gt.s32.totalorder %v9964_v38, 3 }
 0x125   :  { %1209 = vst [vmem:[#allocation2 + $0xe] sm:$0x3] %v1205_v19  ;;  %v1620_v8 = vld [vmem:[#allocation3 + $0xc] sm:$0x3] }
 0x126   :  { %1281 = vst [vmem:[#allocation3 + $0xe] sm:$0x3] %v1277_v21 }
 0x12a   :  { %v1362_v24 = vpop.f32.mrb[16].mxu0 }
 0x12b   :  { %v1366_v25 = vadd.f32 %v1362_v24, %v1292_v23  ;;  %v1465_v28 = vpop.f32.mrb[16].mxu1  ;;  %v8094_v29 = vpop.f32.mrb[17].mxu0  ;;  %v1718_v24 = vsel %vm1514_vm7, 1, %v9611_v34 }
 0x12c   :  { %v8105_v30 = vpop.f32.mrb[17].mxu1 }
 0x12d   :  { %9328 = vtanh.f32 %v1366_v25  ;;  %v1398_v31 = vld [vmem:[#allocation3 + $0xe] sm:$0x3]  ;;  %v7394_v40 = vmul.f32 -1.442695, %v1366_v25 }
 0x12e   :  { %v1469_v37 = vadd.f32 %v1465_v28, %v1398_v31 }
 0x130   :  { %9330 = vtanh.f32 %v1469_v37  ;;  %v7395_v41 = vmul.f32 -1.442695, %v1469_v37 }
 0x131   :  { %9332 = vpow2.f32 %v7394_v40 }
 0x132   :  { %9334 = vpow2.f32 %v7395_v41 }
 0x137   :  { %v9329_v35 = vpop.eup %9328 }
 0x138   :  { %1376 = vrot.lane.b32.xlu1 %v9329_v35, %s9612_s24 }
 0x13a   :  { %v9331_v39 = vpop.eup %9330 }
 0x13b   :  { %1479 = vrot.lane.b32.xlu0 %v9331_v39, %s9612_s24  ;;  %v9333_v42 = vpop.eup %9332 }
 0x13c   :  { %1496 = vperm.xlu1 %9326, %v1494_v36   ;;  %v9335_v43 = vpop.eup %9334  ;;  %v1370_v44 = vadd.f32 1.0, %v9333_v42  ;;  %v1613_v42 = vsel %vm1513_vm8, 1, %v9611_v34 }
 0x13d   :  { %v1473_v45 = vadd.f32 1.0, %v9335_v43 }
 0x13e   :  { %9336 = vrcp.f32 %v1370_v44 }
 0x13f   :  { %9338 = vrcp.f32 %v1473_v45 }
 0x148   :  { %v9337_v46 = vpop.eup %9336 }
 0x149   :  { %v9339_v49 = vpop.eup %9338  ;;  %v1374_v59 = vmul.f32 0.0, %v9337_v46 }
 0x14a   :  { %v1477_v53 = vmul.f32 0.0, %v9339_v49 }
 0x1aa   :  { %v1377_v47 = vpop.permute.xlu1 %1376 }
 0x1ab   :  { %v1379_v48 = vmul.f32 %v9337_v46, %v1377_v47 }
 0x1ad   :  { %v1480_v50 = vpop.permute.xlu0 %1479  ;;  %1381 = vrot.lane.b32.xlu1 %v1379_v48, %s9613_s2 }
 0x1ae   :  { %v1482_v51 = vmul.f32 %v9339_v49, %v1480_v50 }
 0x1b0   :  { %1484 = vrot.lane.b32.xlu0 %v1482_v51, %s9613_s2 }
 0x1b1   :  { %1393 = vperm.xlu1 %9326, %v1391_v52  }
 0x1bb   :  { %v9978_v57 = vpop.permute.xlu1 %1496 }
 0x1bc   :  { %vm1498_vm4 = vcmp.eq.s32.totalorder %v9978_v57, 1  ;;  %v7269_v57 = vld [vmem:[%s11309_s19] sm:$0xff] }
 0x21f   :  { %v1382_v58 = vpop.permute.xlu1 %1381 }
 0x220   :  { %v9980_v60 = vadd.f32 %v1382_v58, %v1374_v59 }
 0x222   :  { %v1485_v54 = vpop.permute.xlu0 %1484 }
 0x223   :  { %v9974_v55 = vadd.f32 %v1485_v54, %v1477_v53 }
 0x225   :  { %9340 = vtanh.f32 %v9974_v55  ;;  %v10024_v31 = vsel %vm1498_vm4, %v9974_v55, 0.0 }
 0x226   :  { %9342 = vtanh.f32 %v9980_v60 }
 0x22f   :  { %v9341_v56 = vpop.eup %9340 }
 0x230   :  { %1490 = vrot.lane.b32.xlu0 %v9341_v56, %s9612_s24  ;;  %v9343_v0 = vpop.eup %9342  ;;  %v9996_v2 = vpop.permute.xlu1 %1393 }
 0x231   :  { %vm1395_vm6 = vcmp.eq.s32.totalorder %v9996_v2, 1  ;;  %v7270_v2 = vld [vmem:[%s11309_s19 + $0x8] sm:$0xff] }
 0x232   :  { %v10039_v45 = vsel %vm1395_vm6, %v9980_v60, 0.0  ;;  %v1849_v60 = vld [vmem:[#allocation3 + $0xa] sm:$0x3] }
 0x2a2   :  { %v1491_v61 = vpop.permute.xlu0 %1490 }
 0x2a3   :  { %v1493_v62 = vmul.f32 %v9339_v49, %v1491_v61 }
 0x2a5   :  { %v9986_v63 = vsel %vm1498_vm4, %v1493_v62, 0.0 }
 0x2a6   :  { %1508 = vrot.lane.b32.xlu0 %v9986_v63, %s9613_s2 }
 0x2aa   :  { %1387 = vrot.lane.b32.xlu0 %v9343_v0, %s9612_s24 }
 0x318   :  { %v1509_v1 = vpop.permute.xlu0 %1508 }
 0x319   :  { %1512 = vst.msk [vmem:[#allocation5 + $0xe] sm:$0x3] %vm1505_vm5, %v1509_v1  ;;  %8126 = vmatmul.mubr.msk.f32.vlgmr.msra.gmra.mrb[18].mxu1 %vm87_vm1, %v1509_v1 }
 0x31a   :  { %8949 = vmatpush3.bf16.msra.mxu1 %v9906_v27  ;;  %8147 = vmatprep.mubr.msk.f32.mxu1 %vm9609_vm0, %v9610_v11 }
 0x31b   :  { %8950 = vmatprep.subr.bf16.mxu1 %v9608_v3 }
 0x31c   :  { %v1388_v4 = vpop.permute.xlu0 %1387 }
 0x31d   :  { %v1390_v5 = vmul.f32 %v9337_v46, %v1388_v4 }
 0x31e   :  { %8952 = vmatpush3.bf16.msra.mxu1 %v9928_v33 }
 0x31f   :  { %v10003_v6 = vsel %vm1395_vm6, %v1390_v5, 0.0  ;;  %8959 = vmatprep.subr.bf16.mxu1 %v9608_v3 }
 0x320   :  { %1502 = vrot.lane.b32.xlu1 %v10003_v6, %s9613_s2 }
 0x392   :  { %v1503_v7 = vpop.permute.xlu1 %1502 }
 0x393   :  { %1506 = vst.msk [vmem:[#allocation4] sm:$0x3] %vm1505_vm5, %v1503_v7  ;;  %8115 = vmatmul.mubr.msk.f32.vlgmr.msra.gmra.mrb[18].mxu0 %vm87_vm1, %v1503_v7 }
 0x394   :  { %8943 = vmatpush3.bf16.msra.mxu0 %v9902_v26  ;;  %8136 = vmatprep.mubr.msk.f32.mxu0 %vm9609_vm0, %v9610_v11 }
 0x395   :  { %8944 = vmatprep.subr.bf16.mxu0 %v9608_v3 }
 0x398   :  { %8946 = vmatpush3.bf16.msra.mxu0 %v9924_v32 }
 0x399   :  { %8953 = vmatprep.subr.bf16.mxu0 %v9608_v3 }
 0x3ec   :  { %v1689_v9 = vpop.f32.mrb[18].mxu1 }
 0x3ed   :  { %v1693_v10 = vadd.f32 %v1689_v9, %v1620_v8  ;;  %v8127_v12 = vpop.f32.mrb[19].mxu1 }
 0x3ef   :  { %9344 = vtanh.f32 %v1693_v10  ;;  %v7399_v14 = vmul.f32 -1.442695, %v1693_v10 }
 0x3f1   :  { %9346 = vpow2.f32 %v7399_v14  ;;  %v1950_v14 = vsel %vm1740_vm11, 1, %v9611_v34 }
 0x3f9   :  { %v9345_v13 = vpop.eup %9344 }
 0x3fa   :  { %1703 = vrot.lane.b32.xlu0 %v9345_v13, %s9612_s24 }
 0x3fb   :  { %v9347_v15 = vpop.eup %9346 }
 0x3fc   :  { %v1697_v16 = vadd.f32 1.0, %v9347_v15 }
 0x3fe   :  { %9348 = vrcp.f32 %v1697_v16 }
 0x408   :  { %v9349_v21 = vpop.eup %9348 }
 0x409   :  { %v1701_v37 = vmul.f32 %v9349_v21, %v10024_v31 }
 0x466   :  { %v1584_v18 = vpop.f32.mrb[18].mxu0 }
 0x467   :  { %v1588_v19 = vadd.f32 %v1584_v18, %v1515_v17  ;;  %v8116_v20 = vpop.f32.mrb[19].mxu0 }
 0x469   :  { %9350 = vtanh.f32 %v1588_v19  ;;  %v7397_v28 = vmul.f32 -1.442695, %v1588_v19 }
 0x46b   :  { %9352 = vpow2.f32 %v7397_v28  ;;  %v1842_v28 = vsel %vm1739_vm12, 1, %v9611_v34 }
 0x46c   :  { %v1704_v22 = vpop.permute.xlu0 %1703 }
 0x46d   :  { %v1706_v23 = vmul.f32 %v9349_v21, %v1704_v22 }
 0x46f   :  { %1708 = vrot.lane.b32.xlu1 %v1706_v23, %s9613_s2 }
 0x473   :  { %v9351_v25 = vpop.eup %9350  ;;  %1720 = vperm.xlu1 %9326, %v1718_v24  }
 0x474   :  { %1598 = vrot.lane.b32.xlu0 %v9351_v25, %s9612_s24 }
 0x475   :  { %v9353_v29 = vpop.eup %9352 }
 0x476   :  { %v1592_v30 = vadd.f32 1.0, %v9353_v29 }
 0x478   :  { %9354 = vrcp.f32 %v1592_v30 }
 0x482   :  { %v9355_v39 = vpop.eup %9354 }
 0x483   :  { %v1596_v46 = vmul.f32 %v9355_v39, %v10039_v45 }
 0x4e1   :  { %v1709_v35 = vpop.permute.xlu1 %1708 }
 0x4e2   :  { %v10027_v36 = vadd.f32 %v1709_v35, %v1701_v37 }
 0x4e4   :  { %9356 = vtanh.f32 %v10027_v36 }
 0x4e6   :  { %v1599_v40 = vpop.permute.xlu0 %1598 }
 0x4e7   :  { %v1601_v41 = vmul.f32 %v9355_v39, %v1599_v40 }
 0x4e9   :  { %1603 = vrot.lane.b32.xlu1 %v1601_v41, %s9613_s2 }
 0x4ed   :  { %1615 = vperm.xlu1 %9326, %v1613_v42  }
 0x4ee   :  { %v9357_v43 = vpop.eup %9356 }
 0x4ef   :  { %1714 = vrot.lane.b32.xlu0 %v9357_v43, %s9612_s24 }
 0x4f2   :  { %v10034_v44 = vpop.permute.xlu1 %1720 }
 0x4f3   :  { %vm1722_vm9 = vcmp.eq.s32.totalorder %v10034_v44, 1  ;;  %v7103_v44 = vld [vmem:[%s11306_s16 + $0x8] sm:$0xff] }
 0x4f4   :  { %v10093_v19 = vsel %vm1722_vm9, %v10027_v36, %v10024_v31 }
 0x55b   :  { %v1604_v47 = vpop.permute.xlu1 %1603 }
 0x55c   :  { %v10042_v48 = vadd.f32 %v1604_v47, %v1596_v46 }
 0x55e   :  { %9358 = vtanh.f32 %v10042_v48 }
 0x561   :  { %v1715_v49 = vpop.permute.xlu0 %1714 }
 0x562   :  { %v10045_v50 = vmul.f32 %v9349_v21, %v1715_v49 }
 0x564   :  { %v10052_v51 = vsel %vm1722_vm9, %v10045_v50, %v9986_v63 }
 0x565   :  { %1851 = vrot.lane.b32.xlu0 %v10052_v51, %s9613_s2 }
 0x568   :  { %v9359_v52 = vpop.eup %9358 }
 0x569   :  { %1609 = vrot.lane.b32.xlu0 %v9359_v52, %s9612_s24 }
 0x56c   :  { %v10061_v54 = vpop.permute.xlu1 %1615 }
 0x56d   :  { %vm1617_vm10 = vcmp.eq.s32.totalorder %v10061_v54, 1  ;;  %v7104_v54 = vld [vmem:[%s11306_s16 + $0x10] sm:$0xff] }
 0x56e   :  { %v10109_v31 = vsel %vm1617_vm10, %v10042_v48, %v10039_v45 }
 0x5d7   :  { %v1852_v53 = vpop.permute.xlu0 %1851 }
 0x5d8   :  { %8148 = vmatmul.mubr.msk.f32.vlgmr.msra.gmra.mrb[20].mxu1 %vm87_vm1, %v1852_v53 }
 0x5d9   :  { %8961 = vmatpush3.bf16.msra.mxu1 %v9906_v27  ;;  %8169 = vmatprep.mubr.msk.f32.mxu1 %vm9609_vm0, %v9610_v11 }
 0x5da   :  { %8962 = vmatprep.subr.bf16.mxu1 %v9608_v3 }
 0x5db   :  { %v1610_v55 = vpop.permute.xlu0 %1609 }
 0x5dc   :  { %v10064_v56 = vmul.f32 %v9355_v39, %v1610_v55 }
 0x5dd   :  { %8964 = vmatpush3.bf16.msra.mxu1 %v9928_v33 }
 0x5de   :  { %v10072_v58 = vsel %vm1617_vm10, %v10064_v56, %v10003_v6  ;;  %8971 = vmatprep.subr.bf16.mxu1 %v9608_v3  ;;  %v1741_v6 = vld [vmem:[#allocation2 + $0x4] sm:$0x3] }
 0x5df   :  { %1743 = vrot.lane.b32.xlu1 %v10072_v58, %s9613_s2 }
 0x651   :  { %v1744_v59 = vpop.permute.xlu1 %1743 }
 0x652   :  { %8137 = vmatmul.mubr.msk.f32.vlgmr.msra.gmra.mrb[20].mxu0 %vm87_vm1, %v1744_v59 }
 0x653   :  { %8955 = vmatpush3.bf16.msra.mxu0 %v9902_v26  ;;  %8158 = vmatprep.mubr.msk.f32.mxu0 %vm9609_vm0, %v9610_v11 }
 0x654   :  { %8956 = vmatprep.subr.bf16.mxu0 %v9608_v3 }
 0x657   :  { %8958 = vmatpush3.bf16.msra.mxu0 %v9924_v32 }
 0x658   :  { %8965 = vmatprep.subr.bf16.mxu0 %v9608_v3 }
 0x6ab   :  { %v1921_v61 = vpop.f32.mrb[20].mxu1 }
 0x6ac   :  { %v1925_v62 = vadd.f32 %v1921_v61, %v1849_v60  ;;  %v8149_v63 = vpop.f32.mrb[21].mxu1 }
 0x6ae   :  { %9360 = vtanh.f32 %v1925_v62  ;;  %v7403_v1 = vmul.f32 -1.442695, %v1925_v62  ;;  %v1973_v62 = vld [vmem:[#allocation2 + $0x6] sm:$0x3] }
 0x6b0   :  { %9362 = vpow2.f32 %v7403_v1 }
 0x6b8   :  { %v9361_v0 = vpop.eup %9360 }
 0x6b9   :  { %1935 = vrot.lane.b32.xlu0 %v9361_v0, %s9612_s24 }
 0x6ba   :  { %v9363_v4 = vpop.eup %9362 }
 0x6bb   :  { %v1929_v5 = vadd.f32 1.0, %v9363_v4 }
 0x6bd   :  { %9364 = vrcp.f32 %v1929_v5 }
 0x6c7   :  { %v9365_v10 = vpop.eup %9364 }
 0x6c8   :  { %v1933_v20 = vmul.f32 %v9365_v10, %v10093_v19 }
 0x725   :  { %v1813_v7 = vpop.f32.mrb[20].mxu0 }
 0x726   :  { %v1817_v8 = vadd.f32 %v1813_v7, %v1741_v6  ;;  %v8138_v9 = vpop.f32.mrb[21].mxu0  ;;  %v2182_v7 = vsel %vm1972_vm15, 1, %v9611_v34 }
 0x728   :  { %9366 = vtanh.f32 %v1817_v8  ;;  %v7401_v16 = vmul.f32 -1.442695, %v1817_v8 }
 0x72a   :  { %9368 = vpow2.f32 %v7401_v16 }
 0x72b   :  { %v1936_v12 = vpop.permute.xlu0 %1935 }
 0x72c   :  { %v1938_v13 = vmul.f32 %v9365_v10, %v1936_v12 }
 0x72e   :  { %1940 = vrot.lane.b32.xlu1 %v1938_v13, %s9613_s2 }
 0x732   :  { %v9367_v15 = vpop.eup %9366  ;;  %1952 = vperm.xlu1 %9326, %v1950_v14  }
 0x733   :  { %1827 = vrot.lane.b32.xlu0 %v9367_v15, %s9612_s24 }
 0x734   :  { %v9369_v17 = vpop.eup %9368 }
 0x735   :  { %v1821_v18 = vadd.f32 1.0, %v9369_v17 }
 0x737   :  { %9370 = vrcp.f32 %v1821_v18 }
 0x741   :  { %v9371_v23 = vpop.eup %9370 }
 0x742   :  { %v1825_v37 = vmul.f32 %v9371_v23, %v10109_v31 }
 0x7a0   :  { %v1941_v21 = vpop.permute.xlu1 %1940 }
 0x7a1   :  { %v10096_v22 = vadd.f32 %v1941_v21, %v1933_v20  ;;  %v2074_v21 = vsel %vm1971_vm2, 1, %v9611_v34 }
 0x7a3   :  { %9372 = vtanh.f32 %v10096_v22 }
 0x7a5   :  { %v1828_v24 = vpop.permute.xlu0 %1827 }
 0x7a6   :  { %v1830_v25 = vmul.f32 %v9371_v23, %v1828_v24 }
 0x7a8   :  { %1832 = vrot.lane.b32.xlu1 %v1830_v25, %s9613_s2 }
 0x7ac   :  { %1844 = vperm.xlu1 %9326, %v1842_v28  }
 0x7ad   :  { %v9373_v29 = vpop.eup %9372 }
 0x7ae   :  { %1946 = vrot.lane.b32.xlu0 %v9373_v29, %s9612_s24 }
 0x7b1   :  { %v10103_v30 = vpop.permute.xlu1 %1952 }
 0x7b2   :  { %vm1954_vm13 = vcmp.eq.s32.totalorder %v10103_v30, 1 }
 0x7b3   :  { %v10163_v13 = vsel %vm1954_vm13, %v10096_v22, %v10093_v19 }
 0x81a   :  { %v1833_v35 = vpop.permute.xlu1 %1832 }
 0x81b   :  { %v10112_v36 = vadd.f32 %v1833_v35, %v1825_v37 }
 0x81d   :  { %9374 = vtanh.f32 %v10112_v36 }
 0x820   :  { %v1947_v39 = vpop.permute.xlu0 %1946 }
 0x821   :  { %v10115_v40 = vmul.f32 %v9365_v10, %v1947_v39 }
 0x823   :  { %v10122_v41 = vsel %vm1954_vm13, %v10115_v40, %v10052_v51  ;;  %v2081_v51 = vld [vmem:[#allocation3 + $0x8] sm:$0x3] }
 0x824   :  { %2083 = vrot.lane.b32.xlu0 %v10122_v41, %s9613_s2 }
 0x827   :  { %v9375_v42 = vpop.eup %9374 }
 0x828   :  { %1838 = vrot.lane.b32.xlu0 %v9375_v42, %s9612_s24 }
 0x82b   :  { %v10131_v45 = vpop.permute.xlu1 %1844 }
 0x82c   :  { %vm1846_vm14 = vcmp.eq.s32.totalorder %v10131_v45, 1 }
 0x82d   :  { %v10179_v22 = vsel %vm1846_vm14, %v10112_v36, %v10109_v31 }
 0x896   :  { %v2084_v43 = vpop.permute.xlu0 %2083 }
 0x897   :  { %8170 = vmatmul.mubr.msk.f32.vlgmr.msra.gmra.mrb[22].mxu1 %vm87_vm1, %v2084_v43  ;;  %v2306_v43 = vld [vmem:[#allocation3 + $0x6] sm:$0x3] }
 0x898   :  { %8973 = vmatpush3.bf16.msra.mxu1 %v9906_v27  ;;  %8191 = vmatprep.mubr.msk.f32.mxu1 %vm9609_vm0, %v9610_v11 }
 0x899   :  { %8974 = vmatprep.subr.bf16.mxu1 %v9608_v3 }
 0x89a   :  { %v1839_v46 = vpop.permute.xlu0 %1838 }
 0x89b   :  { %v10134_v47 = vmul.f32 %v9371_v23, %v1839_v46 }
 0x89c   :  { %8976 = vmatpush3.bf16.msra.mxu1 %v9928_v33 }
 0x89d   :  { %v10142_v48 = vsel %vm1846_vm14, %v10134_v47, %v10072_v58  ;;  %8983 = vmatprep.subr.bf16.mxu1 %v9608_v3 }
 0x89e   :  { %1975 = vrot.lane.b32.xlu1 %v10142_v48, %s9613_s2 }
 0x910   :  { %v1976_v49 = vpop.permute.xlu1 %1975 }
 0x911   :  { %8159 = vmatmul.mubr.msk.f32.vlgmr.msra.gmra.mrb[22].mxu0 %vm87_vm1, %v1976_v49 }
 0x912   :  { %8967 = vmatpush3.bf16.msra.mxu0 %v9902_v26  ;;  %8180 = vmatprep.mubr.msk.f32.mxu0 %vm9609_vm0, %v9610_v11 }
 0x913   :  { %8968 = vmatprep.subr.bf16.mxu0 %v9608_v3 }
 0x916   :  { %8970 = vmatpush3.bf16.msra.mxu0 %v9924_v32 }
 0x917   :  { %8977 = vmatprep.subr.bf16.mxu0 %v9608_v3 }
 0x96a   :  { %v2153_v52 = vpop.f32.mrb[22].mxu1 }
 0x96b   :  { %v2157_v53 = vadd.f32 %v2153_v52, %v2081_v51  ;;  %v8171_v55 = vpop.f32.mrb[23].mxu1 }
 0x96d   :  { %9376 = vtanh.f32 %v2157_v53  ;;  %v7407_v59 = vmul.f32 -1.442695, %v2157_v53 }
 0x96f   :  { %9378 = vpow2.f32 %v7407_v59 }
 0x977   :  { %v9377_v58 = vpop.eup %9376 }
 0x978   :  { %2167 = vrot.lane.b32.xlu0 %v9377_v58, %s9612_s24  ;;  %v2203_v58 = vld [vmem:[#allocation2 + $0x8] sm:$0x3] }
 0x979   :  { %v9379_v60 = vpop.eup %9378 }
 0x97a   :  { %v2161_v61 = vadd.f32 1.0, %v9379_v60 }
 0x97c   :  { %9380 = vrcp.f32 %v2161_v61 }
 0x986   :  { %v9381_v4 = vpop.eup %9380 }
 0x987   :  { %v2165_v14 = vmul.f32 %v9381_v4, %v10163_v13 }
 0x9e4   :  { %v2045_v63 = vpop.f32.mrb[22].mxu0 }
 0x9e5   :  { %v2049_v0 = vadd.f32 %v2045_v63, %v1973_v62  ;;  %v8160_v1 = vpop.f32.mrb[23].mxu0 }
 0x9e7   :  { %9382 = vtanh.f32 %v2049_v0  ;;  %v7405_v9 = vmul.f32 -1.442695, %v2049_v0 }
 0x9e9   :  { %9384 = vpow2.f32 %v7405_v9 }
 0x9ea   :  { %v2168_v5 = vpop.permute.xlu0 %2167 }
 0x9eb   :  { %v2170_v6 = vmul.f32 %v9381_v4, %v2168_v5 }
 0x9ed   :  { %2172 = vrot.lane.b32.xlu1 %v2170_v6, %s9613_s2 }
 0x9f1   :  { %v9383_v8 = vpop.eup %9382  ;;  %2184 = vperm.xlu1 %9326, %v2182_v7  }
 0x9f2   :  { %2059 = vrot.lane.b32.xlu0 %v9383_v8, %s9612_s24 }
 0x9f3   :  { %v9385_v10 = vpop.eup %9384 }
 0x9f4   :  { %v2053_v12 = vadd.f32 1.0, %v9385_v10 }
 0x9f6   :  { %9386 = vrcp.f32 %v2053_v12 }
 0xa00   :  { %v9387_v17 = vpop.eup %9386 }
 0xa01   :  { %v2057_v24 = vmul.f32 %v9387_v17, %v10179_v22 }
 0xa5f   :  { %v2173_v15 = vpop.permute.xlu1 %2172 }
 0xa60   :  { %v10166_v16 = vadd.f32 %v2173_v15, %v2165_v14 }
 0xa62   :  { %9388 = vtanh.f32 %v10166_v16 }
 0xa64   :  { %v2060_v18 = vpop.permute.xlu0 %2059 }
 0xa65   :  { %v2062_v20 = vmul.f32 %v9387_v17, %v2060_v18 }
 0xa67   :  { %2064 = vrot.lane.b32.xlu1 %v2062_v20, %s9613_s2 }
 0xa6b   :  { %2076 = vperm.xlu1 %9326, %v2074_v21  }
 0xa6c   :  { %v9389_v23 = vpop.eup %9388 }
 0xa6d   :  { %2178 = vrot.lane.b32.xlu0 %v9389_v23, %s9612_s24 }
 0xa70   :  { %v10173_v19 = vpop.permute.xlu1 %2184 }
 0xa71   :  { %vm2186_vm3 = vcmp.eq.s32.totalorder %v10173_v19, 1 }
 0xa72   :  { %v10231_v7 = vsel %vm2186_vm3, %v10166_v16, %v10163_v13 }
 0xad9   :  { %v2065_v25 = vpop.permute.xlu1 %2064 }
 0xada   :  { %v10182_v38 = vadd.f32 %v2065_v25, %v2057_v24 }
 0xadc   :  { %9390 = vtanh.f32 %v10182_v38 }
 0xadf   :  { %v2179_v34 = vpop.permute.xlu0 %2178 }
 0xae0   :  { %v10185_v28 = vmul.f32 %v9381_v4, %v2179_v34 }
 0xae2   :  { %v10192_v29 = vsel %vm2186_vm3, %v10185_v28, %v10122_v41 }
 0xae3   :  { %2308 = vrot.lane.b32.xlu0 %v10192_v29, %s9613_s2 }
 0xae6   :  { %v9391_v31 = vpop.eup %9390 }
 0xae7   :  { %2070 = vrot.lane.b32.xlu0 %v9391_v31, %s9612_s24 }
 0xaea   :  { %v10201_v35 = vpop.permute.xlu1 %2076 }
 0xaeb   :  { %vm2078_vm7 = vcmp.eq.s32.totalorder %v10201_v35, 1 }
 0xaec   :  { %v10243_v13 = vsel %vm2078_vm7, %v10182_v38, %v10179_v22 }
 0xb55   :  { %v2309_v37 = vpop.permute.xlu0 %2308 }
 0xb56   :  { %8192 = vmatmul.mubr.msk.f32.vlgmr.msra.gmra.mrb[24].mxu1 %vm87_vm1, %v2309_v37  ;;  %v2526_v37 = vld [vmem:[#allocation3 + $0x4] sm:$0x3] }
 0xb57   :  { %8985 = vmatpush3.bf16.msra.mxu1 %v9906_v27  ;;  %8213 = vmatprep.mubr.msk.f32.mxu1 %vm9609_vm0, %v9610_v11 }
 0xb58   :  { %8986 = vmatprep.subr.bf16.mxu1 %v9608_v3 }
 0xb59   :  { %v2071_v36 = vpop.permute.xlu0 %2070 }
 0xb5a   :  { %v10204_v39 = vmul.f32 %v9387_v17, %v2071_v36 }
 0xb5b   :  { %8988 = vmatpush3.bf16.msra.mxu1 %v9928_v33 }
 0xb5c   :  { %v10212_v41 = vsel %vm2078_vm7, %v10204_v39, %v10142_v48  ;;  %8995 = vmatprep.subr.bf16.mxu1 %v9608_v3 }
 0xb5d   :  { %2205 = vrot.lane.b32.xlu1 %v10212_v41, %s9613_s2 }
 0xbcf   :  { %v2206_v42 = vpop.permute.xlu1 %2205 }
 0xbd0   :  { %8181 = vmatmul.mubr.msk.f32.vlgmr.msra.gmra.mrb[24].mxu0 %vm87_vm1, %v2206_v42 }
 0xbd1   :  { %8979 = vmatpush3.bf16.msra.mxu0 %v9902_v26  ;;  %8202 = vmatprep.mubr.msk.f32.mxu0 %vm9609_vm0, %v9610_v11 }
 0xbd2   :  { %8980 = vmatprep.subr.bf16.mxu0 %v9608_v3 }
 0xbd5   :  { %8982 = vmatpush3.bf16.msra.mxu0 %v9924_v32 }
 0xbd6   :  { %8989 = vmatprep.subr.bf16.mxu0 %v9608_v3 }
 0xc29   :  { %v2378_v46 = vpop.f32.mrb[24].mxu1 }
 0xc2a   :  { %v2382_v48 = vadd.f32 %v2378_v46, %v2306_v43  ;;  %v8193_v49 = vpop.f32.mrb[25].mxu1 }
 0xc2c   :  { %9392 = vtanh.f32 %v2382_v48  ;;  %v7411_v52 = vmul.f32 -1.442695, %v2382_v48 }
 0xc2e   :  { %9394 = vpow2.f32 %v7411_v52 }
 0xc36   :  { %v9393_v51 = vpop.eup %9392 }
 0xc37   :  { %2392 = vrot.lane.b32.xlu0 %v9393_v51, %s9612_s24  ;;  %v2423_v51 = vld [vmem:[#allocation2 + $0xa] sm:$0x3] }
 0xc38   :  { %v9395_v53 = vpop.eup %9394 }
 0xc39   :  { %v2386_v55 = vadd.f32 1.0, %v9395_v53 }
 0xc3b   :  { %9396 = vrcp.f32 %v2386_v55 }
 0xc45   :  { %v9397_v62 = vpop.eup %9396 }
 0xc46   :  { %v2390_v8 = vmul.f32 %v9397_v62, %v10231_v7 }
 0xca3   :  { %v2275_v59 = vpop.f32.mrb[24].mxu0 }
 0xca4   :  { %v2279_v60 = vadd.f32 %v2275_v59, %v2203_v58  ;;  %v8182_v61 = vpop.f32.mrb[25].mxu0 }
 0xca6   :  { %9398 = vtanh.f32 %v2279_v60  ;;  %v7409_v4 = vmul.f32 -1.442695, %v2279_v60 }
 0xca8   :  { %9400 = vpow2.f32 %v7409_v4 }
 0xca9   :  { %v2393_v63 = vpop.permute.xlu0 %2392 }
 0xcaa   :  { %v2395_v0 = vmul.f32 %v9397_v62, %v2393_v63 }
 0xcac   :  { %2397 = vrot.lane.b32.xlu1 %v2395_v0, %s9613_s2 }
 0xcb0   :  { %v9399_v1 = vpop.eup %9398 }
 0xcb1   :  { %2289 = vrot.lane.b32.xlu0 %v9399_v1, %s9612_s24 }
 0xcb2   :  { %v9401_v5 = vpop.eup %9400 }
 0xcb3   :  { %v2283_v6 = vadd.f32 1.0, %v9401_v5 }
 0xcb5   :  { %9402 = vrcp.f32 %v2283_v6 }
 0xcbf   :  { %v9403_v12 = vpop.eup %9402 }
 0xcc0   :  { %v2287_v16 = vmul.f32 %v9403_v12, %v10243_v13 }
 0xd1e   :  { %v2398_v9 = vpop.permute.xlu1 %2397 }
 0xd1f   :  { %v10234_v10 = vadd.f32 %v2398_v9, %v2390_v8 }
 0xd21   :  { %9404 = vtanh.f32 %v10234_v10  ;;  %v10291_v1 = vsel %vm2078_vm7, %v10234_v10, %v10231_v7 }
 0xd23   :  { %v2290_v14 = vpop.permute.xlu0 %2289 }
 0xd24   :  { %v2292_v15 = vmul.f32 %v9403_v12, %v2290_v14 }
 0xd26   :  { %2294 = vrot.lane.b32.xlu0 %v2292_v15, %s9613_s2 }
 0xd2b   :  { %v9405_v17 = vpop.eup %9404 }
 0xd2c   :  { %2403 = vrot.lane.b32.xlu1 %v9405_v17, %s9612_s24 }
 0xd98   :  { %v2295_v18 = vpop.permute.xlu0 %2294 }
 0xd99   :  { %v10246_v20 = vadd.f32 %v2295_v18, %v2287_v16 }
 0xd9b   :  { %9406 = vtanh.f32 %v10246_v20  ;;  %v10303_v7 = vsel %vm2186_vm3, %v10246_v20, %v10243_v13 }
 0xd9e   :  { %v2404_v21 = vpop.permute.xlu1 %2403 }
 0xd9f   :  { %v10249_v23 = vmul.f32 %v9397_v62, %v2404_v21 }
 0xda1   :  { %v10255_v24 = vsel %vm2078_vm7, %v10249_v23, %v10192_v29 }
 0xda2   :  { %2528 = vrot.lane.b32.xlu1 %v10255_v24, %s9613_s2 }
 0xda5   :  { %v9407_v22 = vpop.eup %9406 }
 0xda6   :  { %2300 = vrot.lane.b32.xlu0 %v9407_v22, %s9612_s24 }
 0xe14   :  { %v2529_v25 = vpop.permute.xlu1 %2528 }
 0xe15   :  { %8214 = vmatmul.mubr.msk.f32.vlgmr.msra.gmra.mrb[26].mxu1 %vm87_vm1, %v2529_v25 }
 0xe16   :  { %8997 = vmatpush3.bf16.msra.mxu1 %v9906_v27  ;;  %8235 = vmatprep.mubr.msk.f32.mxu1 %vm9609_vm0, %v9610_v11 }
 0xe17   :  { %8998 = vmatprep.subr.bf16.mxu1 %v9608_v3 }
 0xe18   :  { %v2301_v38 = vpop.permute.xlu0 %2300 }
 0xe19   :  { %v10265_v34 = vmul.f32 %v9403_v12, %v2301_v38 }
 0xe1a   :  { %9000 = vmatpush3.bf16.msra.mxu1 %v9928_v33 }
 0xe1b   :  { %v10272_v29 = vsel %vm2186_vm3, %v10265_v34, %v10212_v41  ;;  %9007 = vmatprep.subr.bf16.mxu1 %v9608_v3 }
 0xe1c   :  { %2425 = vrot.lane.b32.xlu1 %v10272_v29, %s9613_s2 }
 0xe8e   :  { %v2426_v31 = vpop.permute.xlu1 %2425 }
 0xe8f   :  { %8203 = vmatmul.mubr.msk.f32.vlgmr.msra.gmra.mrb[26].mxu0 %vm87_vm1, %v2426_v31 }
 0xe90   :  { %8991 = vmatpush3.bf16.msra.mxu0 %v9902_v26  ;;  %8224 = vmatprep.mubr.msk.f32.mxu0 %vm9609_vm0, %v9610_v11 }
 0xe91   :  { %8992 = vmatprep.subr.bf16.mxu0 %v9608_v3 }
 0xe94   :  { %8994 = vmatpush3.bf16.msra.mxu0 %v9924_v32 }
 0xe95   :  { %9001 = vmatprep.subr.bf16.mxu0 %v9608_v3 }
 0xee8   :  { %v2598_v36 = vpop.f32.mrb[26].mxu1 }
 0xee9   :  { %v2602_v41 = vadd.f32 %v2598_v36, %v2526_v37  ;;  %v8215_v42 = vpop.f32.mrb[27].mxu1 }
 0xeea   :  { %v2643_v42 = vld [vmem:[#allocation2 + $0xc] sm:$0x3] }
 0xeeb   :  { %9408 = vtanh.f32 %v2602_v41  ;;  %v7415_v46 = vmul.f32 -1.442695, %v2602_v41 }
 0xeed   :  { %9410 = vpow2.f32 %v7415_v46 }
 0xef5   :  { %v9409_v43 = vpop.eup %9408 }
 0xef6   :  { %2612 = vrot.lane.b32.xlu0 %v9409_v43, %s9612_s24 }
 0xef7   :  { %v9411_v48 = vpop.eup %9410 }
 0xef8   :  { %v2606_v49 = vadd.f32 1.0, %v9411_v48 }
 0xefa   :  { %9412 = vrcp.f32 %v2606_v49 }
 0xf04   :  { %v9413_v58 = vpop.eup %9412 }
 0xf05   :  { %v2610_v4 = vmul.f32 %v9413_v58, %v10291_v1 }
 0xf62   :  { %v2495_v52 = vpop.f32.mrb[26].mxu0 }
 0xf63   :  { %v2499_v53 = vadd.f32 %v2495_v52, %v2423_v51  ;;  %v8204_v55 = vpop.f32.mrb[27].mxu0 }
 0xf65   :  { %9414 = vtanh.f32 %v2499_v53  ;;  %v7413_v62 = vmul.f32 -1.442695, %v2499_v53 }
 0xf67   :  { %9416 = vpow2.f32 %v7413_v62 }
 0xf68   :  { %v2613_v59 = vpop.permute.xlu0 %2612 }
 0xf69   :  { %v2615_v60 = vmul.f32 %v9413_v58, %v2613_v59 }
 0xf6b   :  { %2617 = vrot.lane.b32.xlu1 %v2615_v60, %s9613_s2 }
 0xf6f   :  { %v9415_v61 = vpop.eup %9414 }
 0xf70   :  { %2509 = vrot.lane.b32.xlu0 %v9415_v61, %s9612_s24 }
 0xf71   :  { %v9417_v63 = vpop.eup %9416 }
 0xf72   :  { %v2503_v0 = vadd.f32 1.0, %v9417_v63 }
 0xf74   :  { %9418 = vrcp.f32 %v2503_v0 }
 0xf7e   :  { %v9419_v8 = vpop.eup %9418 }
 0xf7f   :  { %v2507_v10 = vmul.f32 %v9419_v8, %v10303_v7 }
 0xfdd   :  { %v2618_v5 = vpop.permute.xlu1 %2617 }
 0xfde   :  { %v10294_v6 = vadd.f32 %v2618_v5, %v2610_v4 }
 0xfe0   :  { %9420 = vtanh.f32 %v10294_v6  ;;  %v10351_v59 = vsel %vm1846_vm14, %v10294_v6, %v10291_v1 }
 0xfe2   :  { %v2510_v9 = vpop.permute.xlu0 %2509 }
 0xfe3   :  { %v2512_v12 = vmul.f32 %v9419_v8, %v2510_v9 }
 0xfe5   :  { %2514 = vrot.lane.b32.xlu0 %v2512_v12, %s9613_s2 }
 0xfea   :  { %v9421_v14 = vpop.eup %9420 }
 0xfeb   :  { %2623 = vrot.lane.b32.xlu1 %v9421_v14, %s9612_s24 }
0x1057   :  { %v2515_v15 = vpop.permute.xlu0 %2514 }
0x1058   :  { %v10306_v17 = vadd.f32 %v2515_v15, %v2507_v10 }
0x105a   :  { %9422 = vtanh.f32 %v10306_v17  ;;  %v10363_v1 = vsel %vm1954_vm13, %v10306_v17, %v10303_v7  ;;  %v3078_v7 = vld [vmem:[%s11298_s8] sm:$0xff]  ;;  %v3079_v17 = vld [vmem:[%s11298_s8 + $0x8] sm:$0xff] }
0x105d   :  { %v2624_v16 = vpop.permute.xlu1 %2623 }
0x105e   :  { %v10309_v18 = vmul.f32 %v9413_v58, %v2624_v16  ;;  %v10383_v16 = vpack.c.bf16 %v3079_v17, %v3078_v7 }
0x1060   :  { %v10315_v21 = vsel %vm1846_vm14, %v10309_v18, %v10255_v24 }
0x1061   :  { %2748 = vrot.lane.b32.xlu1 %v10315_v21, %s9613_s2 }
0x1064   :  { %v9423_v13 = vpop.eup %9422 }
0x1065   :  { %2520 = vrot.lane.b32.xlu0 %v9423_v13, %s9612_s24  ;;  %v3080_v13 = vld [vmem:[%s11298_s8 + $0x10] sm:$0xff] }
0x10d3   :  { %v2749_v20 = vpop.permute.xlu1 %2748 }
0x10d4   :  { %8236 = vmatmul.mubr.msk.f32.vlgmr.msra.gmra.mrb[28].mxu1 %vm87_vm1, %v2749_v20 }
0x10d5   :  { %9009 = vmatpush3.bf16.msra.mxu1 %v9906_v27  ;;  %8257 = vmatprep.mubr.msk.f32.mxu1 %vm9609_vm0, %v9610_v11 }
0x10d6   :  { %9010 = vmatprep.subr.bf16.mxu1 %v9608_v3 }
0x10d7   :  { %v2521_v22 = vpop.permute.xlu0 %2520 }
0x10d8   :  { %v10325_v25 = vmul.f32 %v9419_v8, %v2521_v22 }
0x10d9   :  { %9012 = vmatpush3.bf16.msra.mxu1 %v9928_v33  ;;  %v2746_v33 = vld [vmem:[#allocation3 + $0x2] sm:$0x3] }
0x10da   :  { %v10332_v24 = vsel %vm1954_vm13, %v10325_v25, %v10272_v29  ;;  %9019 = vmatprep.subr.bf16.mxu1 %v9608_v3 }
0x10db   :  { %2645 = vrot.lane.b32.xlu1 %v10332_v24, %s9613_s2 }
0x114d   :  { %v2646_v27 = vpop.permute.xlu1 %2645 }
0x114e   :  { %8225 = vmatmul.mubr.msk.f32.vlgmr.msra.gmra.mrb[28].mxu0 %vm87_vm1, %v2646_v27  ;;  %v3087_v27 = vld [vmem:[%s11302_s12] sm:$0xff] }
0x114f   :  { %9003 = vmatpush3.bf16.msra.mxu0 %v9902_v26  ;;  %8246 = vmatprep.mubr.msk.f32.mxu0 %vm9609_vm0, %v9610_v11 }
0x1150   :  { %9004 = vmatprep.subr.bf16.mxu0 %v9608_v3 }
0x1153   :  { %9006 = vmatpush3.bf16.msra.mxu0 %v9924_v32 }
0x1154   :  { %9013 = vmatprep.subr.bf16.mxu0 %v9608_v3 }
0x11a7   :  { %v2818_v38 = vpop.f32.mrb[28].mxu1 }
0x11a8   :  { %v2822_v29 = vadd.f32 %v2818_v38, %v2746_v33  ;;  %v8237_v31 = vpop.f32.mrb[29].mxu1  ;;  %v3088_v33 = vld [vmem:[%s11302_s12 + $0x8] sm:$0xff] }
0x11a9   :  { %v10407_v31 = vpack.c.bf16 %v3088_v33, %v3087_v27 }
0x11aa   :  { %9424 = vtanh.f32 %v2822_v29  ;;  %v7419_v36 = vmul.f32 -1.442695, %v2822_v29 }
0x11ac   :  { %9426 = vpow2.f32 %v7419_v36  ;;  %v3089_v36 = vld [vmem:[%s11302_s12 + $0x10] sm:$0xff] }
0x11b4   :  { %v9425_v37 = vpop.eup %9424 }
0x11b5   :  { %2832 = vrot.lane.b32.xlu0 %v9425_v37, %s9612_s24 }
0x11b6   :  { %v9427_v26 = vpop.eup %9426 }
0x11b7   :  { %v2826_v41 = vadd.f32 1.0, %v9427_v26  ;;  %v3090_v26 = vld [vmem:[%s11302_s12 + $0x18] sm:$0xff] }
0x11b9   :  { %9428 = vrcp.f32 %v2826_v41  ;;  %v3096_v41 = vld [vmem:[#allocation4] sm:$0x3] }
0x11c3   :  { %v9429_v32 = vpop.eup %9428 }
0x11c4   :  { %v2830_v60 = vmul.f32 %v9429_v32, %v10351_v59 }
0x1221   :  { %v2715_v43 = vpop.f32.mrb[28].mxu0 }
0x1222   :  { %v2719_v46 = vadd.f32 %v2715_v43, %v2643_v42  ;;  %v8226_v48 = vpop.f32.mrb[29].mxu0  ;;  %v10423_v42 = vpack.c.bf16 %v3090_v26, %v3089_v36  ;;  %v2964_v43 = vld [vmem:[#allocation3] sm:$0x3]  ;;  %v1725_v36 = vsel %vm1617_vm10, %v10064_v56, 0.0  ;;  %v3082_v56 = vld [vmem:[%s11299_s9] sm:$0xff] }
0x1224   :  { %9430 = vtanh.f32 %v2719_v46  ;;  %v7417_v53 = vmul.f32 -1.442695, %v2719_v46 }
0x1226   :  { %9432 = vpow2.f32 %v7417_v53 }
0x1227   :  { %v2833_v49 = vpop.permute.xlu0 %2832 }
0x1228   :  { %v2835_v51 = vmul.f32 %v9429_v32, %v2833_v49 }
0x122a   :  { %2837 = vrot.lane.b32.xlu1 %v2835_v51, %s9613_s2 }
0x122e   :  { %v9431_v52 = vpop.eup %9430 }
0x122f   :  { %2729 = vrot.lane.b32.xlu0 %v9431_v52, %s9612_s24 }
0x1230   :  { %v9433_v55 = vpop.eup %9432 }
0x1231   :  { %v2723_v58 = vadd.f32 1.0, %v9433_v55 }
0x1233   :  { %9434 = vrcp.f32 %v2723_v58 }
0x123d   :  { %v9435_v63 = vpop.eup %9434 }
0x123e   :  { %v2727_v6 = vmul.f32 %v9435_v63, %v10363_v1 }
0x129c   :  { %v2838_v61 = vpop.permute.xlu1 %2837 }
0x129d   :  { %v10354_v62 = vadd.f32 %v2838_v61, %v2830_v60 }
0x129f   :  { %9436 = vtanh.f32 %v10354_v62 }
0x12a1   :  { %v2730_v0 = vpop.permute.xlu0 %2729 }
0x12a2   :  { %v2732_v4 = vmul.f32 %v9435_v63, %v2730_v0 }
0x12a4   :  { %2734 = vrot.lane.b32.xlu0 %v2732_v4, %s9613_s2 }
0x12a9   :  { %v9437_v5 = vpop.eup %9436 }
0x12aa   :  { %2843 = vrot.lane.b32.xlu1 %v9437_v5, %s9612_s24 }
0x1316   :  { %v2735_v8 = vpop.permute.xlu0 %2734 }
0x1317   :  { %v10366_v9 = vadd.f32 %v2735_v8, %v2727_v6 }
0x1319   :  { %9438 = vtanh.f32 %v10366_v9 }
0x131c   :  { %v2844_v12 = vpop.permute.xlu1 %2843 }
0x131d   :  { %v10369_v14 = vmul.f32 %v9429_v32, %v2844_v12 }
0x131f   :  { %v2847_v10 = vsel %vm1617_vm10, %v10369_v14, %v10315_v21  ;;  %v3081_v21 = vld [vmem:[%s11298_s8 + $0x18] sm:$0xff] }
0x1320   :  { %2966 = vrot.lane.b32.xlu1 %v2847_v10, %s9613_s2  ;;  %v10393_v22 = vpack.c.bf16 %v3081_v21, %v3080_v13  ;;  %v2848_v13 = vsel %vm1617_vm10, %v10354_v62, %v10351_v59  ;;  %v1957_v59 = vsel %vm1846_vm14, %v10134_v47, 0.0  ;;  %v2189_v62 = vsel %vm2078_vm7, %v10204_v39, 0.0 }
0x1321   :  { %v2745_v47 = vsel %vm1722_vm9, %v10366_v9, %v10363_v1 }
0x1323   :  { %v9439_v15 = vpop.eup %9438 }
0x1324   :  { %2740 = vrot.lane.b32.xlu0 %v9439_v15, %s9612_s24 }
0x1392   :  { %v2967_v20 = vpop.permute.xlu1 %2966 }
0x1393   :  { %8258 = vmatmul.mubr.msk.f32.vlgmr.msra.gmra.mrb[30].mxu1 %vm87_vm1, %v2967_v20 }
0x1394   :  { %9021 = vmatpush3.bf16.msra.mxu1 %v10383_v16  ;;  %8279 = vmatprep.mubr.msk.f32.mxu1 %vm9609_vm0, %v9610_v11 }
0x1395   :  { %9022 = vmatprep.subr.bf16.mxu1 %v9608_v3 }
0x1396   :  { %v2741_v38 = vpop.permute.xlu0 %2740 }
0x1397   :  { %v10404_v29 = vmul.f32 %v9435_v63, %v2741_v38  ;;  %v2863_v63 = vld [vmem:[#allocation2 + $0xe] sm:$0x3] }
0x1398   :  { %9024 = vmatpush3.bf16.msra.mxu1 %v10393_v22 }
0x1399   :  { %v2744_v37 = vsel %vm1722_vm9, %v10404_v29, %v10332_v24  ;;  %9031 = vmatprep.subr.bf16.mxu1 %v9608_v3 }
0x139a   :  { %2865 = vrot.lane.b32.xlu1 %v2744_v37, %s9613_s2 }
0x139b   :  { %8280 = vmatmul.mubr.msk.f32.vlgmr.msra.gmra.mrb[32].mxu1 %vm87_vm1, %v3096_v41 }
0x139c   :  { %9033 = vmatpush3.bf16.msra.mxu1 %v10407_v31  ;;  %8301 = vmatprep.mubr.msk.f32.mxu1 %vm9609_vm0, %v9610_v11 }
0x139d   :  { %9034 = vmatprep.subr.bf16.mxu1 %v9608_v3 }
0x13a0   :  { %9036 = vmatpush3.bf16.msra.mxu1 %v10423_v42 }
0x13a1   :  { %9043 = vmatprep.subr.bf16.mxu1 %v9608_v3 }
0x13a3   :  { %8302 = vmatmul.mubr.msk.f32.vlgmr.msra.gmra.mrb[34].mxu1 %vm87_vm1, %v3096_v41  ;;  %v3083_v41 = vld [vmem:[%s11299_s9 + $0x8] sm:$0xff] }
0x13a4   :  { %9045 = vmatpush3.bf16.msra.mxu1 %v10383_v16  ;;  %8323 = vmatprep.mubr.msk.f32.mxu1 %vm9609_vm0, %v9610_v11 }
0x13a5   :  { %9046 = vmatprep.subr.bf16.mxu1 %v9608_v3 }
0x13a8   :  { %9048 = vmatpush3.bf16.msra.mxu1 %v10393_v22 }
0x13a9   :  { %9055 = vmatprep.subr.bf16.mxu1 %v9608_v3 }
0x140c   :  { %v2866_v24 = vpop.permute.xlu1 %2865 }
0x140d   :  { %8247 = vmatmul.mubr.msk.f32.vlgmr.msra.gmra.mrb[30].mxu0 %vm87_vm1, %v2866_v24  ;;  %v10474_v24 = vpack.c.bf16 %v3083_v41, %v3082_v56 }
0x140e   :  { %8268 = vmatprep.mubr.msk.f32.mxu0 %vm9609_vm0, %v9610_v11 }
0x140f   :  { %9015 = vmatpush3.bf16.msra.mxu0 %v10474_v24 }
0x1410   :  { %9016 = vmatprep.subr.bf16.mxu0 %v9608_v3 }
0x1466   :  { %v3036_v46 = vpop.f32.mrb[30].mxu1 }
0x1467   :  { %v3040_v48 = vadd.f32 %v3036_v46, %v2964_v43  ;;  %v8259_v32 = vpop.f32.mrb[31].mxu1  ;;  %v3084_v43 = vld [vmem:[%s11299_s9 + $0x10] sm:$0xff]  ;;  %v3085_v46 = vld [vmem:[%s11299_s9 + $0x18] sm:$0xff] }
0x1468   :  { %v10489_v32 = vpack.c.bf16 %v3085_v46, %v3084_v43 }
0x1469   :  { %9440 = vtanh.f32 %v3040_v48  ;;  %v7423_v58 = vmul.f32 -1.442695, %v3040_v48 }
0x146a   :  { %9018 = vmatpush3.bf16.msra.mxu0 %v10489_v32 }
0x146b   :  { %9442 = vpow2.f32 %v7423_v58  ;;  %9025 = vmatprep.subr.bf16.mxu0 %v9608_v3 }
0x146e   :  { %v10440_v49 = vpop.f32.mrb[32].mxu1 }
0x146f   :  { %v8281_v51 = vpop.f32.mrb[33].mxu1 }
0x1473   :  { %v9441_v52 = vpop.eup %9440 }
0x1474   :  { %3050 = vrot.lane.b32.xlu0 %v9441_v52, %s9612_s24 }
0x1475   :  { %v9443_v60 = vpop.eup %9442 }
0x1476   :  { %v10443_v53 = vpop.f32.mrb[34].mxu1  ;;  %v3044_v61 = vadd.f32 1.0, %v9443_v60 }
0x1477   :  { %v8303_v55 = vpop.f32.mrb[35].mxu1 }
0x1478   :  { %9444 = vrcp.f32 %v3044_v61 }
0x1482   :  { %v9445_v6 = vpop.eup %9444 }
0x1483   :  { %v3048_v21 = vmul.f32 %v9445_v6, %v2848_v13  ;;  %v3093_v13 = vld [vmem:[%s11303_s13 + $0x10] sm:$0xff] }
0x14e0   :  { %v2935_v0 = vpop.f32.mrb[30].mxu0 }
0x14e1   :  { %v2939_v4 = vadd.f32 %v2935_v0, %v2863_v63  ;;  %v8248_v5 = vpop.f32.mrb[31].mxu0  ;;  %v2856_v0 = vsel %vm1617_vm10, %v10369_v14, 0.0  ;;  %v2629_v14 = vsel %vm1954_vm13, %v10325_v25, 0.0  ;;  %v2196_v25 = vsel %vm2186_vm3, %v10185_v28, 0.0 }
0x14e2   :  { %v2636_v5 = vsel %vm1846_vm14, %v10309_v18, 0.0  ;;  %v2849_v18 = vsel %vm1722_vm9, %v10404_v29, 0.0  ;;  %v1964_v29 = vsel %vm1954_vm13, %v10115_v40, 0.0  ;;  %v1732_v28 = vsel %vm1722_vm9, %v10045_v50, 0.0 }
0x14e3   :  { %9446 = vtanh.f32 %v2939_v4  ;;  %v7421_v15 = vmul.f32 -1.442695, %v2939_v4  ;;  %v2409_v4 = vsel %vm2186_vm3, %v10265_v34, 0.0  ;;  %v2416_v34 = vsel %vm2078_vm7, %v10249_v23, 0.0 }
0x14e5   :  { %9448 = vpow2.f32 %v7421_v15 }
0x14e6   :  { %v3051_v8 = vpop.permute.xlu0 %3050 }
0x14e7   :  { %v3053_v12 = vmul.f32 %v9445_v6, %v3051_v8  ;;  %v3092_v8 = vld [vmem:[%s11303_s13 + $0x8] sm:$0xff] }
0x14e9   :  { %3055 = vrot.lane.b32.xlu1 %v3053_v12, %s9613_s2 }
0x14ed   :  { %v9447_v10 = vpop.eup %9446 }
0x14ee   :  { %2949 = vrot.lane.b32.xlu0 %v9447_v10, %s9612_s24 }
0x14ef   :  { %v9449_v7 = vpop.eup %9448 }
0x14f0   :  { %v2943_v17 = vadd.f32 1.0, %v9449_v7 }
0x14f2   :  { %9450 = vrcp.f32 %v2943_v17 }
0x14fc   :  { %v10451_v33 = vpop.eup %9450 }
0x14fd   :  { %v2947_v39 = vmul.f32 %v10451_v33, %v2745_v47 }
0x155b   :  { %v3056_v20 = vpop.permute.xlu1 %3055 }
0x155c   :  { %v3058_v27 = vadd.f32 %v3056_v20, %v3048_v21  ;;  %v3094_v21 = vld [vmem:[%s11303_s13 + $0x18] sm:$0xff] }
0x155e   :  { %9452 = vtanh.f32 %v3058_v27 }
0x1560   :  { %v2950_v38 = vpop.permute.xlu0 %2949 }
0x1561   :  { %v2952_v37 = vmul.f32 %v10451_v33, %v2950_v38  ;;  %v10602_v38 = vpack.c.bf16 %v3094_v21, %v3093_v13  ;;  %v10845_v21 = vld [vmem:[%s11304_s14] ss:$0 sm:$0xff] }
0x1563   :  { %2954 = vrot.lane.b32.xlu0 %v2952_v37, %s9613_s2 }
0x1567   :  { %1727 = vrot.lane.b32.xlu0 %v1725_v36, %s9613_s2 }
0x1568   :  { %v9453_v26 = vpop.eup %9452 }
0x1569   :  { %3061 = vrot.lane.b32.xlu1 %v9453_v26, %s9612_s24 }
0x156b   :  { %1959 = vrot.lane.b32.xlu0 %v1957_v59, %s9613_s2 }
0x156f   :  { %2191 = vrot.lane.b32.xlu0 %v2189_v62, %s9613_s2 }
0x15d5   :  { %v2955_v48 = vpop.permute.xlu0 %2954 }
0x15d6   :  { %v2957_v51 = vadd.f32 %v2955_v48, %v2947_v39 }
0x15d8   :  { %9454 = vtanh.f32 %v2957_v51 }
0x15d9   :  { %v1728_v1 = vpop.permute.xlu0 %1727 }
0x15da   :  { %1731 = vst.msk [vmem:[#allocation4 + $0x2] sm:$0x3] %vm1505_vm5, %v1728_v1 }
0x15db   :  { %v3062_v9 = vpop.permute.xlu1 %3061 }
0x15dc   :  { %v3064_v52 = vmul.f32 %v9445_v6, %v3062_v9  ;;  %v3091_v6 = vld [vmem:[%s11303_s13] sm:$0xff] }
0x15dd   :  { %v1960_v55 = vpop.permute.xlu0 %1959  ;;  %v10587_v7 = vpack.c.bf16 %v3092_v8, %v3091_v6  ;;  %v5465_v6 = vld [vmem:[%s11305_s15 + $0x18] sm:$0xff] }
0x15de   :  { %1963 = vst.msk [vmem:[#allocation4 + $0x4] sm:$0x3] %vm1505_vm5, %v1960_v55  ;;  %v3072_v58 = vsel %vm1395_vm6, %v3064_v52, 0.0 }
0x15df   :  { %3074 = vrot.lane.b32.xlu1 %v3072_v58, %s9613_s2 }
0x15e1   :  { %v2192_v60 = vpop.permute.xlu0 %2191  ;;  %v3400_v61 = vld [vmem:[#allocation4 + $0x2] sm:$0x3] }
0x15e2   :  { %v9455_v63 = vpop.eup %9454  ;;  %2195 = vst.msk [vmem:[#allocation4 + $0x6] sm:$0x3] %vm1505_vm5, %v2192_v60  ;;  %8324 = vmatmul.mubr.msk.f32.vlgmr.msra.gmra.mrb[36].mxu1 %vm87_vm1, %v3400_v61 }
0x15e3   :  { %9057 = vmatpush3.bf16.msra.mxu1 %v10407_v31  ;;  %2960 = vrot.lane.b32.xlu0 %v9455_v63, %s9612_s24 }
0x15e4   :  { %2858 = vrot.lane.b32.xlu1 %v2856_v0, %s9613_s2  ;;  %9058 = vmatprep.subr.bf16.mxu1 %v9608_v3 }
0x15e5   :  { %8345 = vmatprep.mubr.msk.f32.mxu1 %vm9609_vm0, %v9610_v11  ;;  %v3694_v23 = vld [vmem:[#allocation4 + $0x4] sm:$0x3] }
0x15e7   :  { %9060 = vmatpush3.bf16.msra.mxu1 %v10423_v42  ;;  %2411 = vrot.lane.b32.xlu0 %v2409_v4, %s9613_s2 }
0x15e8   :  { %2638 = vrot.lane.b32.xlu1 %v2636_v5, %s9613_s2  ;;  %9067 = vmatprep.subr.bf16.mxu1 %v9608_v3 }
0x15e9   :  { %v3988_v40 = vld [vmem:[#allocation4 + $0x6] sm:$0x3] }
0x15ea   :  { %8346 = vmatmul.mubr.msk.f32.vlgmr.msra.gmra.mrb[38].mxu1 %vm87_vm1, %v3400_v61  ;;  %v5165_v61 = vld [vmem:[#allocation5 + $0xe] sm:$0x3] }
0x15eb   :  { %9069 = vmatpush3.bf16.msra.mxu1 %v10383_v16  ;;  %2631 = vrot.lane.b32.xlu0 %v2629_v14, %s9613_s2  ;;  %v5460_v14 = vld [vmem:[%s11301_s11 + $0x10] sm:$0xff] }
0x15ec   :  { %2418 = vrot.lane.b32.xlu1 %v2416_v34, %s9613_s2  ;;  %9070 = vmatprep.subr.bf16.mxu1 %v9608_v3  ;;  %v5461_v34 = vld [vmem:[%s11301_s11 + $0x18] sm:$0xff] }
0x15ed   :  { %8367 = vmatprep.mubr.msk.f32.mxu1 %vm9609_vm0, %v9610_v11 }
0x15ef   :  { %9072 = vmatpush3.bf16.msra.mxu1 %v10393_v22  ;;  %2851 = vrot.lane.b32.xlu0 %v2849_v18, %s9613_s2 }
0x15f0   :  { %2198 = vrot.lane.b32.xlu1 %v2196_v25, %s9613_s2  ;;  %9079 = vmatprep.subr.bf16.mxu1 %v9608_v3  ;;  %v10780_v25 = vpack.c.bf16 %v5461_v34, %v5460_v14 }
0x15f2   :  { %8368 = vmatmul.mubr.msk.f32.vlgmr.msra.gmra.mrb[40].mxu1 %vm87_vm1, %v3694_v23 }
0x15f3   :  { %9081 = vmatpush3.bf16.msra.mxu1 %v10407_v31  ;;  %8389 = vmatprep.mubr.msk.f32.mxu1 %vm9609_vm0, %v9610_v11 }
0x15f4   :  { %1966 = vrot.lane.b32.xlu1 %v1964_v29, %s9613_s2  ;;  %9082 = vmatprep.subr.bf16.mxu1 %v9608_v3 }
0x15f7   :  { %9084 = vmatpush3.bf16.msra.mxu1 %v10423_v42 }
0x15f8   :  { %1734 = vrot.lane.b32.xlu1 %v1732_v28, %s9613_s2  ;;  %9091 = vmatprep.subr.bf16.mxu1 %v9608_v3  ;;  %v5462_v28 = vld [vmem:[%s11305_s15] sm:$0xff] }
0x15fa   :  { %8390 = vmatmul.mubr.msk.f32.vlgmr.msra.gmra.mrb[42].mxu1 %vm87_vm1, %v3694_v23 }
0x15fb   :  { %9093 = vmatpush3.bf16.msra.mxu1 %v10383_v16  ;;  %8411 = vmatprep.mubr.msk.f32.mxu1 %vm9609_vm0, %v9610_v11 }
0x15fc   :  { %9094 = vmatprep.subr.bf16.mxu1 %v9608_v3 }
0x15ff   :  { %9096 = vmatpush3.bf16.msra.mxu1 %v10393_v22 }
0x1600   :  { %9103 = vmatprep.subr.bf16.mxu1 %v9608_v3 }
0x1602   :  { %8412 = vmatmul.mubr.msk.f32.vlgmr.msra.gmra.mrb[44].mxu1 %vm87_vm1, %v3988_v40 }
0x1603   :  { %9105 = vmatpush3.bf16.msra.mxu1 %v10407_v31  ;;  %8433 = vmatprep.mubr.msk.f32.mxu1 %vm9609_vm0, %v9610_v11 }
0x1604   :  { %9106 = vmatprep.subr.bf16.mxu1 %v9608_v3 }
0x1607   :  { %9108 = vmatpush3.bf16.msra.mxu1 %v10423_v42 }
0x1608   :  { %9115 = vmatprep.subr.bf16.mxu1 %v9608_v3 }
0x160a   :  { %8434 = vmatmul.mubr.msk.f32.vlgmr.msra.gmra.mrb[46].mxu1 %vm87_vm1, %v3988_v40  ;;  %v5463_v40 = vld [vmem:[%s11305_s15 + $0x8] sm:$0xff] }
0x160b   :  { %9117 = vmatpush3.bf16.msra.mxu1 %v10383_v16  ;;  %8455 = vmatprep.mubr.msk.f32.mxu1 %vm9609_vm0, %v9610_v11 }
0x160c   :  { %9118 = vmatprep.subr.bf16.mxu1 %v9608_v3 }
0x160f   :  { %9120 = vmatpush3.bf16.msra.mxu1 %v10393_v22 }
0x1610   :  { %9127 = vmatprep.subr.bf16.mxu1 %v9608_v3 }
0x1651   :  { %v3075_v50 = vpop.permute.xlu1 %3074 }
0x1652   :  { %3077 = vst.msk [vmem:[#allocation5] sm:$0x3] %vm1505_vm5, %v3075_v50  ;;  %v5464_v50 = vld [vmem:[%s11305_s15 + $0x10] sm:$0xff] }
0x1653   :  { %v10819_v8 = vpack.c.bf16 %v5465_v6, %v5464_v50 }
0x1655   :  { %v2961_v12 = vpop.permute.xlu0 %2960 }
0x1656   :  { %v2963_v10 = vmul.f32 %v10451_v33, %v2961_v12  ;;  %v2859_v15 = vpop.permute.xlu1 %2858 }
0x1657   :  { %2862 = vst.msk [vmem:[#allocation5 + $0x2] sm:$0x3] %vm1505_vm5, %v2859_v15 }
0x1658   :  { %v3065_v17 = vsel %vm1498_vm4, %v2963_v10, 0.0  ;;  %v10838_v10 = vld [vmem:[%s11300_s10] ss:$0 sm:$0xff] }
0x1659   :  { %v2412_v20 = vpop.permute.xlu0 %2411  ;;  %3067 = vrot.lane.b32.xlu1 %v3065_v17, %s9613_s2  ;;  %v3097_v27 = vld [vmem:[#allocation5] sm:$0x3] }
0x165a   :  { %2415 = vst.msk [vmem:[#allocation4 + $0x8] sm:$0x3] %vm1505_vm5, %v2412_v20  ;;  %v2639_v33 = vpop.permute.xlu1 %2638  ;;  %8269 = vmatmul.mubr.msk.f32.vlgmr.msra.gmra.mrb[32].mxu0 %vm87_vm1, %v3097_v27 }
0x165b   :  { %2642 = vst.msk [vmem:[#allocation5 + $0x4] sm:$0x3] %vm1505_vm5, %v2639_v33  ;;  %9027 = vmatpush3.bf16.msra.mxu0 %v10587_v7  ;;  %8290 = vmatprep.mubr.msk.f32.mxu0 %vm9609_vm0, %v9610_v11 }
0x165c   :  { %9028 = vmatprep.subr.bf16.mxu0 %v9608_v3 }
0x165d   :  { %v2632_v37 = vpop.permute.xlu0 %2631 }
0x165e   :  { %2635 = vst.msk [vmem:[#allocation4 + $0xa] sm:$0x3] %vm1505_vm5, %v2632_v37  ;;  %v2419_v36 = vpop.permute.xlu1 %2418  ;;  %v3401_v41 = vld [vmem:[#allocation5 + $0x2] sm:$0x3] }
0x165f   :  { %2422 = vst.msk [vmem:[#allocation5 + $0x6] sm:$0x3] %vm1505_vm5, %v2419_v36  ;;  %9030 = vmatpush3.bf16.msra.mxu0 %v10602_v38 }
0x1660   :  { %9037 = vmatprep.subr.bf16.mxu0 %v9608_v3 }
0x1661   :  { %v2852_v26 = vpop.permute.xlu0 %2851  ;;  %v4282_v59 = vld [vmem:[#allocation4 + $0x8] sm:$0x3] }
0x1662   :  { %2855 = vst.msk [vmem:[#allocation4 + $0xc] sm:$0x3] %vm1505_vm5, %v2852_v26  ;;  %8291 = vmatmul.mubr.msk.f32.vlgmr.msra.gmra.mrb[34].mxu0 %vm87_vm1, %v3097_v27  ;;  %v2199_v62 = vpop.permute.xlu1 %2198  ;;  %8456 = vmatmul.mubr.msk.f32.vlgmr.msra.gmra.mrb[48].mxu1 %vm87_vm1, %v4282_v59  ;;  %v3695_v43 = vld [vmem:[#allocation5 + $0x4] sm:$0x3] }
0x1663   :  { %2202 = vst.msk [vmem:[#allocation5 + $0x8] sm:$0x3] %vm1505_vm5, %v2199_v62  ;;  %9039 = vmatpush3.bf16.msra.mxu0 %v10474_v24  ;;  %9129 = vmatpush3.bf16.msra.mxu1 %v10407_v31 }
0x1664   :  { %9040 = vmatprep.subr.bf16.mxu0 %v9608_v3  ;;  %9130 = vmatprep.subr.bf16.mxu1 %v9608_v3 }
0x1665   :  { %8312 = vmatprep.mubr.msk.f32.mxu0 %vm9609_vm0, %v9610_v11  ;;  %8477 = vmatprep.mubr.msk.f32.mxu1 %vm9609_vm0, %v9610_v11  ;;  %v4576_v39 = vld [vmem:[#allocation4 + $0xa] sm:$0x3] }
0x1666   :  { %v1967_v56 = vpop.permute.xlu1 %1966  ;;  %v3989_v48 = vld [vmem:[#allocation5 + $0x6] sm:$0x3] }
0x1667   :  { %1970 = vst.msk [vmem:[#allocation5 + $0xa] sm:$0x3] %vm1505_vm5, %v1967_v56  ;;  %9042 = vmatpush3.bf16.msra.mxu0 %v10489_v32  ;;  %9132 = vmatpush3.bf16.msra.mxu1 %v10423_v42 }
0x1668   :  { %9049 = vmatprep.subr.bf16.mxu0 %v9608_v3  ;;  %9139 = vmatprep.subr.bf16.mxu1 %v9608_v3 }
0x1669   :  { %v4870_v46 = vld [vmem:[#allocation4 + $0xc] sm:$0x3] }
0x166a   :  { %8313 = vmatmul.mubr.msk.f32.vlgmr.msra.gmra.mrb[36].mxu0 %vm87_vm1, %v3401_v41  ;;  %8478 = vmatmul.mubr.msk.f32.vlgmr.msra.gmra.mrb[50].mxu1 %vm87_vm1, %v4282_v59  ;;  %v1735_v47 = vpop.permute.xlu1 %1734 }
0x166b   :  { %1738 = vst.msk [vmem:[#allocation5 + $0xc] sm:$0x3] %vm1505_vm5, %v1735_v47  ;;  %9051 = vmatpush3.bf16.msra.mxu0 %v10587_v7  ;;  %9141 = vmatpush3.bf16.msra.mxu1 %v10383_v16 }
0x166c   :  { %9052 = vmatprep.subr.bf16.mxu0 %v9608_v3  ;;  %9142 = vmatprep.subr.bf16.mxu1 %v9608_v3 }
0x166d   :  { %8334 = vmatprep.mubr.msk.f32.mxu0 %vm9609_vm0, %v9610_v11  ;;  %8499 = vmatprep.mubr.msk.f32.mxu1 %vm9609_vm0, %v9610_v11 }
0x166f   :  { %9054 = vmatpush3.bf16.msra.mxu0 %v10602_v38  ;;  %9144 = vmatpush3.bf16.msra.mxu1 %v10393_v22 }
0x1670   :  { %9061 = vmatprep.subr.bf16.mxu0 %v9608_v3  ;;  %9151 = vmatprep.subr.bf16.mxu1 %v9608_v3 }
0x1672   :  { %8335 = vmatmul.mubr.msk.f32.vlgmr.msra.gmra.mrb[38].mxu0 %vm87_vm1, %v3401_v41  ;;  %8500 = vmatmul.mubr.msk.f32.vlgmr.msra.gmra.mrb[52].mxu1 %vm87_vm1, %v4576_v39  ;;  %v4871_v9 = vld [vmem:[#allocation5 + $0xc] sm:$0x3] }
0x1673   :  { %9063 = vmatpush3.bf16.msra.mxu0 %v10474_v24  ;;  %9153 = vmatpush3.bf16.msra.mxu1 %v10407_v31 }
0x1674   :  { %9064 = vmatprep.subr.bf16.mxu0 %v9608_v3  ;;  %9154 = vmatprep.subr.bf16.mxu1 %v9608_v3 }
0x1675   :  { %8356 = vmatprep.mubr.msk.f32.mxu0 %vm9609_vm0, %v9610_v11  ;;  %8521 = vmatprep.mubr.msk.f32.mxu1 %vm9609_vm0, %v9610_v11 }
0x1677   :  { %9066 = vmatpush3.bf16.msra.mxu0 %v10489_v32  ;;  %9156 = vmatpush3.bf16.msra.mxu1 %v10423_v42 }
0x1678   :  { %9073 = vmatprep.subr.bf16.mxu0 %v9608_v3  ;;  %9163 = vmatprep.subr.bf16.mxu1 %v9608_v3 }
0x167a   :  { %8357 = vmatmul.mubr.msk.f32.vlgmr.msra.gmra.mrb[40].mxu0 %vm87_vm1, %v3695_v43  ;;  %8522 = vmatmul.mubr.msk.f32.vlgmr.msra.gmra.mrb[54].mxu1 %vm87_vm1, %v4576_v39 }
0x167b   :  { %9075 = vmatpush3.bf16.msra.mxu0 %v10587_v7  ;;  %9165 = vmatpush3.bf16.msra.mxu1 %v10383_v16 }
0x167c   :  { %9076 = vmatprep.subr.bf16.mxu0 %v9608_v3  ;;  %9166 = vmatprep.subr.bf16.mxu1 %v9608_v3 }
0x167d   :  { %8378 = vmatprep.mubr.msk.f32.mxu0 %vm9609_vm0, %v9610_v11  ;;  %8543 = vmatprep.mubr.msk.f32.mxu1 %vm9609_vm0, %v9610_v11 }
0x167f   :  { %9078 = vmatpush3.bf16.msra.mxu0 %v10602_v38  ;;  %9168 = vmatpush3.bf16.msra.mxu1 %v10393_v22 }
0x1680   :  { %9085 = vmatprep.subr.bf16.mxu0 %v9608_v3  ;;  %9175 = vmatprep.subr.bf16.mxu1 %v9608_v3 }
0x1682   :  { %8379 = vmatmul.mubr.msk.f32.vlgmr.msra.gmra.mrb[42].mxu0 %vm87_vm1, %v3695_v43  ;;  %8544 = vmatmul.mubr.msk.f32.vlgmr.msra.gmra.mrb[56].mxu1 %vm87_vm1, %v4870_v46 }
0x1683   :  { %9087 = vmatpush3.bf16.msra.mxu0 %v10474_v24  ;;  %9177 = vmatpush3.bf16.msra.mxu1 %v10407_v31 }
0x1684   :  { %9088 = vmatprep.subr.bf16.mxu0 %v9608_v3  ;;  %9178 = vmatprep.subr.bf16.mxu1 %v9608_v3 }
0x1685   :  { %8400 = vmatprep.mubr.msk.f32.mxu0 %vm9609_vm0, %v9610_v11  ;;  %8565 = vmatprep.mubr.msk.f32.mxu1 %vm9609_vm0, %v9610_v11 }
0x1687   :  { %9090 = vmatpush3.bf16.msra.mxu0 %v10489_v32  ;;  %9180 = vmatpush3.bf16.msra.mxu1 %v10423_v42 }
0x1688   :  { %9097 = vmatprep.subr.bf16.mxu0 %v9608_v3  ;;  %9187 = vmatprep.subr.bf16.mxu1 %v9608_v3 }
0x168a   :  { %8401 = vmatmul.mubr.msk.f32.vlgmr.msra.gmra.mrb[44].mxu0 %vm87_vm1, %v3989_v48  ;;  %8566 = vmatmul.mubr.msk.f32.vlgmr.msra.gmra.mrb[58].mxu1 %vm87_vm1, %v4870_v46 }
0x168b   :  { %9099 = vmatpush3.bf16.msra.mxu0 %v10587_v7  ;;  %8422 = vmatprep.mubr.msk.f32.mxu0 %vm9609_vm0, %v9610_v11 }
0x168c   :  { %9100 = vmatprep.subr.bf16.mxu0 %v9608_v3  ;;  %9189 = vmatpush3.bf16.msra.mxu1 %v10383_v16  ;;  %v4283_v16 = vld [vmem:[#allocation5 + $0x8] sm:$0x3] }
0x168d   :  { %9190 = vmatprep.subr.bf16.mxu1 %v9608_v3  ;;  %8587 = vmatprep.mubr.msk.f32.mxu1 %vm9609_vm0, %v9610_v11 }
0x168f   :  { %9102 = vmatpush3.bf16.msra.mxu0 %v10602_v38 }
0x1690   :  { %9109 = vmatprep.subr.bf16.mxu0 %v9608_v3  ;;  %9192 = vmatpush3.bf16.msra.mxu1 %v10393_v22  ;;  %v4577_v22 = vld [vmem:[#allocation5 + $0xa] sm:$0x3] }
0x1691   :  { %9199 = vmatprep.subr.bf16.mxu1 %v9608_v3 }
0x1692   :  { %8423 = vmatmul.mubr.msk.f32.vlgmr.msra.gmra.mrb[46].mxu0 %vm87_vm1, %v3989_v48 }
0x1693   :  { %9111 = vmatpush3.bf16.msra.mxu0 %v10474_v24  ;;  %8444 = vmatprep.mubr.msk.f32.mxu0 %vm9609_vm0, %v9610_v11 }
0x1694   :  { %9112 = vmatprep.subr.bf16.mxu0 %v9608_v3 }
0x1697   :  { %9114 = vmatpush3.bf16.msra.mxu0 %v10489_v32 }
0x1698   :  { %9121 = vmatprep.subr.bf16.mxu0 %v9608_v3 }
0x169a   :  { %8445 = vmatmul.mubr.msk.f32.vlgmr.msra.gmra.mrb[48].mxu0 %vm87_vm1, %v4283_v16 }
0x169b   :  { %9123 = vmatpush3.bf16.msra.mxu0 %v10587_v7  ;;  %8466 = vmatprep.mubr.msk.f32.mxu0 %vm9609_vm0, %v9610_v11 }
0x169c   :  { %9124 = vmatprep.subr.bf16.mxu0 %v9608_v3 }
0x169f   :  { %9126 = vmatpush3.bf16.msra.mxu0 %v10602_v38 }
0x16a0   :  { %9133 = vmatprep.subr.bf16.mxu0 %v9608_v3 }
0x16a2   :  { %8467 = vmatmul.mubr.msk.f32.vlgmr.msra.gmra.mrb[50].mxu0 %vm87_vm1, %v4283_v16 }
0x16a3   :  { %9135 = vmatpush3.bf16.msra.mxu0 %v10474_v24  ;;  %8488 = vmatprep.mubr.msk.f32.mxu0 %vm9609_vm0, %v9610_v11 }
0x16a4   :  { %9136 = vmatprep.subr.bf16.mxu0 %v9608_v3 }
0x16a7   :  { %9138 = vmatpush3.bf16.msra.mxu0 %v10489_v32 }
0x16a8   :  { %9145 = vmatprep.subr.bf16.mxu0 %v9608_v3 }
0x16aa   :  { %8489 = vmatmul.mubr.msk.f32.vlgmr.msra.gmra.mrb[52].mxu0 %vm87_vm1, %v4577_v22 }
0x16ab   :  { %9147 = vmatpush3.bf16.msra.mxu0 %v10587_v7  ;;  %8510 = vmatprep.mubr.msk.f32.mxu0 %vm9609_vm0, %v9610_v11 }
0x16ac   :  { %9148 = vmatprep.subr.bf16.mxu0 %v9608_v3 }
0x16af   :  { %9150 = vmatpush3.bf16.msra.mxu0 %v10602_v38 }
0x16b0   :  { %9157 = vmatprep.subr.bf16.mxu0 %v9608_v3 }
0x16b2   :  { %8511 = vmatmul.mubr.msk.f32.vlgmr.msra.gmra.mrb[54].mxu0 %vm87_vm1, %v4577_v22 }
0x16b3   :  { %9159 = vmatpush3.bf16.msra.mxu0 %v10474_v24  ;;  %8532 = vmatprep.mubr.msk.f32.mxu0 %vm9609_vm0, %v9610_v11 }
0x16b4   :  { %9160 = vmatprep.subr.bf16.mxu0 %v9608_v3 }
0x16b5   :  { %v10732_v51 = vpop.f32.mrb[36].mxu1 }
0x16b6   :  { %v8325_v1 = vpop.f32.mrb[37].mxu1 }
0x16b7   :  { %9162 = vmatpush3.bf16.msra.mxu0 %v10489_v32 }
0x16b8   :  { %9169 = vmatprep.subr.bf16.mxu0 %v9608_v3 }
0x16ba   :  { %8533 = vmatmul.mubr.msk.f32.vlgmr.msra.gmra.mrb[56].mxu0 %vm87_vm1, %v4871_v9 }
0x16bb   :  { %9171 = vmatpush3.bf16.msra.mxu0 %v10587_v7  ;;  %8554 = vmatprep.mubr.msk.f32.mxu0 %vm9609_vm0, %v9610_v11 }
0x16bc   :  { %9172 = vmatprep.subr.bf16.mxu0 %v9608_v3 }
0x16bd   :  { %v10741_v52 = vpop.f32.mrb[38].mxu1 }
0x16be   :  { %v8347_v55 = vpop.f32.mrb[39].mxu1 }
0x16bf   :  { %9174 = vmatpush3.bf16.msra.mxu0 %v10602_v38 }
0x16c0   :  { %9181 = vmatprep.subr.bf16.mxu0 %v9608_v3 }
0x16c2   :  { %8555 = vmatmul.mubr.msk.f32.vlgmr.msra.gmra.mrb[58].mxu0 %vm87_vm1, %v4871_v9 }
0x16c3   :  { %9183 = vmatpush3.bf16.msra.mxu0 %v10474_v24  ;;  %8576 = vmatprep.mubr.msk.f32.mxu0 %vm9609_vm0, %v9610_v11  ;;  %v5458_v24 = vld [vmem:[%s11301_s11] sm:$0xff] }
0x16c4   :  { %9184 = vmatprep.subr.bf16.mxu0 %v9608_v3 }
0x16c5   :  { %v10750_v58 = vpop.f32.mrb[40].mxu1 }
0x16c6   :  { %v8369_v60 = vpop.f32.mrb[41].mxu1 }
0x16c7   :  { %9186 = vmatpush3.bf16.msra.mxu0 %v10489_v32  ;;  %v5459_v32 = vld [vmem:[%s11301_s11 + $0x8] sm:$0xff] }
0x16c8   :  { %9193 = vmatprep.subr.bf16.mxu0 %v9608_v3  ;;  %v10769_v5 = vpack.c.bf16 %v5459_v32, %v5458_v24 }
0x16ca   :  { %8577 = vmatmul.mubr.msk.f32.vlgmr.msra.gmra.mrb[60].mxu0 %vm87_vm1, %v5165_v61 }
0x16cb   :  { %9195 = vmatpush3.bf16.msra.mxu0 %v10587_v7  ;;  %v3068_v63 = vpop.permute.xlu1 %3067  ;;  %8598 = vmatprep.mubr.msk.f32.mxu0 %vm9609_vm0, %v9610_v11 }
0x16cc   :  { %3071 = vst.msk [vmem:[#allocation4 + $0xe] sm:$0x3] %vm1505_vm5, %v3068_v63  ;;  %9196 = vmatprep.subr.bf16.mxu0 %v9608_v3 }
0x16cd   :  { %v10766_v0 = vpop.f32.mrb[42].mxu1 }
0x16ce   :  { %v8391_v4 = vpop.f32.mrb[43].mxu1 }
0x16cf   :  { %9198 = vmatpush3.bf16.msra.mxu0 %v10602_v38 }
0x16d0   :  { %9205 = vmatprep.subr.bf16.mxu0 %v9608_v3 }
0x16d2   :  { %8599 = vmatmul.mubr.msk.f32.vlgmr.msra.gmra.mrb[62].mxu0 %vm87_vm1, %v5165_v61 }
0x16d3   :  { %9207 = vmatpush3.bf16.msra.mxu0 %v10769_v5  ;;  %v5164_v18 = vld [vmem:[#allocation4 + $0xe] sm:$0x3]  ;;  %8620 = vmatprep.mubr.msk.f32.mxu0 %vm9609_vm0, %v9610_v11 }
0x16d4   :  { %8588 = vmatmul.mubr.msk.f32.vlgmr.msra.gmra.mrb[60].mxu1 %vm87_vm1, %v5164_v18  ;;  %9208 = vmatprep.subr.bf16.mxu0 %v9608_v3 }
0x16d5   :  { %v10786_v23 = vpop.f32.mrb[44].mxu1  ;;  %9201 = vmatpush3.bf16.msra.mxu1 %v10407_v31  ;;  %8609 = vmatprep.mubr.msk.f32.mxu1 %vm9609_vm0, %v9610_v11  ;;  %v10801_v31 = vpack.c.bf16 %v5463_v40, %v5462_v28 }
0x16d6   :  { %v8413_v29 = vpop.f32.mrb[45].mxu1  ;;  %9202 = vmatprep.subr.bf16.mxu1 %v9608_v3 }
0x16d7   :  { %9210 = vmatpush3.bf16.msra.mxu0 %v10780_v25 }
0x16d8   :  { %9217 = vmatprep.subr.bf16.mxu0 %v9608_v3 }
0x16d9   :  { %9204 = vmatpush3.bf16.msra.mxu1 %v10423_v42 }
0x16da   :  { %8621 = vmatmul.mubr.f32.vlgmr.msra.gmra.mrb[64].mxu0 %v9610_v11  ;;  %9211 = vmatprep.subr.bf16.mxu1 %v9608_v3 }
0x16db   :  { %9219 = vmatpush3.bf16.msra.mxu0 %v10769_v5  ;;  %8642 = vmatprep.mubr.msk.f32.mxu0 %vm9609_vm0, %v9610_v11 }
0x16dc   :  { %8610 = vmatmul.mubr.msk.f32.vlgmr.msra.gmra.mrb[62].mxu1 %vm87_vm1, %v5164_v18  ;;  %9220 = vmatprep.subr.bf16.mxu0 %v9608_v3 }
0x16dd   :  { %v10816_v42 = vpop.f32.mrb[46].mxu1  ;;  %9213 = vmatpush3.bf16.msra.mxu1 %v10801_v31  ;;  %8631 = vmatprep.mubr.msk.f32.mxu1 %vm9609_vm0, %v9610_v11 }
0x16de   :  { %v8435_v12 = vpop.f32.mrb[47].mxu1  ;;  %9214 = vmatprep.subr.bf16.mxu1 %v9608_v3 }
0x16df   :  { %9222 = vmatpush3.bf16.msra.mxu0 %v10780_v25 }
0x16e0   :  { %9229 = vmatprep.subr.bf16.mxu0 %v9608_v3 }
0x16e1   :  { %9216 = vmatpush3.bf16.msra.mxu1 %v10819_v8 }
0x16e2   :  { %9223 = vmatprep.subr.bf16.mxu1 %v9608_v3 }
0x16e4   :  { %8632 = vmatmul.mubr.f32.vlgmr.msra.gmra.mrb[64].mxu1 %v9610_v11 }
0x16e5   :  { %9225 = vmatpush3.bf16.msra.mxu1 %v10801_v31  ;;  %8653 = vmatprep.mubr.msk.f32.mxu1 %vm9609_vm0, %v9610_v11 }
0x16e6   :  { %9226 = vmatprep.subr.bf16.mxu1 %v9608_v3 }
0x16e9   :  { %9228 = vmatpush3.bf16.msra.mxu1 %v10819_v8 }
0x16ea   :  { %9235 = vmatprep.subr.bf16.mxu1 %v9608_v3 }
0x172d   :  { %v3167_v15 = vpop.f32.mrb[32].mxu0 }
0x172e   :  { %v3241_v7 = vadd.f32 %v10440_v49, %v3167_v15  ;;  %v8270_v17 = vpop.f32.mrb[33].mxu0 }
0x1730   :  { %v3250_v13 = vadd.f32 %v10838_v10, %v3241_v7 }
0x1732   :  { %3251 = vst [vmem:[#allocation6] sm:$0x3] %v3250_v13 }
0x1735   :  { %v3318_v20 = vpop.f32.mrb[34].mxu0  ;;  %v4426_v27 = vpop.f32.mrb[48].mxu1 }
0x1736   :  { %v3389_v33 = vadd.f32 %v10443_v53, %v3318_v20  ;;  %v8292_v38 = vpop.f32.mrb[35].mxu0  ;;  %v8457_v37 = vpop.f32.mrb[49].mxu1 }
0x1738   :  { %v3398_v36 = vadd.f32 %v10845_v21, %v3389_v33 }
0x173a   :  { %3399 = vst [vmem:[#allocation7] sm:$0x3] %v3398_v36 }
0x173d   :  { %v3471_v26 = vpop.f32.mrb[36].mxu0  ;;  %v4569_v49 = vpop.f32.mrb[50].mxu1 }
0x173e   :  { %v3545_v59 = vadd.f32 %v10732_v51, %v3471_v26  ;;  %v8314_v62 = vpop.f32.mrb[37].mxu0  ;;  %v8479_v56 = vpop.f32.mrb[51].mxu1 }
0x1740   :  { %v3548_v41 = vadd.f32 %v10838_v10, %v3545_v59 }
0x1742   :  { %3550 = vst [vmem:[#allocation6 + $0x2] sm:$0x3] %v3548_v41 }
0x1745   :  { %v3617_v47 = vpop.f32.mrb[38].mxu0  ;;  %v4720_v39 = vpop.f32.mrb[52].mxu1 }
0x1746   :  { %v3688_v43 = vadd.f32 %v10741_v52, %v3617_v47  ;;  %v8336_v46 = vpop.f32.mrb[39].mxu0  ;;  %v8501_v53 = vpop.f32.mrb[53].mxu1 }
0x1748   :  { %v3691_v48 = vadd.f32 %v10845_v21, %v3688_v43 }
0x174a   :  { %3693 = vst [vmem:[#allocation7 + $0x2] sm:$0x3] %v3691_v48 }
0x174d   :  { %v3765_v16 = vpop.f32.mrb[40].mxu0  ;;  %v4863_v22 = vpop.f32.mrb[54].mxu1 }
0x174e   :  { %v3839_v1 = vadd.f32 %v10750_v58, %v3765_v16  ;;  %v8358_v9 = vpop.f32.mrb[41].mxu0  ;;  %v8523_v51 = vpop.f32.mrb[55].mxu1 }
0x1750   :  { %v3842_v55 = vadd.f32 %v10838_v10, %v3839_v1 }
0x1752   :  { %3844 = vst [vmem:[#allocation6 + $0x4] sm:$0x3] %v3842_v55 }
0x1755   :  { %v3911_v60 = vpop.f32.mrb[42].mxu0  ;;  %v5014_v61 = vpop.f32.mrb[56].mxu1 }
0x1756   :  { %v3982_v63 = vadd.f32 %v10766_v0, %v3911_v60  ;;  %v8380_v24 = vpop.f32.mrb[43].mxu0  ;;  %v8545_v52 = vpop.f32.mrb[57].mxu1  ;;  %v5466_v60 = vld [vmem:[#allocation6] sm:$0x3] }
0x1758   :  { %v3985_v32 = vadd.f32 %v10845_v21, %v3982_v63 }
0x175a   :  { %3987 = vst [vmem:[#allocation7 + $0x4] sm:$0x3] %v3985_v32 }
0x175d   :  { %v4059_v4 = vpop.f32.mrb[44].mxu0  ;;  %v5157_v14 = vpop.f32.mrb[58].mxu1 }
0x175e   :  { %v4133_v34 = vadd.f32 %v10786_v23, %v4059_v4  ;;  %v8402_v18 = vpop.f32.mrb[45].mxu0  ;;  %v8567_v58 = vpop.f32.mrb[59].mxu1 }
0x1760   :  { %v4136_v29 = vadd.f32 %v10838_v10, %v4133_v34 }
0x1762   :  { %4138 = vst [vmem:[#allocation6 + $0x6] sm:$0x3] %v4136_v29 }
0x1765   :  { %v4205_v28 = vpop.f32.mrb[46].mxu0 }
0x1766   :  { %v4276_v40 = vadd.f32 %v10816_v42, %v4205_v28  ;;  %v8424_v50 = vpop.f32.mrb[47].mxu0 }
0x1768   :  { %v4279_v0 = vadd.f32 %v10845_v21, %v4276_v40 }
0x176a   :  { %4281 = vst [vmem:[#allocation7 + $0x6] sm:$0x3] %v4279_v0 }
0x176d   :  { %v4353_v6 = vpop.f32.mrb[48].mxu0 }
0x176e   :  { %v4427_v12 = vadd.f32 %v4426_v27, %v4353_v6  ;;  %v8446_v15 = vpop.f32.mrb[49].mxu0 }
0x1770   :  { %v4430_v7 = vadd.f32 %v10838_v10, %v4427_v12 }
0x1772   :  { %4432 = vst [vmem:[#allocation6 + $0x8] sm:$0x3] %v4430_v7 }
0x1775   :  { %v4499_v17 = vpop.f32.mrb[50].mxu0 }
0x1776   :  { %v4570_v23 = vadd.f32 %v4569_v49, %v4499_v17  ;;  %v8468_v13 = vpop.f32.mrb[51].mxu0 }
0x1778   :  { %v4573_v20 = vadd.f32 %v10845_v21, %v4570_v23 }
0x177a   :  { %4575 = vst [vmem:[#allocation7 + $0x8] sm:$0x3] %v4573_v20 }
0x177d   :  { %v4647_v33 = vpop.f32.mrb[52].mxu0 }
0x177e   :  { %v4721_v38 = vadd.f32 %v4720_v39, %v4647_v33  ;;  %v8490_v37 = vpop.f32.mrb[53].mxu0 }
0x1780   :  { %v4724_v42 = vadd.f32 %v10838_v10, %v4721_v38 }
0x1782   :  { %4726 = vst [vmem:[#allocation6 + $0xa] sm:$0x3] %v4724_v42 }
0x1785   :  { %v4793_v36 = vpop.f32.mrb[54].mxu0 }
0x1786   :  { %v4864_v26 = vadd.f32 %v4863_v22, %v4793_v36  ;;  %v8512_v59 = vpop.f32.mrb[55].mxu0 }
0x1788   :  { %v4867_v27 = vadd.f32 %v10845_v21, %v4864_v26 }
0x178a   :  { %4869 = vst [vmem:[#allocation7 + $0xa] sm:$0x3] %v4867_v27 }
0x178d   :  { %v4941_v62 = vpop.f32.mrb[56].mxu0 }
0x178e   :  { %v5015_v56 = vadd.f32 %v5014_v61, %v4941_v62  ;;  %v8534_v41 = vpop.f32.mrb[57].mxu0 }
0x1790   :  { %v5018_v49 = vadd.f32 %v10838_v10, %v5015_v56 }
0x1792   :  { %5020 = vst [vmem:[#allocation6 + $0xc] sm:$0x3] %v5018_v49 }
0x1795   :  { %v5087_v47 = vpop.f32.mrb[58].mxu0 }
0x1796   :  { %v5158_v43 = vadd.f32 %v5157_v14, %v5087_v47  ;;  %v8556_v46 = vpop.f32.mrb[59].mxu0 }
0x1798   :  { %v5161_v39 = vadd.f32 %v10845_v21, %v5158_v43 }
0x179a   :  { %5163 = vst [vmem:[#allocation7 + $0xc] sm:$0x3] %v5161_v39 }
0x179d   :  { %v5235_v53 = vpop.f32.mrb[60].mxu0 }
0x179e   :  { %v8578_v48 = vpop.f32.mrb[61].mxu0 }
0x17a5   :  { %v5381_v16 = vpop.f32.mrb[62].mxu0 }
0x17a6   :  { %v8600_v22 = vpop.f32.mrb[63].mxu0 }
0x17a7   :  { %v5308_v1 = vpop.f32.mrb[60].mxu1 }
0x17a8   :  { %v5309_v9 = vadd.f32 %v5308_v1, %v5235_v53  ;;  %v8589_v51 = vpop.f32.mrb[61].mxu1  ;;  %v5662_v53 = vld [vmem:[#allocation6 + $0x2] sm:$0x3] }
0x17aa   :  { %v5312_v55 = vadd.f32 %v10838_v10, %v5309_v9  ;;  %v5765_v9 = vld [vmem:[#allocation7 + $0xc] sm:$0x3] }
0x17ac   :  { %5314 = vst [vmem:[#allocation6 + $0xe] sm:$0x3] %v5312_v55 }
0x17ad   :  { %v5533_v61 = vpop.f32.mrb[64].mxu0 }
0x17ae   :  { %v5537_v63 = vadd.f32 %v5533_v61, %v5466_v60  ;;  %v8622_v24 = vpop.f32.mrb[65].mxu0 }
0x17af   :  { %v5451_v52 = vpop.f32.mrb[62].mxu1 }
0x17b0   :  { %9456 = vtanh.f32 %v5537_v63  ;;  %v5452_v32 = vadd.f32 %v5451_v52, %v5381_v16  ;;  %v8611_v4 = vpop.f32.mrb[63].mxu1  ;;  %v7458_v40 = vmul.f32 -1.442695, %v5537_v63 }
0x17b2   :  { %v5455_v14 = vadd.f32 %v10845_v21, %v5452_v32 }
0x17b4   :  { %5457 = vst [vmem:[#allocation7 + $0xe] sm:$0x3] %v5455_v14 }
0x17b7   :  { %v5631_v34 = vpop.f32.mrb[64].mxu1 }
0x17b8   :  { %v8633_v18 = vpop.f32.mrb[65].mxu1 }
0x17ba   :  { %v9457_v58 = vpop.eup %9456 }
0x17bb   :  { %v5564_v29 = vld [vmem:[#allocation7 + $0xe] sm:$0x3]  ;;  %5547 = vrot.lane.b32.xlu0 %v9457_v58, %s9612_s24 }
0x17bc   :  { %v5635_v28 = vadd.f32 %v5631_v34, %v5564_v29 }
0x17be   :  { %9458 = vtanh.f32 %v5635_v28  ;;  %v7459_v0 = vmul.f32 -1.442695, %v5635_v28 }
0x17bf   :  { %9460 = vpow2.f32 %v7458_v40 }
0x17c0   :  { %9462 = vpow2.f32 %v7459_v0 }
0x17c8   :  { %v9459_v10 = vpop.eup %9458 }
0x17c9   :  { %5645 = vrot.lane.b32.xlu1 %v9459_v10, %s9612_s24  ;;  %v9461_v50 = vpop.eup %9460 }
0x17ca   :  { %v5541_v6 = vadd.f32 1.0, %v9461_v50  ;;  %v9463_v21 = vpop.eup %9462 }
0x17cb   :  { %v5639_v15 = vadd.f32 1.0, %v9463_v21 }
0x17cc   :  { %9464 = vrcp.f32 %v5541_v6 }
0x17cd   :  { %9466 = vrcp.f32 %v5639_v15 }
0x17d6   :  { %v9465_v12 = vpop.eup %9464 }
0x17d7   :  { %v9467_v23 = vpop.eup %9466  ;;  %v5545_v33 = vmul.f32 0.0, %v9465_v12 }
0x17d8   :  { %v5643_v36 = vmul.f32 0.0, %v9467_v23 }
0x182d   :  { %v5548_v7 = vpop.permute.xlu0 %5547 }
0x182e   :  { %v5550_v17 = vmul.f32 %v9465_v12, %v5548_v7 }
0x1830   :  { %5552 = vrot.lane.b32.xlu0 %v5550_v17, %s9613_s2 }
0x183b   :  { %v5646_v13 = vpop.permute.xlu1 %5645 }
0x183c   :  { %v5648_v20 = vmul.f32 %v9467_v23, %v5646_v13 }
0x183e   :  { %5650 = vrot.lane.b32.xlu1 %v5648_v20, %s9613_s2 }
0x18a2   :  { %v5553_v38 = vpop.permute.xlu0 %5552 }
0x18a3   :  { %v10873_v37 = vadd.f32 %v5553_v38, %v5545_v33 }
0x18a5   :  { %9468 = vtanh.f32 %v10873_v37  ;;  %v10914_v40 = vsel %vm1395_vm6, %v10873_v37, 0.0 }
0x18af   :  { %v9469_v42 = vpop.eup %9468 }
0x18b0   :  { %5558 = vrot.lane.b32.xlu0 %v9469_v42, %s9612_s24  ;;  %v5651_v26 = vpop.permute.xlu1 %5650 }
0x18b1   :  { %v10877_v59 = vadd.f32 %v5651_v26, %v5643_v36 }
0x18b3   :  { %9470 = vtanh.f32 %v10877_v59  ;;  %v10923_v21 = vsel %vm1498_vm4, %v10877_v59, 0.0  ;;  %v5868_v59 = vld [vmem:[#allocation6 + $0x4] sm:$0x3] }
0x18bd   :  { %v9471_v27 = vpop.eup %9470 }
0x18be   :  { %5656 = vrot.lane.b32.xlu1 %v9471_v27, %s9612_s24 }
0x1922   :  { %v5559_v62 = vpop.permute.xlu0 %5558 }
0x1923   :  { %v5561_v56 = vmul.f32 %v9465_v12, %v5559_v62 }
0x1925   :  { %v10883_v41 = vsel %vm1395_vm6, %v5561_v56, 0.0 }
0x1926   :  { %5664 = vrot.lane.b32.xlu0 %v10883_v41, %s9613_s2 }
0x1930   :  { %v5657_v49 = vpop.permute.xlu1 %5656 }
0x1931   :  { %v5659_v47 = vmul.f32 %v9467_v23, %v5657_v49  ;;  %v5971_v49 = vld [vmem:[#allocation7 + $0xa] sm:$0x3] }
0x1933   :  { %v10889_v43 = vsel %vm1498_vm4, %v5659_v47, 0.0 }
0x1934   :  { %5767 = vrot.lane.b32.xlu1 %v10889_v43, %s9613_s2 }
0x1998   :  { %v5665_v46 = vpop.permute.xlu0 %5664 }
0x1999   :  { %8643 = vmatmul.mubr.msk.f32.vlgmr.msra.gmra.mrb[66].mxu0 %vm87_vm1, %v5665_v46 }
0x199a   :  { %9231 = vmatpush3.bf16.msra.mxu0 %v10769_v5  ;;  %8664 = vmatprep.mubr.msk.f32.mxu0 %vm9609_vm0, %v9610_v11 }
0x199b   :  { %9232 = vmatprep.subr.bf16.mxu0 %v9608_v3 }
0x199e   :  { %9234 = vmatpush3.bf16.msra.mxu0 %v10780_v25 }
0x199f   :  { %9241 = vmatprep.subr.bf16.mxu0 %v9608_v3 }
0x19a6   :  { %v5768_v39 = vpop.permute.xlu1 %5767 }
0x19a7   :  { %8654 = vmatmul.mubr.msk.f32.vlgmr.msra.gmra.mrb[66].mxu1 %vm87_vm1, %v5768_v39 }
0x19a8   :  { %9237 = vmatpush3.bf16.msra.mxu1 %v10801_v31  ;;  %8675 = vmatprep.mubr.msk.f32.mxu1 %vm9609_vm0, %v9610_v11 }
0x19a9   :  { %9238 = vmatprep.subr.bf16.mxu1 %v9608_v3 }
0x19ac   :  { %9240 = vmatpush3.bf16.msra.mxu1 %v10819_v8 }
0x19ad   :  { %9247 = vmatprep.subr.bf16.mxu1 %v9608_v3 }
0x1a6c   :  { %v5734_v48 = vpop.f32.mrb[66].mxu0 }
0x1a6d   :  { %v5738_v16 = vadd.f32 %v5734_v48, %v5662_v53  ;;  %v8644_v22 = vpop.f32.mrb[67].mxu0 }
0x1a6f   :  { %9472 = vtanh.f32 %v5738_v16  ;;  %v7461_v63 = vmul.f32 -1.442695, %v5738_v16 }
0x1a79   :  { %v9473_v1 = vpop.eup %9472 }
0x1a7a   :  { %5748 = vrot.lane.b32.xlu0 %v9473_v1, %s9612_s24  ;;  %v5837_v51 = vpop.f32.mrb[66].mxu1 }
0x1a7b   :  { %v5841_v55 = vadd.f32 %v5837_v51, %v5765_v9  ;;  %v8655_v60 = vpop.f32.mrb[67].mxu1 }
0x1a7d   :  { %9474 = vtanh.f32 %v5841_v55  ;;  %v7463_v52 = vmul.f32 -1.442695, %v5841_v55 }
0x1a7e   :  { %9476 = vpow2.f32 %v7461_v63 }
0x1a7f   :  { %9478 = vpow2.f32 %v7463_v52 }
0x1a87   :  { %v9475_v61 = vpop.eup %9474 }
0x1a88   :  { %5851 = vrot.lane.b32.xlu1 %v9475_v61, %s9612_s24  ;;  %v9477_v24 = vpop.eup %9476 }
0x1a89   :  { %v5742_v32 = vadd.f32 1.0, %v9477_v24  ;;  %v9479_v4 = vpop.eup %9478 }
0x1a8a   :  { %v5845_v34 = vadd.f32 1.0, %v9479_v4 }
0x1a8b   :  { %9480 = vrcp.f32 %v5742_v32 }
0x1a8c   :  { %9482 = vrcp.f32 %v5845_v34 }
0x1a95   :  { %v9481_v14 = vpop.eup %9480 }
0x1a96   :  { %v9483_v29 = vpop.eup %9482  ;;  %v5746_v50 = vmul.f32 %v9481_v14, %v10914_v40 }
0x1a97   :  { %v5849_v15 = vmul.f32 %v9483_v29, %v10923_v21 }
0x1aec   :  { %v5749_v18 = vpop.permute.xlu0 %5748 }
0x1aed   :  { %v5751_v58 = vmul.f32 %v9481_v14, %v5749_v18 }
0x1aef   :  { %5753 = vrot.lane.b32.xlu0 %v5751_v58, %s9613_s2 }
0x1afa   :  { %v5852_v28 = vpop.permute.xlu1 %5851 }
0x1afb   :  { %v5854_v10 = vmul.f32 %v9483_v29, %v5852_v28 }
0x1afd   :  { %5856 = vrot.lane.b32.xlu1 %v5854_v10, %s9613_s2 }
0x1b61   :  { %v5754_v0 = vpop.permute.xlu0 %5753 }
0x1b62   :  { %v10917_v6 = vadd.f32 %v5754_v0, %v5746_v50 }
0x1b64   :  { %9484 = vtanh.f32 %v10917_v6  ;;  %v10967_v52 = vsel %vm1617_vm10, %v10917_v6, %v10914_v40 }
0x1b6e   :  { %v9485_v12 = vpop.eup %9484 }
0x1b6f   :  { %5759 = vrot.lane.b32.xlu0 %v9485_v12, %s9612_s24  ;;  %v5857_v7 = vpop.permute.xlu1 %5856 }
0x1b70   :  { %v10927_v17 = vadd.f32 %v5857_v7, %v5849_v15 }
0x1b72   :  { %9486 = vtanh.f32 %v10927_v17  ;;  %v10977_v34 = vsel %vm1722_vm9, %v10927_v17, %v10923_v21  ;;  %v6074_v17 = vld [vmem:[#allocation6 + $0x6] sm:$0x3] }
0x1b7c   :  { %v9487_v23 = vpop.eup %9486 }
0x1b7d   :  { %5862 = vrot.lane.b32.xlu1 %v9487_v23, %s9612_s24 }
0x1be1   :  { %v5760_v13 = vpop.permute.xlu0 %5759 }
0x1be2   :  { %v5762_v20 = vmul.f32 %v9481_v14, %v5760_v13 }
0x1be4   :  { %v10934_v33 = vsel %vm1617_vm10, %v5762_v20, %v10883_v41 }
0x1be5   :  { %5870 = vrot.lane.b32.xlu0 %v10934_v33, %s9613_s2 }
0x1bef   :  { %v5863_v38 = vpop.permute.xlu1 %5862 }
0x1bf0   :  { %v5865_v37 = vmul.f32 %v9483_v29, %v5863_v38  ;;  %v6177_v38 = vld [vmem:[#allocation7 + $0x8] sm:$0x3] }
0x1bf2   :  { %v10941_v42 = vsel %vm1722_vm9, %v5865_v37, %v10889_v43 }
0x1bf3   :  { %5973 = vrot.lane.b32.xlu1 %v10941_v42, %s9613_s2 }
0x1c57   :  { %v5871_v36 = vpop.permute.xlu0 %5870 }
0x1c58   :  { %8665 = vmatmul.mubr.msk.f32.vlgmr.msra.gmra.mrb[68].mxu0 %vm87_vm1, %v5871_v36 }
0x1c59   :  { %9243 = vmatpush3.bf16.msra.mxu0 %v10769_v5  ;;  %8686 = vmatprep.mubr.msk.f32.mxu0 %vm9609_vm0, %v9610_v11 }
0x1c5a   :  { %9244 = vmatprep.subr.bf16.mxu0 %v9608_v3 }
0x1c5d   :  { %9246 = vmatpush3.bf16.msra.mxu0 %v10780_v25 }
0x1c5e   :  { %9253 = vmatprep.subr.bf16.mxu0 %v9608_v3 }
0x1c65   :  { %v5974_v26 = vpop.permute.xlu1 %5973 }
0x1c66   :  { %8676 = vmatmul.mubr.msk.f32.vlgmr.msra.gmra.mrb[68].mxu1 %vm87_vm1, %v5974_v26 }
0x1c67   :  { %9249 = vmatpush3.bf16.msra.mxu1 %v10801_v31  ;;  %8697 = vmatprep.mubr.msk.f32.mxu1 %vm9609_vm0, %v9610_v11 }
0x1c68   :  { %9250 = vmatprep.subr.bf16.mxu1 %v9608_v3 }
0x1c6b   :  { %9252 = vmatpush3.bf16.msra.mxu1 %v10819_v8 }
0x1c6c   :  { %9259 = vmatprep.subr.bf16.mxu1 %v9608_v3 }
0x1d2b   :  { %v5940_v27 = vpop.f32.mrb[68].mxu0 }
0x1d2c   :  { %v5944_v62 = vadd.f32 %v5940_v27, %v5868_v59  ;;  %v8666_v56 = vpop.f32.mrb[69].mxu0 }
0x1d2e   :  { %9488 = vtanh.f32 %v5944_v62  ;;  %v7465_v53 = vmul.f32 -1.442695, %v5944_v62 }
0x1d38   :  { %v9489_v41 = vpop.eup %9488 }
0x1d39   :  { %5954 = vrot.lane.b32.xlu0 %v9489_v41, %s9612_s24  ;;  %v6043_v47 = vpop.f32.mrb[68].mxu1 }
0x1d3a   :  { %v6047_v43 = vadd.f32 %v6043_v47, %v5971_v49  ;;  %v8677_v46 = vpop.f32.mrb[69].mxu1 }
0x1d3c   :  { %9490 = vtanh.f32 %v6047_v43  ;;  %v7467_v16 = vmul.f32 -1.442695, %v6047_v43 }
0x1d3d   :  { %9492 = vpow2.f32 %v7465_v53 }
0x1d3e   :  { %9494 = vpow2.f32 %v7467_v16 }
0x1d46   :  { %v9491_v39 = vpop.eup %9490 }
0x1d47   :  { %6057 = vrot.lane.b32.xlu1 %v9491_v39, %s9612_s24  ;;  %v9493_v48 = vpop.eup %9492 }
0x1d48   :  { %v5948_v22 = vadd.f32 1.0, %v9493_v48  ;;  %v9495_v1 = vpop.eup %9494 }
0x1d49   :  { %v6051_v51 = vadd.f32 1.0, %v9495_v1 }
0x1d4a   :  { %9496 = vrcp.f32 %v5948_v22 }
0x1d4b   :  { %9498 = vrcp.f32 %v6051_v51 }
0x1d54   :  { %v9497_v9 = vpop.eup %9496 }
0x1d55   :  { %v9499_v61 = vpop.eup %9498  ;;  %v5952_v32 = vmul.f32 %v9497_v9, %v10967_v52 }
0x1d56   :  { %v6055_v58 = vmul.f32 %v9499_v61, %v10977_v34 }
0x1dab   :  { %v5955_v55 = vpop.permute.xlu0 %5954 }
0x1dac   :  { %v5957_v60 = vmul.f32 %v9497_v9, %v5955_v55 }
0x1dae   :  { %5959 = vrot.lane.b32.xlu0 %v5957_v60, %s9613_s2 }
0x1db9   :  { %v6058_v63 = vpop.permute.xlu1 %6057 }
0x1dba   :  { %v6060_v24 = vmul.f32 %v9499_v61, %v6058_v63 }
0x1dbc   :  { %6062 = vrot.lane.b32.xlu1 %v6060_v24, %s9613_s2 }
0x1e20   :  { %v5960_v4 = vpop.permute.xlu0 %5959 }
0x1e21   :  { %v10970_v14 = vadd.f32 %v5960_v4, %v5952_v32 }
0x1e23   :  { %9500 = vtanh.f32 %v10970_v14  ;;  %v11021_v16 = vsel %vm1846_vm14, %v10970_v14, %v10967_v52 }
0x1e2d   :  { %v9501_v18 = vpop.eup %9500 }
0x1e2e   :  { %5965 = vrot.lane.b32.xlu0 %v9501_v18, %s9612_s24  ;;  %v6063_v29 = vpop.permute.xlu1 %6062 }
0x1e2f   :  { %v10981_v28 = vadd.f32 %v6063_v29, %v6055_v58 }
0x1e31   :  { %9502 = vtanh.f32 %v10981_v28  ;;  %v11031_v51 = vsel %vm1954_vm13, %v10981_v28, %v10977_v34  ;;  %v6280_v28 = vld [vmem:[#allocation6 + $0x8] sm:$0x3] }
0x1e3b   :  { %v9503_v10 = vpop.eup %9502 }
0x1e3c   :  { %6068 = vrot.lane.b32.xlu1 %v9503_v10, %s9612_s24 }
0x1ea0   :  { %v5966_v40 = vpop.permute.xlu0 %5965 }
0x1ea1   :  { %v5968_v50 = vmul.f32 %v9497_v9, %v5966_v40 }
0x1ea3   :  { %v10988_v0 = vsel %vm1846_vm14, %v5968_v50, %v10934_v33 }
0x1ea4   :  { %6076 = vrot.lane.b32.xlu0 %v10988_v0, %s9613_s2 }
0x1eae   :  { %v6069_v6 = vpop.permute.xlu1 %6068 }
0x1eaf   :  { %v6071_v21 = vmul.f32 %v9499_v61, %v6069_v6  ;;  %v6383_v6 = vld [vmem:[#allocation7 + $0x6] sm:$0x3] }
0x1eb1   :  { %v10995_v12 = vsel %vm1954_vm13, %v6071_v21, %v10941_v42 }
0x1eb2   :  { %6179 = vrot.lane.b32.xlu1 %v10995_v12, %s9613_s2 }
0x1f16   :  { %v6077_v15 = vpop.permute.xlu0 %6076 }
0x1f17   :  { %8687 = vmatmul.mubr.msk.f32.vlgmr.msra.gmra.mrb[70].mxu0 %vm87_vm1, %v6077_v15 }
0x1f18   :  { %9255 = vmatpush3.bf16.msra.mxu0 %v10769_v5  ;;  %8708 = vmatprep.mubr.msk.f32.mxu0 %vm9609_vm0, %v9610_v11 }
0x1f19   :  { %9256 = vmatprep.subr.bf16.mxu0 %v9608_v3 }
0x1f1c   :  { %9258 = vmatpush3.bf16.msra.mxu0 %v10780_v25 }
0x1f1d   :  { %9265 = vmatprep.subr.bf16.mxu0 %v9608_v3 }
0x1f24   :  { %v6180_v7 = vpop.permute.xlu1 %6179 }
0x1f25   :  { %8698 = vmatmul.mubr.msk.f32.vlgmr.msra.gmra.mrb[70].mxu1 %vm87_vm1, %v6180_v7 }
0x1f26   :  { %9261 = vmatpush3.bf16.msra.mxu1 %v10801_v31  ;;  %8719 = vmatprep.mubr.msk.f32.mxu1 %vm9609_vm0, %v9610_v11 }
0x1f27   :  { %9262 = vmatprep.subr.bf16.mxu1 %v9608_v3 }
0x1f2a   :  { %9264 = vmatpush3.bf16.msra.mxu1 %v10819_v8 }
0x1f2b   :  { %9271 = vmatprep.subr.bf16.mxu1 %v9608_v3 }
0x1fea   :  { %v6146_v23 = vpop.f32.mrb[70].mxu0 }
0x1feb   :  { %v6150_v13 = vadd.f32 %v6146_v23, %v6074_v17  ;;  %v8688_v20 = vpop.f32.mrb[71].mxu0 }
0x1fed   :  { %9504 = vtanh.f32 %v6150_v13  ;;  %v7469_v59 = vmul.f32 -1.442695, %v6150_v13 }
0x1ff7   :  { %v9505_v33 = vpop.eup %9504 }
0x1ff8   :  { %6160 = vrot.lane.b32.xlu0 %v9505_v33, %s9612_s24  ;;  %v6249_v37 = vpop.f32.mrb[70].mxu1 }
0x1ff9   :  { %v6253_v42 = vadd.f32 %v6249_v37, %v6177_v38  ;;  %v8699_v36 = vpop.f32.mrb[71].mxu1 }
0x1ffb   :  { %9506 = vtanh.f32 %v6253_v42  ;;  %v7471_v62 = vmul.f32 -1.442695, %v6253_v42 }
0x1ffc   :  { %9508 = vpow2.f32 %v7469_v59 }
0x1ffd   :  { %9510 = vpow2.f32 %v7471_v62 }
0x2005   :  { %v9507_v26 = vpop.eup %9506 }
0x2006   :  { %6263 = vrot.lane.b32.xlu1 %v9507_v26, %s9612_s24  ;;  %v9509_v27 = vpop.eup %9508 }
0x2007   :  { %v6154_v56 = vadd.f32 1.0, %v9509_v27  ;;  %v9511_v41 = vpop.eup %9510 }
0x2008   :  { %v6257_v47 = vadd.f32 1.0, %v9511_v41 }
0x2009   :  { %9512 = vrcp.f32 %v6154_v56 }
0x200a   :  { %9514 = vrcp.f32 %v6257_v47 }
0x2013   :  { %v9513_v49 = vpop.eup %9512 }
0x2014   :  { %v9515_v39 = vpop.eup %9514  ;;  %v6158_v22 = vmul.f32 %v9513_v49, %v11021_v16 }
0x2015   :  { %v6261_v60 = vmul.f32 %v9515_v39, %v11031_v51 }
0x206a   :  { %v6161_v43 = vpop.permute.xlu0 %6160 }
0x206b   :  { %v6163_v46 = vmul.f32 %v9513_v49, %v6161_v43 }
0x206d   :  { %6165 = vrot.lane.b32.xlu0 %v6163_v46, %s9613_s2 }
0x2078   :  { %v6264_v53 = vpop.permute.xlu1 %6263 }
0x2079   :  { %v6266_v48 = vmul.f32 %v9515_v39, %v6264_v53 }
0x207b   :  { %6268 = vrot.lane.b32.xlu1 %v6266_v48, %s9613_s2 }
0x20df   :  { %v6166_v1 = vpop.permute.xlu0 %6165 }
0x20e0   :  { %v11024_v9 = vadd.f32 %v6166_v1, %v6158_v22 }
0x20e2   :  { %9516 = vtanh.f32 %v11024_v9  ;;  %v11075_v62 = vsel %vm2078_vm7, %v11024_v9, %v11021_v16 }
0x20ec   :  { %v9517_v55 = vpop.eup %9516 }
0x20ed   :  { %6171 = vrot.lane.b32.xlu0 %v9517_v55, %s9612_s24  ;;  %v6269_v61 = vpop.permute.xlu1 %6268 }
0x20ee   :  { %v11035_v63 = vadd.f32 %v6269_v61, %v6261_v60 }
0x20f0   :  { %9518 = vtanh.f32 %v11035_v63  ;;  %v11085_v47 = vsel %vm2186_vm3, %v11035_v63, %v11031_v51  ;;  %v6486_v63 = vld [vmem:[#allocation6 + $0xa] sm:$0x3] }
0x20fa   :  { %v9519_v24 = vpop.eup %9518 }
0x20fb   :  { %6274 = vrot.lane.b32.xlu1 %v9519_v24, %s9612_s24 }
0x215f   :  { %v6172_v52 = vpop.permute.xlu0 %6171 }
0x2160   :  { %v6174_v32 = vmul.f32 %v9513_v49, %v6172_v52 }
0x2162   :  { %v11042_v4 = vsel %vm2078_vm7, %v6174_v32, %v10988_v0 }
0x2163   :  { %6282 = vrot.lane.b32.xlu0 %v11042_v4, %s9613_s2 }
0x216d   :  { %v6275_v14 = vpop.permute.xlu1 %6274 }
0x216e   :  { %v6277_v34 = vmul.f32 %v9515_v39, %v6275_v14  ;;  %v6589_v14 = vld [vmem:[#allocation7 + $0x4] sm:$0x3] }
0x2170   :  { %v11049_v18 = vsel %vm2186_vm3, %v6277_v34, %v10995_v12 }
0x2171   :  { %6385 = vrot.lane.b32.xlu1 %v11049_v18, %s9613_s2 }
0x21d5   :  { %v6283_v58 = vpop.permute.xlu0 %6282 }
0x21d6   :  { %8709 = vmatmul.mubr.msk.f32.vlgmr.msra.gmra.mrb[72].mxu0 %vm87_vm1, %v6283_v58 }
0x21d7   :  { %9267 = vmatpush3.bf16.msra.mxu0 %v10769_v5  ;;  %8730 = vmatprep.mubr.msk.f32.mxu0 %vm9609_vm0, %v9610_v11 }
0x21d8   :  { %9268 = vmatprep.subr.bf16.mxu0 %v9608_v3 }
0x21db   :  { %9270 = vmatpush3.bf16.msra.mxu0 %v10780_v25 }
0x21dc   :  { %9277 = vmatprep.subr.bf16.mxu0 %v9608_v3 }
0x21e3   :  { %v6386_v29 = vpop.permute.xlu1 %6385 }
0x21e4   :  { %8720 = vmatmul.mubr.msk.f32.vlgmr.msra.gmra.mrb[72].mxu1 %vm87_vm1, %v6386_v29 }
0x21e5   :  { %9273 = vmatpush3.bf16.msra.mxu1 %v10801_v31  ;;  %8741 = vmatprep.mubr.msk.f32.mxu1 %vm9609_vm0, %v9610_v11 }
0x21e6   :  { %9274 = vmatprep.subr.bf16.mxu1 %v9608_v3 }
0x21e9   :  { %9276 = vmatpush3.bf16.msra.mxu1 %v10819_v8 }
0x21ea   :  { %9283 = vmatprep.subr.bf16.mxu1 %v9608_v3 }
0x22a9   :  { %v6352_v10 = vpop.f32.mrb[72].mxu0 }
0x22aa   :  { %v6356_v40 = vadd.f32 %v6352_v10, %v6280_v28  ;;  %v8710_v50 = vpop.f32.mrb[73].mxu0 }
0x22ac   :  { %9520 = vtanh.f32 %v6356_v40  ;;  %v7473_v17 = vmul.f32 -1.442695, %v6356_v40 }
0x22b6   :  { %v9521_v0 = vpop.eup %9520 }
0x22b7   :  { %6366 = vrot.lane.b32.xlu0 %v9521_v0, %s9612_s24  ;;  %v6455_v21 = vpop.f32.mrb[72].mxu1 }
0x22b8   :  { %v6459_v12 = vadd.f32 %v6455_v21, %v6383_v6  ;;  %v8721_v15 = vpop.f32.mrb[73].mxu1 }
0x22ba   :  { %9522 = vtanh.f32 %v6459_v12  ;;  %v7475_v13 = vmul.f32 -1.442695, %v6459_v12 }
0x22bb   :  { %9524 = vpow2.f32 %v7473_v17 }
0x22bc   :  { %9526 = vpow2.f32 %v7475_v13 }
0x22c4   :  { %v9523_v7 = vpop.eup %9522 }
0x22c5   :  { %6469 = vrot.lane.b32.xlu1 %v9523_v7, %s9612_s24  ;;  %v9525_v23 = vpop.eup %9524 }
0x22c6   :  { %v6360_v20 = vadd.f32 1.0, %v9525_v23  ;;  %v9527_v33 = vpop.eup %9526 }
0x22c7   :  { %v6463_v37 = vadd.f32 1.0, %v9527_v33 }
0x22c8   :  { %9528 = vrcp.f32 %v6360_v20 }
0x22c9   :  { %9530 = vrcp.f32 %v6463_v37 }
0x22d2   :  { %v9529_v38 = vpop.eup %9528 }
0x22d3   :  { %v9531_v26 = vpop.eup %9530  ;;  %v6364_v56 = vmul.f32 %v9529_v38, %v11075_v62 }
0x22d4   :  { %v6467_v46 = vmul.f32 %v9531_v26, %v11085_v47 }
0x2329   :  { %v6367_v42 = vpop.permute.xlu0 %6366 }
0x232a   :  { %v6369_v36 = vmul.f32 %v9529_v38, %v6367_v42 }
0x232c   :  { %6371 = vrot.lane.b32.xlu0 %v6369_v36, %s9613_s2 }
0x2337   :  { %v6470_v59 = vpop.permute.xlu1 %6469 }
0x2338   :  { %v6472_v27 = vmul.f32 %v9531_v26, %v6470_v59 }
0x233a   :  { %6474 = vrot.lane.b32.xlu1 %v6472_v27, %s9613_s2 }
0x239e   :  { %v6372_v41 = vpop.permute.xlu0 %6371 }
0x239f   :  { %v11078_v49 = vadd.f32 %v6372_v41, %v6364_v56 }
0x23a1   :  { %9532 = vtanh.f32 %v11078_v49  ;;  %v11129_v13 = vsel %vm2186_vm3, %v11078_v49, %v11075_v62 }
0x23ab   :  { %v9533_v43 = vpop.eup %9532 }
0x23ac   :  { %6377 = vrot.lane.b32.xlu0 %v9533_v43, %s9612_s24  ;;  %v6475_v39 = vpop.permute.xlu1 %6474 }
0x23ad   :  { %v11089_v53 = vadd.f32 %v6475_v39, %v6467_v46 }
0x23af   :  { %9534 = vtanh.f32 %v11089_v53  ;;  %v11139_v37 = vsel %vm2078_vm7, %v11089_v53, %v11085_v47 }
0x23b9   :  { %v9535_v48 = vpop.eup %9534 }
0x23ba   :  { %6480 = vrot.lane.b32.xlu1 %v9535_v48, %s9612_s24  ;;  %v6795_v48 = vld [vmem:[#allocation7 + $0x2] sm:$0x3] }
0x241e   :  { %v6378_v16 = vpop.permute.xlu0 %6377 }
0x241f   :  { %v6380_v22 = vmul.f32 %v9529_v38, %v6378_v16 }
0x2421   :  { %v11096_v1 = vsel %vm2186_vm3, %v6380_v22, %v11042_v4 }
0x2422   :  { %6488 = vrot.lane.b32.xlu0 %v11096_v1, %s9613_s2 }
0x242c   :  { %v6481_v9 = vpop.permute.xlu1 %6480 }
0x242d   :  { %v6483_v51 = vmul.f32 %v9531_v26, %v6481_v9 }
0x242f   :  { %v11103_v55 = vsel %vm2078_vm7, %v6483_v51, %v11049_v18 }
0x2430   :  { %6591 = vrot.lane.b32.xlu1 %v11103_v55, %s9613_s2 }
0x2494   :  { %v6489_v60 = vpop.permute.xlu0 %6488 }
0x2495   :  { %8731 = vmatmul.mubr.msk.f32.vlgmr.msra.gmra.mrb[74].mxu0 %vm87_vm1, %v6489_v60 }
0x2496   :  { %9279 = vmatpush3.bf16.msra.mxu0 %v10769_v5  ;;  %8752 = vmatprep.mubr.msk.f32.mxu0 %vm9609_vm0, %v9610_v11 }
0x2497   :  { %9280 = vmatprep.subr.bf16.mxu0 %v9608_v3 }
0x249a   :  { %9282 = vmatpush3.bf16.msra.mxu0 %v10780_v25 }
0x249b   :  { %9289 = vmatprep.subr.bf16.mxu0 %v9608_v3 }
0x24a2   :  { %v6592_v61 = vpop.permute.xlu1 %6591 }
0x24a3   :  { %8742 = vmatmul.mubr.msk.f32.vlgmr.msra.gmra.mrb[74].mxu1 %vm87_vm1, %v6592_v61 }
0x24a4   :  { %9285 = vmatpush3.bf16.msra.mxu1 %v10801_v31  ;;  %8763 = vmatprep.mubr.msk.f32.mxu1 %vm9609_vm0, %v9610_v11 }
0x24a5   :  { %9286 = vmatprep.subr.bf16.mxu1 %v9608_v3 }
0x24a8   :  { %9288 = vmatpush3.bf16.msra.mxu1 %v10819_v8 }
0x24a9   :  { %9295 = vmatprep.subr.bf16.mxu1 %v9608_v3 }
0x2568   :  { %v6558_v24 = vpop.f32.mrb[74].mxu0 }
0x2569   :  { %v6562_v52 = vadd.f32 %v6558_v24, %v6486_v63  ;;  %v8732_v32 = vpop.f32.mrb[75].mxu0 }
0x256b   :  { %9536 = vtanh.f32 %v6562_v52  ;;  %v7477_v28 = vmul.f32 -1.442695, %v6562_v52 }
0x2575   :  { %v9537_v4 = vpop.eup %9536 }
0x2576   :  { %6572 = vrot.lane.b32.xlu0 %v9537_v4, %s9612_s24  ;;  %v6661_v34 = vpop.f32.mrb[74].mxu1 }
0x2577   :  { %v6665_v18 = vadd.f32 %v6661_v34, %v6589_v14  ;;  %v8743_v58 = vpop.f32.mrb[75].mxu1 }
0x2579   :  { %9538 = vtanh.f32 %v6665_v18  ;;  %v7479_v40 = vmul.f32 -1.442695, %v6665_v18 }
0x257a   :  { %9540 = vpow2.f32 %v7477_v28 }
0x257b   :  { %9542 = vpow2.f32 %v7479_v40 }
0x2583   :  { %v9539_v29 = vpop.eup %9538 }
0x2584   :  { %6675 = vrot.lane.b32.xlu1 %v9539_v29, %s9612_s24  ;;  %v9541_v10 = vpop.eup %9540 }
0x2585   :  { %v6566_v50 = vadd.f32 1.0, %v9541_v10  ;;  %v9543_v0 = vpop.eup %9542 }
0x2586   :  { %v6669_v21 = vadd.f32 1.0, %v9543_v0 }
0x2587   :  { %9544 = vrcp.f32 %v6566_v50 }
0x2588   :  { %9546 = vrcp.f32 %v6669_v21 }
0x2591   :  { %v9545_v6 = vpop.eup %9544 }
0x2592   :  { %v9547_v7 = vpop.eup %9546  ;;  %v6570_v20 = vmul.f32 %v9545_v6, %v11129_v13 }
0x2593   :  { %v6673_v36 = vmul.f32 %v9547_v7, %v11139_v37 }
0x25e8   :  { %v6573_v12 = vpop.permute.xlu0 %6572 }
0x25e9   :  { %v6575_v15 = vmul.f32 %v9545_v6, %v6573_v12 }
0x25eb   :  { %6577 = vrot.lane.b32.xlu0 %v6575_v15, %s9613_s2 }
0x25f6   :  { %v6676_v17 = vpop.permute.xlu1 %6675 }
0x25f7   :  { %v6678_v23 = vmul.f32 %v9547_v7, %v6676_v17 }
0x25f9   :  { %6680 = vrot.lane.b32.xlu1 %v6678_v23, %s9613_s2 }
0x265d   :  { %v6578_v33 = vpop.permute.xlu0 %6577 }
0x265e   :  { %v11132_v38 = vadd.f32 %v6578_v33, %v6570_v20 }
0x2660   :  { %9548 = vtanh.f32 %v11132_v38  ;;  %v6588_v34 = vsel %vm1954_vm13, %v11132_v38, %v11129_v13  ;;  %v6898_v13 = vld [vmem:[#allocation6 + $0xe] sm:$0x3] }
0x266a   :  { %v9549_v42 = vpop.eup %9548 }
0x266b   :  { %6583 = vrot.lane.b32.xlu0 %v9549_v42, %s9612_s24  ;;  %v6681_v19 = vpop.permute.xlu1 %6680  ;;  %v7000_v42 = vld [vmem:[#allocation7] sm:$0x3] }
0x266c   :  { %v11143_v26 = vadd.f32 %v6681_v19, %v6673_v36 }
0x266e   :  { %9550 = vtanh.f32 %v11143_v26  ;;  %v6691_v28 = vsel %vm1846_vm14, %v11143_v26, %v11139_v37 }
0x2678   :  { %v9551_v59 = vpop.eup %9550 }
0x2679   :  { %6686 = vrot.lane.b32.xlu1 %v9551_v59, %s9612_s24 }
0x26dd   :  { %v6584_v27 = vpop.permute.xlu0 %6583 }
0x26de   :  { %v6586_v62 = vmul.f32 %v9545_v6, %v6584_v27 }
0x26e0   :  { %v11150_v35 = vsel %vm1954_vm13, %v6586_v62, %v11096_v1 }
0x26e1   :  { %6694 = vrot.lane.b32.xlu0 %v11150_v35, %s9613_s2 }
0x26eb   :  { %v6687_v56 = vpop.permute.xlu1 %6686 }
0x26ec   :  { %v6689_v41 = vmul.f32 %v9547_v7, %v6687_v56 }
0x26ee   :  { %v11157_v49 = vsel %vm1846_vm14, %v6689_v41, %v11103_v55 }
0x26ef   :  { %6797 = vrot.lane.b32.xlu1 %v11157_v49, %s9613_s2 }
0x2753   :  { %v6695_v47 = vpop.permute.xlu0 %6694 }
0x2754   :  { %8753 = vmatmul.mubr.msk.f32.vlgmr.msra.gmra.mrb[76].mxu0 %vm87_vm1, %v6695_v47 }
0x2755   :  { %9291 = vmatpush3.bf16.msra.mxu0 %v10769_v5  ;;  %8774 = vmatprep.mubr.msk.f32.mxu0 %vm9609_vm0, %v9610_v11  ;;  %v6692_v5 = vld [vmem:[#allocation6 + $0xc] sm:$0x3] }
0x2756   :  { %9292 = vmatprep.subr.bf16.mxu0 %v9608_v3 }
0x2759   :  { %9294 = vmatpush3.bf16.msra.mxu0 %v10780_v25 }
0x275a   :  { %9301 = vmatprep.subr.bf16.mxu0 %v9608_v3 }
0x2761   :  { %v6798_v43 = vpop.permute.xlu1 %6797 }
0x2762   :  { %8764 = vmatmul.mubr.msk.f32.vlgmr.msra.gmra.mrb[76].mxu1 %vm87_vm1, %v6798_v43 }
0x2763   :  { %9297 = vmatpush3.bf16.msra.mxu1 %v10801_v31  ;;  %8785 = vmatprep.mubr.msk.f32.mxu1 %vm9609_vm0, %v9610_v11 }
0x2764   :  { %9298 = vmatprep.subr.bf16.mxu1 %v9608_v3 }
0x2767   :  { %9300 = vmatpush3.bf16.msra.mxu1 %v10819_v8 }
0x2768   :  { %9307 = vmatprep.subr.bf16.mxu1 %v9608_v3 }
0x2827   :  { %v6764_v46 = vpop.f32.mrb[76].mxu0 }
0x2828   :  { %v6768_v39 = vadd.f32 %v6764_v46, %v6692_v5  ;;  %v8754_v25 = vpop.f32.mrb[77].mxu0 }
0x282a   :  { %9552 = vtanh.f32 %v6768_v39  ;;  %v7481_v9 = vmul.f32 -1.442695, %v6768_v39 }
0x2834   :  { %v9553_v53 = vpop.eup %9552 }
0x2835   :  { %6778 = vrot.lane.b32.xlu0 %v9553_v53, %s9612_s24  ;;  %v6867_v16 = vpop.f32.mrb[76].mxu1 }
0x2836   :  { %v6871_v31 = vadd.f32 %v6867_v16, %v6795_v48  ;;  %v8765_v22 = vpop.f32.mrb[77].mxu1 }
0x2838   :  { %9554 = vtanh.f32 %v6871_v31  ;;  %v7483_v51 = vmul.f32 -1.442695, %v6871_v31 }
0x2839   :  { %9556 = vpow2.f32 %v7481_v9 }
0x283a   :  { %9558 = vpow2.f32 %v7483_v51 }
0x2842   :  { %v9555_v1 = vpop.eup %9554 }
0x2843   :  { %6881 = vrot.lane.b32.xlu1 %v9555_v1, %s9612_s24  ;;  %v9557_v8 = vpop.eup %9556 }
0x2844   :  { %v6772_v55 = vadd.f32 1.0, %v9557_v8  ;;  %v9559_v60 = vpop.eup %9558 }
0x2845   :  { %v6875_v63 = vadd.f32 1.0, %v9559_v60 }
0x2846   :  { %9560 = vrcp.f32 %v6772_v55  ;;  %v7102_v55 = vld [vmem:[%s11306_s16] sm:$0xff] }
0x2847   :  { %9562 = vrcp.f32 %v6875_v63  ;;  %v9308_v60 = vpack.c.bf16 %v7103_v44, %v7102_v55 }
0x2850   :  { %v9561_v61 = vpop.eup %9560 }
0x2851   :  { %v9563_v32 = vpop.eup %9562  ;;  %v6776_v18 = vmul.f32 %v9561_v61, %v6588_v34 }
0x2852   :  { %v6879_v40 = vmul.f32 %v9563_v32, %v6691_v28 }
0x28a7   :  { %v6779_v24 = vpop.permute.xlu0 %6778 }
0x28a8   :  { %v6781_v52 = vmul.f32 %v9561_v61, %v6779_v24 }
0x28aa   :  { %6783 = vrot.lane.b32.xlu0 %v6781_v52, %s9613_s2  ;;  %v7106_v52 = vld [vmem:[%s11307_s17] sm:$0xff] }
0x28b5   :  { %v6882_v4 = vpop.permute.xlu1 %6881 }
0x28b6   :  { %v6884_v14 = vmul.f32 %v9563_v32, %v6882_v4  ;;  %v7108_v4 = vld [vmem:[%s11307_s17 + $0x10] sm:$0xff] }
0x28b8   :  { %6886 = vrot.lane.b32.xlu1 %v6884_v14, %s9613_s2 }
0x291c   :  { %v6784_v58 = vpop.permute.xlu0 %6783 }
0x291d   :  { %v6786_v29 = vadd.f32 %v6784_v58, %v6776_v18 }
0x291f   :  { %9564 = vtanh.f32 %v6786_v29  ;;  %v6794_v53 = vsel %vm1722_vm9, %v6786_v29, %v6588_v34  ;;  %v7109_v34 = vld [vmem:[%s11307_s17 + $0x18] sm:$0xff] }
0x2920   :  { %v9305_v18 = vpack.c.bf16 %v7109_v34, %v7108_v4 }
0x2929   :  { %v9565_v10 = vpop.eup %9564 }
0x292a   :  { %6789 = vrot.lane.b32.xlu0 %v9565_v10, %s9612_s24  ;;  %v6887_v50 = vpop.permute.xlu1 %6886 }
0x292b   :  { %v6889_v0 = vadd.f32 %v6887_v50, %v6879_v40 }
0x292d   :  { %9566 = vtanh.f32 %v6889_v0  ;;  %v6897_v22 = vsel %vm1617_vm10, %v6889_v0, %v6691_v28 }
0x2937   :  { %v9567_v6 = vpop.eup %9566 }
0x2938   :  { %6892 = vrot.lane.b32.xlu1 %v9567_v6, %s9612_s24 }
0x299c   :  { %v6790_v30 = vpop.permute.xlu0 %6789 }
0x299d   :  { %v6792_v21 = vmul.f32 %v9561_v61, %v6790_v30  ;;  %v7105_v61 = vld [vmem:[%s11306_s16 + $0x18] sm:$0xff]  ;;  %v9314_v30 = vpack.c.bf16 %v7270_v2, %v7269_v57 }
0x299e   :  { %v9311_v63 = vpack.c.bf16 %v7105_v61, %v7104_v54 }
0x299f   :  { %v11192_v12 = vsel %vm1722_vm9, %v6792_v21, %v11150_v35  ;;  %v7271_v21 = vld [vmem:[%s11309_s19 + $0x10] sm:$0xff] }
0x29a0   :  { %6900 = vrot.lane.b32.xlu0 %v11192_v12, %s9613_s2 }
0x29aa   :  { %v6893_v45 = vpop.permute.xlu1 %6892 }
0x29ab   :  { %v6895_v15 = vmul.f32 %v9563_v32, %v6893_v45  ;;  %v7107_v32 = vld [vmem:[%s11307_s17 + $0x8] sm:$0xff] }
0x29ac   :  { %v9302_v14 = vpack.c.bf16 %v7107_v32, %v7106_v52 }
0x29ad   :  { %v11199_v7 = vsel %vm1617_vm10, %v6895_v15, %v11157_v49 }
0x29ae   :  { %7002 = vrot.lane.b32.xlu1 %v11199_v7, %s9613_s2 }
0x2a12   :  { %v6901_v17 = vpop.permute.xlu0 %6900 }
0x2a13   :  { %8775 = vmatmul.mubr.msk.f32.vlgmr.msra.gmra.mrb[78].mxu0 %vm87_vm1, %v6901_v17  ;;  %v7490_v17 = vld [vmem:[%s11308_s18] ss:$0 sm:$0xff] }
0x2a14   :  { %8796 = vmatprep.mubr.msk.f32.mxu0 %vm9609_vm0, %v9610_v11  ;;  %9303 = vmatpush3.bf16.msra.mxu0 %v9302_v14 }
0x2a15   :  { %9304 = vmatprep.subr.bf16.mxu0 %v9608_v3 }
0x2a18   :  { %9306 = vmatpush3.bf16.msra.mxu0 %v9305_v18 }
0x2a19   :  { %9313 = vmatprep.subr.bf16.mxu0 %v9608_v3 }
0x2a20   :  { %v7003_v23 = vpop.permute.xlu1 %7002 }
0x2a21   :  { %8786 = vmatmul.mubr.msk.f32.vlgmr.msra.gmra.mrb[78].mxu1 %vm87_vm1, %v7003_v23 }
0x2a22   :  { %8807 = vmatprep.mubr.msk.f32.mxu1 %vm9609_vm0, %v9610_v11  ;;  %9309 = vmatpush3.bf16.msra.mxu1 %v9308_v60 }
0x2a23   :  { %9310 = vmatprep.subr.bf16.mxu1 %v9608_v3 }
0x2a26   :  { %9312 = vmatpush3.bf16.msra.mxu1 %v9311_v63 }
0x2ae6   :  { %v6970_v20 = vpop.f32.mrb[78].mxu0 }
0x2ae7   :  { %v6974_v33 = vadd.f32 %v6970_v20, %v6898_v13  ;;  %v8776_v38 = vpop.f32.mrb[79].mxu0 }
0x2ae9   :  { %9568 = vtanh.f32 %v6974_v33  ;;  %v7485_v27 = vmul.f32 -1.442695, %v6974_v33  ;;  %v7491_v33 = vld [vmem:[%s11310_s20] ss:$0 sm:$0xff] }
0x2af3   :  { %v9569_v37 = vpop.eup %9568 }
0x2af4   :  { %6984 = vrot.lane.b32.xlu0 %v9569_v37, %s9612_s24  ;;  %v7072_v36 = vpop.f32.mrb[78].mxu1 }
0x2af5   :  { %v7076_v19 = vadd.f32 %v7072_v36, %v7000_v42  ;;  %v8787_v26 = vpop.f32.mrb[79].mxu1 }
0x2af7   :  { %9570 = vtanh.f32 %v7076_v19  ;;  %v7487_v35 = vmul.f32 -1.442695, %v7076_v19 }
0x2af8   :  { %9572 = vpow2.f32 %v7485_v27 }
0x2af9   :  { %9574 = vpow2.f32 %v7487_v35 }
0x2b01   :  { %v9571_v59 = vpop.eup %9570 }
0x2b02   :  { %7086 = vrot.lane.b32.xlu1 %v9571_v59, %s9612_s24  ;;  %v9573_v62 = vpop.eup %9572 }
0x2b03   :  { %v6978_v56 = vadd.f32 1.0, %v9573_v62  ;;  %v9575_v41 = vpop.eup %9574 }
0x2b04   :  { %v7080_v47 = vadd.f32 1.0, %v9575_v41 }
0x2b05   :  { %9576 = vrcp.f32 %v6978_v56 }
0x2b06   :  { %9578 = vrcp.f32 %v7080_v47 }
0x2b0f   :  { %v9577_v49 = vpop.eup %9576 }
0x2b10   :  { %v9579_v46 = vpop.eup %9578  ;;  %v6982_v48 = vmul.f32 %v9577_v49, %v6794_v53 }
0x2b11   :  { %v7084_v9 = vmul.f32 %v9579_v46, %v6897_v22 }
0x2b66   :  { %v6985_v43 = vpop.permute.xlu0 %6984 }
0x2b67   :  { %v6987_v5 = vmul.f32 %v9577_v49, %v6985_v43 }
0x2b69   :  { %6989 = vrot.lane.b32.xlu0 %v6987_v5, %s9613_s2 }
0x2b74   :  { %v7087_v39 = vpop.permute.xlu1 %7086 }
0x2b75   :  { %v7089_v25 = vmul.f32 %v9579_v46, %v7087_v39 }
0x2b77   :  { %7091 = vrot.lane.b32.xlu1 %v7089_v25, %s9613_s2 }
0x2bdb   :  { %v6990_v16 = vpop.permute.xlu0 %6989 }
0x2bdc   :  { %v6992_v31 = vadd.f32 %v6990_v16, %v6982_v48 }
0x2bde   :  { %9580 = vtanh.f32 %v6992_v31 }
0x2be8   :  { %v9581_v1 = vpop.eup %9580 }
0x2be9   :  { %6995 = vrot.lane.b32.xlu0 %v9581_v1, %s9612_s24  ;;  %v7092_v8 = vpop.permute.xlu1 %7091 }
0x2bea   :  { %v7094_v51 = vadd.f32 %v7092_v8, %v7084_v9 }
0x2bec   :  { %9582 = vtanh.f32 %v7094_v51 }
0x2bf6   :  { %v9583_v24 = vpop.eup %9582 }
0x2bf7   :  { %7097 = vrot.lane.b32.xlu1 %v9583_v24, %s9612_s24 }
0x2c5b   :  { %v6996_v58 = vpop.permute.xlu0 %6995 }
0x2c5c   :  { %v6998_v29 = vmul.f32 %v9577_v49, %v6996_v58 }
0x2c5e   :  { %v6999_v28 = vsel %vm1498_vm4, %v6998_v29, %v11192_v12 }
0x2c5f   :  { %7186 = vrot.lane.b32.xlu1 %v6999_v28, %s9613_s2 }
0x2c69   :  { %v7098_v10 = vpop.permute.xlu1 %7097 }
0x2c6a   :  { %v7100_v40 = vmul.f32 %v9579_v46, %v7098_v10 }
0x2c6c   :  { %v7101_v50 = vsel %vm1395_vm6, %v7100_v40, %v11199_v7 }
0x2c6d   :  { %7111 = vrot.lane.b32.xlu0 %v7101_v50, %s9613_s2 }
0x2cd1   :  { %v7187_v0 = vpop.permute.xlu1 %7186 }
0x2cd2   :  { %8808 = vmatmul.mubr.msk.f32.vlgmr.msra.gmra.mrb[80].mxu1 %vm87_vm1, %v7187_v0 }
0x2cdf   :  { %v7112_v6 = vpop.permute.xlu0 %7111 }
0x2ce0   :  { %8797 = vmatmul.mubr.msk.f32.vlgmr.msra.gmra.mrb[80].mxu0 %vm87_vm1, %v7112_v6 }
0x2ce1   :  { %8818 = vmatprep.mubr.msk.f32.mxu0 %vm9609_vm0, %v9610_v11  ;;  %9315 = vmatpush3.bf16.msra.mxu0 %v9314_v30  ;;  %v7272_v11 = vld [vmem:[%s11309_s19 + $0x18] sm:$0xff]  ;;  %s9614_s19 = smov [#allocation8]   ;;  %vm7353_vm0 = vcmask 25600  }
0x2ce2   :  { %9316 = vmatprep.subr.bf16.mxu0 %v9608_v3  ;;  %v9317_v12 = vpack.c.bf16 %v7272_v11, %v7271_v21  ;;  %s7361_s14 = sshll.u32 %s9614_s19, 4  ;;  %s7362_s14 = int_to_ptr.vmem [resolvable:$true] %s7361_s14 }
0x2ce3   :  { %s9584_s6 = scalar_lea.vmem %s7362_s14, 32  ;;  %p9589_p1 = scmp.lt.s32.totalorder %s7362_s14, %s7362_s14 }
0x2ce4   :  { %p9585_p0 = scmp.ne.s32.totalorder %s7362_s14, %s9584_s6  ;;  %p9590_p2 = scmp.lt.s32.totalorder %s9584_s6, %s9584_s6 }
0x2ce5   :  { %9318 = vmatpush3.bf16.msra.mxu0 %v9317_v12 }
0x2ce6   :  { %p9591_p3 = por %p9590_p2, %p9589_p1 }
0x2ce8   :  { %p9592_p4 = pnand %p9591_p3, %p9585_p0 }
0x2da5   :  { %v7256_v45 = vpop.f32.mrb[80].mxu1 }
0x2da6   :  { %v8809_v15 = vpop.f32.mrb[81].mxu1 }
0x2db3   :  { %v7181_v7 = vpop.f32.mrb[80].mxu0 }
0x2db4   :  { %v7257_v23 = vadd.f32 %v7256_v45, %v7181_v7  ;;  %v8798_v13 = vpop.f32.mrb[81].mxu0 }
0x2db6   :  { %v7267_v3 = vadd.f32 %v7490_v17, %v7257_v23 }
0x2db8   :  { %v7268_v20 = vmax.f32 %v7267_v3, 0.0 }
0x2dba   :  { %8819 = vmatmul.mubr.msk.f32.vlgmr.msra.gmra.mrb[82].mxu0 %vm87_vm1, %v7268_v20 }
0x2e8d   :  { %v7349_v38 = vpop.f32.mrb[82].mxu0 }
0x2e8e   :  { %v7350_v37 = vadd.f32 %v7491_v33, %v7349_v38  ;;  %v8820_v42 = vpop.f32.mrb[83].mxu0 }
0x2e90   :  { %7354 = vst.msk [vmem:[#allocation8] sm:$0x3] %vm7353_vm0, %v7350_v37 }
0x2e91   :  { %9595 = shalt.err (!%p9592_p4)
}
0x2e92   :  { %s9596_s23 = scalar_lea.hbm %s11311_s21, 32 }
0x2e93   :  { %p9597_p5 = scmp.ne.s32.totalorder %s11311_s21, %s9596_s23  ;;  %p9600_p6 = scmp.lt.u32.totalorder %s9596_s23, %s11311_s21 }
0x2e95   :  { %p9602_p7 = pnand %p9600_p6, %p9597_p5 }
0x2e97   :  { %9605 = shalt.err (!%p9602_p7)
}
0x2e98   :  { %7364 = dma.vmem_to_hbm [thread:$0]  %s7362_s14, 32, %s11311_s21, [#allocation9]  }
0x2e99   :  { %9606 = dma.done.wait [#allocation9], 32  }
0x2e9a   :  { %9607 = vsyncadd [#allocation9], 4294967264 }
0x2e9b   :  { %7368 = vsyncpa [#allocation9], 1 }

</bundles_post_ra>
